<compile_context>
chip_gen: v6e
topology: v6e:2x2x1
jax: 0.10.0
libtpu: 0.0.40
codegen_flags: <defaults>
</compile_context>

<pallas_src>
import jax
import jax.numpy as jnp
from jax.experimental import pallas as pl
from jax.experimental.pallas import tpu as pltpu

LN_EPS = 1e-5  # PyTorch nn.LayerNorm default
LANE = 128
SUBLANE = 8


def _round_up(x, m):
    return (x + m - 1) // m * m


def net_kernel(obs_ref, w1_ref, b1_ref, g_ref, beta_ref,
               w2_ref, b2_ref, w3_ref, b3_ref, out_ref):
    # ---- Linear 1: bf16 x bf16 on MXU, f32 accumulate ----
    x = obs_ref[...].astype(jnp.bfloat16)
    h = jnp.dot(x, w1_ref[...], preferred_element_type=jnp.float32) + b1_ref[...]

    # ---- LayerNorm over last dim (biased variance, PyTorch semantics), f32 ----
    mean = jnp.mean(h, axis=-1, keepdims=True)
    centered = h - mean
    var = jnp.mean(centered * centered, axis=-1, keepdims=True)
    h = centered * jax.lax.rsqrt(var + LN_EPS)
    h = h * g_ref[...] + beta_ref[...]

    # ---- Tanh (EUP, f32) ----
    h = jnp.tanh(h)

    # ---- Linear 2 + ReLU ----
    h = jnp.dot(h.astype(jnp.bfloat16), w2_ref[...],
                preferred_element_type=jnp.float32) + b2_ref[...]
    h = jnp.maximum(h, 0.0)

    # ---- Linear 3 (N padded to 128 lanes) + final tanh ----
    h = jnp.dot(h.astype(jnp.bfloat16), w3_ref[...],
                preferred_element_type=jnp.float32) + b3_ref[...]
    out_ref[...] = jnp.tanh(h).astype(out_ref.dtype)


def net_forward(obs, params, action_dim, *, batch_tile=128):
    """obs: (B, obs_dim) f32. params: dict from init_params (bf16 weights,
    w3/b3 pre-padded to a multiple of 128 output lanes). Returns (B, action_dim) f32."""
    B, obs_dim = obs.shape
    H = params["w1"].shape[1]
    n_pad = params["w3"].shape[1]  # lane-padded output width

    # Batch tile: 128 rows when the batch is big enough (pipelined, megacore-
    # parallel), otherwise a single sublane-aligned tile.
    tm = batch_tile if B >= batch_tile else _round_up(B, SUBLANE)
    b_pad = _round_up(B, tm)
    if b_pad != B:
        obs = jnp.pad(obs, ((0, b_pad - B), (0, 0)))
    n_tiles = b_pad // tm

    in_specs = [
        pl.BlockSpec((tm, obs_dim), lambda i: (i, 0)),   # obs: tiled over batch
        pl.BlockSpec((obs_dim, H), lambda i: (0, 0)),    # w1 (bf16)
        pl.BlockSpec((1, H), lambda i: (0, 0)),          # b1 (f32)
        pl.BlockSpec((1, H), lambda i: (0, 0)),          # gamma (f32)
        pl.BlockSpec((1, H), lambda i: (0, 0)),          # beta (f32)
        pl.BlockSpec((H, H), lambda i: (0, 0)),          # w2 (bf16)
        pl.BlockSpec((1, H), lambda i: (0, 0)),          # b2 (f32)
        pl.BlockSpec((H, n_pad), lambda i: (0, 0)),      # w3 padded (bf16)
        pl.BlockSpec((1, n_pad), lambda i: (0, 0)),      # b3 padded (f32)
    ]
    out_spec = pl.BlockSpec((tm, n_pad), lambda i: (i, 0))

    out = pl.pallas_call(
        net_kernel,
        out_shape=jax.ShapeDtypeStruct((b_pad, n_pad), jnp.float32),
        grid=(n_tiles,),
        in_specs=in_specs,
        out_specs=out_spec,
        compiler_params=pltpu.CompilerParams(
            dimension_semantics=("parallel",),
            vmem_limit_bytes=16 << 20,
        ),
    )(obs, params["w1"], params["b1"], params["gamma"], params["beta"],
      params["w2"], params["b2"], params["w3"], params["b3"])

    return out[:B, :action_dim]


def init_params(key, obs_dim, action_dim, hidden_dim=1024):
    """Weights pre-transposed to (in_features, out_features); matmul weights in
    bf16; final layer padded to a multiple of 128 output columns (zeros)."""
    ks = jax.random.split(key, 6)
    scale = 0.02
    n_pad = _round_up(action_dim, LANE)

    w3 = jax.random.normal(ks[4], (hidden_dim, action_dim), jnp.float32) * scale
    b3 = jax.random.normal(ks[5], (1, action_dim), jnp.float32) * scale
    w3 = jnp.pad(w3, ((0, 0), (0, n_pad - action_dim)))
    b3 = jnp.pad(b3, ((0, 0), (0, n_pad - action_dim)))

    return {
        "w1": (jax.random.normal(ks[0], (obs_dim, hidden_dim), jnp.float32)
               * scale).astype(jnp.bfloat16),
        "b1": jax.random.normal(ks[1], (1, hidden_dim), jnp.float32) * scale,
        "gamma": jnp.ones((1, hidden_dim), jnp.float32),
        "beta": jnp.zeros((1, hidden_dim), jnp.float32),
        "w2": (jax.random.normal(ks[2], (hidden_dim, hidden_dim), jnp.float32)
               * scale).astype(jnp.bfloat16),
        "b2": jax.random.normal(ks[3], (1, hidden_dim), jnp.float32) * scale,
        "w3": w3.astype(jnp.bfloat16),
        "b3": b3,
    }


def reference_forward(obs, p, action_dim):
    """Pure-JAX reference with PyTorch Net semantics, using the same bf16
    quantization points as the kernel (weights + matmul inputs), f32 math."""
    f32 = jnp.float32
    q = lambda x: x.astype(jnp.bfloat16).astype(f32)
    w1, w2, w3 = p["w1"].astype(f32), p["w2"].astype(f32), p["w3"].astype(f32)

    h = q(obs) @ w1 + p["b1"]
    mean = jnp.mean(h, axis=-1, keepdims=True)
    var = jnp.mean((h - mean) ** 2, axis=-1, keepdims=True)
    h = (h - mean) / jnp.sqrt(var + LN_EPS) * p["gamma"] + p["beta"]
    h = jnp.tanh(h)
    h = jnp.maximum(q(h) @ w2 + p["b2"], 0.0)
    h = q(h) @ w3 + p["b3"]
    return jnp.tanh(h)[:, :action_dim]


if __name__ == "__main__":
    key = jax.random.PRNGKey(0)
    k_obs, k_params = jax.random.split(key)

    B, obs_dim, action_dim = 8, 32, 8
    obs = jax.random.normal(k_obs, (B, obs_dim), jnp.float32)
    params = init_params(k_params, obs_dim, action_dim)

    out = jax.block_until_ready(net_forward(obs, params, action_dim))
    ref = reference_forward(obs, params, action_dim)

    assert out.shape == (B, action_dim)
    assert jnp.allclose(out, ref, atol=1e-3, rtol=1e-3), "mismatch vs reference"

    print("KERNEL_OK")
</pallas_src>

<mosaic_0001>
module attributes {stable_mosaic.version = 11 : i64} {
  func.func @net_kernel(%arg0: i32, %arg1: memref<8x32xf32, #tpu.memory_space<vmem>>, %arg2: memref<32x1024xbf16, #tpu.memory_space<vmem>>, %arg3: memref<1x1024xf32, #tpu.memory_space<vmem>>, %arg4: memref<1x1024xf32, #tpu.memory_space<vmem>>, %arg5: memref<1x1024xf32, #tpu.memory_space<vmem>>, %arg6: memref<1024x1024xbf16, #tpu.memory_space<vmem>>, %arg7: memref<1x1024xf32, #tpu.memory_space<vmem>>, %arg8: memref<1024x128xbf16, #tpu.memory_space<vmem>>, %arg9: memref<1x128xf32, #tpu.memory_space<vmem>>, %arg10: memref<8x128xf32, #tpu.memory_space<vmem>>) attributes {dimension_semantics = [#tpu.dimension_semantics<parallel>], iteration_bounds = array<i64: 1>, scalar_prefetch = 0 : i64, scratch_operands = 0 : i64, tpu.core_type = #tpu.core_type<tc>, window_params = [{transform_indices = @transform_0, window_bounds = array<i64: 8, 32>}, {pipeline_mode = #tpu.pipeline_mode<synchronous>, transform_indices = @transform_1, window_bounds = array<i64: 32, 1024>}, {pipeline_mode = #tpu.pipeline_mode<synchronous>, transform_indices = @transform_2, window_bounds = array<i64: 1, 1024>}, {pipeline_mode = #tpu.pipeline_mode<synchronous>, transform_indices = @transform_3, window_bounds = array<i64: 1, 1024>}, {pipeline_mode = #tpu.pipeline_mode<synchronous>, transform_indices = @transform_4, window_bounds = array<i64: 1, 1024>}, {pipeline_mode = #tpu.pipeline_mode<synchronous>, transform_indices = @transform_5, window_bounds = array<i64: 1024, 1024>}, {pipeline_mode = #tpu.pipeline_mode<synchronous>, transform_indices = @transform_6, window_bounds = array<i64: 1, 1024>}, {pipeline_mode = #tpu.pipeline_mode<synchronous>, transform_indices = @transform_7, window_bounds = array<i64: 1024, 128>}, {pipeline_mode = #tpu.pipeline_mode<synchronous>, transform_indices = @transform_8, window_bounds = array<i64: 1, 128>}, {transform_indices = @transform_9, window_bounds = array<i64: 8, 128>}]} {
    %c0 = arith.constant 0 : index
    %c0_0 = arith.constant 0 : index
    %0 = vector.load %arg1[%c0, %c0_0] : memref<8x32xf32, #tpu.memory_space<vmem>>, vector<8x32xf32>
    %1 = arith.truncf %0 : vector<8x32xf32> to vector<8x32xbf16>
    %c0_1 = arith.constant 0 : index
    %c0_2 = arith.constant 0 : index
    %2 = vector.load %arg2[%c0_1, %c0_2] : memref<32x1024xbf16, #tpu.memory_space<vmem>>, vector<32x1024xbf16>
    %cst = arith.constant dense<0.000000e+00> : vector<8x1024xf32>
    %3 = tpu.matmul %1, %2, %cst {dimension_numbers = #tpu.dot_dimension_numbers<[1], [0], [0], [1], [0, 0, 1, 1], [], []>} : vector<8x32xbf16>, vector<32x1024xbf16>, vector<8x1024xf32> -> vector<8x1024xf32>
    %c0_3 = arith.constant 0 : index
    %c0_4 = arith.constant 0 : index
    %4 = vector.load %arg3[%c0_3, %c0_4] : memref<1x1024xf32, #tpu.memory_space<vmem>>, vector<1x1024xf32>
    %5 = vector.broadcast %4 : vector<1x1024xf32> to vector<8x1024xf32>
    %6 = arith.addf %3, %5 : vector<8x1024xf32>
    %cst_5 = arith.constant dense<0.000000e+00> : vector<8xf32>
    %7 = vector.multi_reduction <add>, %6, %cst_5 [1] : vector<8x1024xf32> to vector<8xf32>
    %8 = vector.shape_cast %7 : vector<8xf32> to vector<8x1xf32>
    %cst_6 = arith.constant 1.024000e+03 : f32
    %9 = vector.broadcast %cst_6 : f32 to vector<8x1xf32>
    %10 = arith.divf %8, %9 : vector<8x1xf32>
    %11 = vector.broadcast %10 : vector<8x1xf32> to vector<8x1024xf32>
    %12 = arith.subf %6, %11 : vector<8x1024xf32>
    %13 = arith.mulf %12, %12 : vector<8x1024xf32>
    %cst_7 = arith.constant dense<0.000000e+00> : vector<8xf32>
    %14 = vector.multi_reduction <add>, %13, %cst_7 [1] : vector<8x1024xf32> to vector<8xf32>
    %15 = vector.shape_cast %14 : vector<8xf32> to vector<8x1xf32>
    %cst_8 = arith.constant 1.024000e+03 : f32
    %16 = vector.broadcast %cst_8 : f32 to vector<8x1xf32>
    %17 = arith.divf %15, %16 : vector<8x1xf32>
    %cst_9 = arith.constant 9.99999974E-6 : f32
    %18 = vector.broadcast %cst_9 : f32 to vector<8x1xf32>
    %19 = arith.addf %17, %18 : vector<8x1xf32>
    %20 = math.rsqrt %19 : vector<8x1xf32>
    %21 = vector.broadcast %20 : vector<8x1xf32> to vector<8x1024xf32>
    %22 = arith.mulf %12, %21 : vector<8x1024xf32>
    %c0_10 = arith.constant 0 : index
    %c0_11 = arith.constant 0 : index
    %23 = vector.load %arg4[%c0_10, %c0_11] : memref<1x1024xf32, #tpu.memory_space<vmem>>, vector<1x1024xf32>
    %24 = vector.broadcast %23 : vector<1x1024xf32> to vector<8x1024xf32>
    %25 = arith.mulf %22, %24 : vector<8x1024xf32>
    %c0_12 = arith.constant 0 : index
    %c0_13 = arith.constant 0 : index
    %26 = vector.load %arg5[%c0_12, %c0_13] : memref<1x1024xf32, #tpu.memory_space<vmem>>, vector<1x1024xf32>
    %27 = vector.broadcast %26 : vector<1x1024xf32> to vector<8x1024xf32>
    %28 = arith.addf %25, %27 : vector<8x1024xf32>
    %29 = math.tanh %28 : vector<8x1024xf32>
    %30 = arith.truncf %29 : vector<8x1024xf32> to vector<8x1024xbf16>
    %c0_14 = arith.constant 0 : index
    %c0_15 = arith.constant 0 : index
    %31 = vector.load %arg6[%c0_14, %c0_15] : memref<1024x1024xbf16, #tpu.memory_space<vmem>>, vector<1024x1024xbf16>
    %cst_16 = arith.constant dense<0.000000e+00> : vector<8x1024xf32>
    %32 = tpu.matmul %30, %31, %cst_16 {dimension_numbers = #tpu.dot_dimension_numbers<[1], [0], [0], [1], [0, 0, 1, 1], [], []>} : vector<8x1024xbf16>, vector<1024x1024xbf16>, vector<8x1024xf32> -> vector<8x1024xf32>
    %c0_17 = arith.constant 0 : index
    %c0_18 = arith.constant 0 : index
    %33 = vector.load %arg7[%c0_17, %c0_18] : memref<1x1024xf32, #tpu.memory_space<vmem>>, vector<1x1024xf32>
    %34 = vector.broadcast %33 : vector<1x1024xf32> to vector<8x1024xf32>
    %35 = arith.addf %32, %34 : vector<8x1024xf32>
    %cst_19 = arith.constant 0.000000e+00 : f32
    %36 = vector.broadcast %cst_19 : f32 to vector<8x1024xf32>
    %37 = arith.maximumf %35, %36 : vector<8x1024xf32>
    %38 = arith.truncf %37 : vector<8x1024xf32> to vector<8x1024xbf16>
    %c0_20 = arith.constant 0 : index
    %c0_21 = arith.constant 0 : index
    %39 = vector.load %arg8[%c0_20, %c0_21] : memref<1024x128xbf16, #tpu.memory_space<vmem>>, vector<1024x128xbf16>
    %cst_22 = arith.constant dense<0.000000e+00> : vector<8x128xf32>
    %40 = tpu.matmul %38, %39, %cst_22 {dimension_numbers = #tpu.dot_dimension_numbers<[1], [0], [0], [1], [0, 0, 1, 1], [], []>} : vector<8x1024xbf16>, vector<1024x128xbf16>, vector<8x128xf32> -> vector<8x128xf32>
    %c0_23 = arith.constant 0 : index
    %c0_24 = arith.constant 0 : index
    %41 = vector.load %arg9[%c0_23, %c0_24] : memref<1x128xf32, #tpu.memory_space<vmem>>, vector<1x128xf32>
    %42 = vector.broadcast %41 : vector<1x128xf32> to vector<8x128xf32>
    %43 = arith.addf %40, %42 : vector<8x128xf32>
    %44 = math.tanh %43 : vector<8x128xf32>
    %c0_25 = arith.constant 0 : index
    %c0_26 = arith.constant 0 : index
    %45 = vector.load %arg10[%c0_25, %c0_26] : memref<8x128xf32, #tpu.memory_space<vmem>>, vector<8x128xf32>
    tpu.vector_store %arg10[%c0_25, %c0_26], %44 {strides = array<i32>} : memref<8x128xf32, #tpu.memory_space<vmem>>, vector<8x128xf32>,
    return
  }
  func.func @transform_0(%arg0: i32) -> (i32, i32) {
    %c0_i32 = arith.constant 0 : i32
    %c0_i32_0 = arith.constant 0 : i32
    return %arg0, %c0_i32 : i32, i32
  }
  func.func @transform_1(%arg0: i32) -> (i32, i32) {
    %c0_i32 = arith.constant 0 : i32
    %c0_i32_0 = arith.constant 0 : i32
    %c0_i32_1 = arith.constant 0 : i32
    return %c0_i32, %c0_i32_0 : i32, i32
  }
  func.func @transform_2(%arg0: i32) -> (i32, i32) {
    %c0_i32 = arith.constant 0 : i32
    %c0_i32_0 = arith.constant 0 : i32
    %c0_i32_1 = arith.constant 0 : i32
    return %c0_i32, %c0_i32_0 : i32, i32
  }
  func.func @transform_3(%arg0: i32) -> (i32, i32) {
    %c0_i32 = arith.constant 0 : i32
    %c0_i32_0 = arith.constant 0 : i32
    %c0_i32_1 = arith.constant 0 : i32
    return %c0_i32, %c0_i32_0 : i32, i32
  }
  func.func @transform_4(%arg0: i32) -> (i32, i32) {
    %c0_i32 = arith.constant 0 : i32
    %c0_i32_0 = arith.constant 0 : i32
    %c0_i32_1 = arith.constant 0 : i32
    return %c0_i32, %c0_i32_0 : i32, i32
  }
  func.func @transform_5(%arg0: i32) -> (i32, i32) {
    %c0_i32 = arith.constant 0 : i32
    %c0_i32_0 = arith.constant 0 : i32
    %c0_i32_1 = arith.constant 0 : i32
    return %c0_i32, %c0_i32_0 : i32, i32
  }
  func.func @transform_6(%arg0: i32) -> (i32, i32) {
    %c0_i32 = arith.constant 0 : i32
    %c0_i32_0 = arith.constant 0 : i32
    %c0_i32_1 = arith.constant 0 : i32
    return %c0_i32, %c0_i32_0 : i32, i32
  }
  func.func @transform_7(%arg0: i32) -> (i32, i32) {
    %c0_i32 = arith.constant 0 : i32
    %c0_i32_0 = arith.constant 0 : i32
    %c0_i32_1 = arith.constant 0 : i32
    return %c0_i32, %c0_i32_0 : i32, i32
  }
  func.func @transform_8(%arg0: i32) -> (i32, i32) {
    %c0_i32 = arith.constant 0 : i32
    %c0_i32_0 = arith.constant 0 : i32
    %c0_i32_1 = arith.constant 0 : i32
    return %c0_i32, %c0_i32_0 : i32, i32
  }
  func.func @transform_9(%arg0: i32) -> (i32, i32) {
    %c0_i32 = arith.constant 0 : i32
    %c0_i32_0 = arith.constant 0 : i32
    return %arg0, %c0_i32 : i32, i32
  }
}

</mosaic_0001>

<bundles_post_ra>
// kernel: tpu_custom_call.1
= control target key start
LH: loop header
LB: loop body
LE: loop exit
PB: predicated region body
PF: predicated region fallthrough
CT: control target
= control target key end

     0   :  { %14 = vsyncpa [#allocation3], 0  ;;  %s6438_s0 = inlined_call_operand.hbm [shape: f32[8,32], index: 0, kind: input, shape index: {}]   ;;  %s6439_s1 = inlined_call_operand.hbm [shape: bf16[32,1024], index: 1, kind: input, shape index: {}]   ;;  %s6440_s2 = inlined_call_operand.hbm [shape: f32[1,1024], index: 2, kind: input, shape index: {}]   ;;  %s6441_s3 = inlined_call_operand.hbm [shape: f32[1,1024], index: 3, kind: input, shape index: {}]   ;;  %s6442_s4 = inlined_call_operand.hbm [shape: f32[1,1024], index: 4, kind: input, shape index: {}]   ;;  %s6443_s5 = inlined_call_operand.hbm [shape: bf16[1024,1024], index: 5, kind: input, shape index: {}]   ;;  %s6444_s6 = inlined_call_operand.hbm [shape: f32[1,1024], index: 6, kind: input, shape index: {}]   ;;  %s6445_s7 = inlined_call_operand.hbm [shape: bf16[1024,128], index: 7, kind: input, shape index: {}]   ;;  %s6446_s8 = inlined_call_operand.hbm [shape: f32[1,128], index: 8, kind: input, shape index: {}]   ;;  %s6447_s9 = inlined_call_operand.hbm [shape: f32[8,128], index: 9, kind: output, shape index: {}]  }
   0x1   :  { %15 = vsyncpa [#allocation6], 0 }
   0x2   :  { %16 = vsyncpa [#allocation9], 0 }
   0x3   :  { %17 = vsyncpa [#allocation12], 0 }
   0x4   :  { %18 = vsyncpa [#allocation15], 0 }
   0x5   :  { %19 = vsyncpa [#allocation4], 0  ;;  %s6098_s30 = smov [#allocation5]  }
   0x6   :  { %s35_s10 = sshll.u32 %s6098_s30, 4  ;;  %s36_s10 = int_to_ptr.vmem [resolvable:$true] %s35_s10 }
   0x7   :  { %s5894_s11 = scalar_lea.vmem %s36_s10, 2048  ;;  %p5899_p1 = scmp.lt.s32.totalorder %s36_s10, %s36_s10 }
   0x8   :  { %p5895_p0 = scmp.ne.s32.totalorder %s36_s10, %s5894_s11  ;;  %p5900_p2 = scmp.lt.s32.totalorder %s5894_s11, %s5894_s11 }
   0xa   :  { %p5901_p3 = por %p5900_p2, %p5899_p1 }
   0xc   :  { %p5902_p4 = pnand %p5901_p3, %p5895_p0 }
   0xe   :  { %5905 = shalt.err (!%p5902_p4)
}
   0xf   :  { %s6099_s12 = smov 512   ;;  %s6100_s13 = smov 32  }
  0x10   :  { %41 = dma.hbm_to_vmem [thread:$0]  %s6439_s1, 2048, %s36_s10, [#allocation6], %s6099_s12, %s6099_s12, %s6100_s13  }
  0x11   :  { %s6101_s16 = smov [#allocation8]   ;;  %s6102_s18 = smov [#allocation11]  }
  0x12   :  { %s58_s17 = sshll.u32 %s6101_s16, 4  ;;  %s77_s19 = sshll.u32 %s6102_s18, 4  ;;  %s59_s17 = int_to_ptr.vmem [resolvable:$true] %s58_s17  ;;  %s78_s19 = int_to_ptr.vmem [resolvable:$true] %s77_s19 }
  0x13   :  { %s5914_s20 = scalar_lea.vmem %s59_s17, 128  ;;  %p5919_p6 = scmp.lt.s32.totalorder %s59_s17, %s59_s17 }
  0x14   :  { %p5915_p5 = scmp.ne.s32.totalorder %s59_s17, %s5914_s20  ;;  %p5920_p7 = scmp.lt.s32.totalorder %s5914_s20, %s5914_s20 }
  0x16   :  { %p5921_p8 = por %p5920_p7, %p5919_p6 }
  0x18   :  { %p5922_p9 = pnand %p5921_p8, %p5915_p5 }
  0x1a   :  { %5925 = shalt.err (!%p5922_p9)
}
  0x1b   :  { %61 = dma.hbm_to_vmem [thread:$0]  %s6441_s3, 128, %s59_s17, [#allocation9]  }
  0x1c   :  { %s5934_s23 = scalar_lea.vmem %s78_s19, 65536  ;;  %p5939_p11 = scmp.lt.s32.totalorder %s78_s19, %s78_s19 }
  0x1d   :  { %p5935_p10 = scmp.ne.s32.totalorder %s78_s19, %s5934_s23  ;;  %p5940_p12 = scmp.lt.s32.totalorder %s5934_s23, %s5934_s23 }
  0x1f   :  { %p5941_p13 = por %p5940_p12, %p5939_p11 }
  0x21   :  { %p5942_p0 = pnand %p5941_p13, %p5935_p10 }
  0x23   :  { %5945 = shalt.err (!%p5942_p0)
}
  0x24   :  { %83 = dma.hbm_to_vmem [thread:$0]  %s6443_s5, 65536, %s78_s19, [#allocation12], %s6099_s12, %s6099_s12, %s6100_s13  }
  0x25   :  { %s6103_s25 = smov [#allocation14]  }
  0x26   :  { %s99_s26 = sshll.u32 %s6103_s25, 4  ;;  %s100_s26 = int_to_ptr.vmem [resolvable:$true] %s99_s26 }
  0x27   :  { %s5954_s27 = scalar_lea.vmem %s100_s26, 8192  ;;  %p5959_p2 = scmp.lt.s32.totalorder %s100_s26, %s100_s26 }
  0x28   :  { %p5955_p1 = scmp.ne.s32.totalorder %s100_s26, %s5954_s27  ;;  %p5960_p3 = scmp.lt.s32.totalorder %s5954_s27, %s5954_s27 }
  0x2a   :  { %p5961_p4 = por %p5960_p3, %p5959_p2 }
  0x2c   :  { %p5962_p5 = pnand %p5961_p4, %p5955_p1 }
  0x2e   :  { %5965 = shalt.err (!%p5962_p5)
}
  0x2f   :  { %s6104_s3 = smov 64   ;;  %s6105_s28 = smov 4  }
  0x30   :  { %105 = dma.hbm_to_vmem [thread:$0]  %s6445_s7, 8192, %s100_s26, [#allocation15], %s6104_s3, %s6104_s3, %s6105_s28  }
  0x31   :  { %s6106_s10 = smov [#allocation2]   ;;  %s6107_s14 = smov [#allocation7]  }
  0x32   :  { %s26_s11 = sshll.u32 %s6106_s10, 4  ;;  %s48_s5 = sshll.u32 %s6107_s14, 4  ;;  %s27_s11 = int_to_ptr.vmem [resolvable:$true] %s26_s11  ;;  %s49_s5 = int_to_ptr.vmem [resolvable:$true] %s48_s5 }
  0x33   :  { %s5974_s12 = scalar_lea.vmem %s27_s11, 128  ;;  %p5979_p7 = scmp.lt.s32.totalorder %s27_s11, %s27_s11 }
  0x34   :  { %p5975_p6 = scmp.ne.s32.totalorder %s27_s11, %s5974_s12  ;;  %p5980_p8 = scmp.lt.s32.totalorder %s5974_s12, %s5974_s12 }
  0x36   :  { %p5981_p9 = por %p5980_p8, %p5979_p7 }
  0x38   :  { %p5982_p10 = pnand %p5981_p9, %p5975_p6 }
  0x3a   :  { %5985 = shalt.err (!%p5982_p10)
}
  0x3b   :  { %29 = dma.hbm_to_vmem [thread:$0]  %s6438_s0, 128, %s27_s11, [#allocation3]  }
  0x3c   :  { %s5994_s16 = scalar_lea.vmem %s49_s5, 128  ;;  %p5999_p12 = scmp.lt.s32.totalorder %s49_s5, %s49_s5 }
  0x3d   :  { %p5995_p11 = scmp.ne.s32.totalorder %s49_s5, %s5994_s16  ;;  %p6000_p13 = scmp.lt.s32.totalorder %s5994_s16, %s5994_s16 }
  0x3f   :  { %p6001_p0 = por %p6000_p13, %p5999_p12 }
  0x41   :  { %p6002_p1 = pnand %p6001_p0, %p5995_p11 }
  0x43   :  { %6005 = shalt.err (!%p6002_p1)
}
  0x44   :  { %51 = dma.hbm_to_vmem [thread:$0]  %s6440_s2, 128, %s49_s5, [#allocation6]  }
  0x45   :  { %s6108_s18 = smov [#allocation10]   ;;  %s6109_s20 = smov [#allocation13]  }
  0x46   :  { %s68_s19 = sshll.u32 %s6108_s18, 4  ;;  %s90_s21 = sshll.u32 %s6109_s20, 4  ;;  %s69_s19 = int_to_ptr.vmem [resolvable:$true] %s68_s19  ;;  %s91_s21 = int_to_ptr.vmem [resolvable:$true] %s90_s21 }
  0x47   :  { %s6014_s22 = scalar_lea.vmem %s69_s19, 128  ;;  %p6019_p3 = scmp.lt.s32.totalorder %s69_s19, %s69_s19 }
  0x48   :  { %p6015_p2 = scmp.ne.s32.totalorder %s69_s19, %s6014_s22  ;;  %p6020_p4 = scmp.lt.s32.totalorder %s6014_s22, %s6014_s22 }
  0x4a   :  { %p6021_p5 = por %p6020_p4, %p6019_p3 }
  0x4c   :  { %p6022_p6 = pnand %p6021_p5, %p6015_p2 }
  0x4e   :  { %6025 = shalt.err (!%p6022_p6)
}
  0x4f   :  { %71 = dma.hbm_to_vmem [thread:$0]  %s6442_s4, 128, %s69_s19, [#allocation9]  }
  0x50   :  { %s6034_s1 = scalar_lea.vmem %s91_s21, 128  ;;  %p6039_p8 = scmp.lt.s32.totalorder %s91_s21, %s91_s21 }
  0x51   :  { %p6035_p7 = scmp.ne.s32.totalorder %s91_s21, %s6034_s1  ;;  %p6040_p9 = scmp.lt.s32.totalorder %s6034_s1, %s6034_s1 }
  0x53   :  { %p6041_p10 = por %p6040_p9, %p6039_p8 }
  0x55   :  { %p6042_p11 = pnand %p6041_p10, %p6035_p7 }
  0x57   :  { %6045 = shalt.err (!%p6042_p11)
}
  0x58   :  { %93 = dma.hbm_to_vmem [thread:$0]  %s6444_s6, 128, %s91_s21, [#allocation12]  }
  0x59   :  { %s6110_s25 = smov [#allocation16]  }
  0x5a   :  { %s112_s26 = sshll.u32 %s6110_s25, 4  ;;  %s113_s26 = int_to_ptr.vmem [resolvable:$true] %s112_s26 }
  0x5b   :  { %s6054_s27 = scalar_lea.vmem %s113_s26, 16  ;;  %s6058_s3 = scalar_lea.vmem %s113_s26, 32 }
  0x5c   :  { %p6055_p12 = scmp.ne.s32.totalorder %s113_s26, %s6054_s27  ;;  %p6059_p13 = scmp.lt.s32.totalorder %s113_s26, %s113_s26 }
  0x5d   :  { %p6060_p0 = scmp.lt.s32.totalorder %s6058_s3, %s6054_s27 }
  0x5f   :  { %p6061_p1 = por %p6060_p0, %p6059_p13 }
  0x61   :  { %p6062_p2 = pnand %p6061_p1, %p6055_p12 }
  0x63   :  { %6065 = shalt.err (!%p6062_p2)
}
  0x64   :  { %115 = dma.hbm_to_vmem [thread:$0]  %s6446_s8, 16, %s113_s26, [#allocation15]  }
  0x65   :  { %6086 = dma.done.wait [#allocation3], 128  }
  0x66   :  { %6087 = vsyncadd [#allocation3], 4294967168 }
  0x67   :  { %6088 = dma.done.wait [#allocation6], 2176  }
  0x68   :  { %6089 = vsyncadd [#allocation6], 4294965120 }
  0x69   :  { %6090 = dma.done.wait [#allocation9], 256  }
  0x6a   :  { %6091 = vsyncadd [#allocation9], 4294967040 }
  0x6b   :  { %6092 = dma.done.wait [#allocation12], 65664  }
  0x6c   :  { %6093 = vsyncadd [#allocation12], 4294901632 }
  0x6d   :  { %6094 = dma.done.wait [#allocation15], 8208  }
  0x6e   :  { %6095 = vsyncadd [#allocation15], 4294959088  ;;  %v6111_v0 = vmov 0   ;;  %v154_v1 = vld [vmem:[#allocation5 + $0x40] sm:$0xff]  ;;  %v155_v3 = vld [vmem:[#allocation5 + $0x48] sm:$0xff]  ;;  %vm284_vm0 = vcmask 261120   ;;  %v164_v35 = vlaneseq }
  0x6f   :  { %320 = vmatprep.mubr.bf16.mxu0 %v6111_v0  ;;  %361 = vmatprep.mubr.bf16.mxu1 %v6111_v0  ;;  %v158_v2 = vld [vmem:[#allocation5 + $0x60] sm:$0xff]  ;;  %v159_v5 = vld [vmem:[#allocation5 + $0x68] sm:$0xff]  ;;  %v156_v15 = vld [vmem:[#allocation5 + $0x50] sm:$0xff]  ;;  %s6112_s6 = smov [#allocation17]  }
  0x70   :  { %v5110_v4 = vcombine.high %v154_v1, %v158_v2  ;;  %v5109_v6 = vcombine.low %v154_v1, %v158_v2  ;;  %v146_v7 = vld [vmem:[#allocation5] sm:$0xff]  ;;  %v5112_v9 = vcombine.high %v155_v3, %v159_v5  ;;  %v5111_v10 = vcombine.low %v155_v3, %v159_v5  ;;  %v147_v12 = vld [vmem:[#allocation5 + $0x8] sm:$0xff]  ;;  %v160_v16 = vld [vmem:[#allocation5 + $0x70] sm:$0xff]  ;;  %s5088_s8 = sshll.u32 %s6112_s6, 4  ;;  %s5089_s8 = int_to_ptr.vmem [resolvable:$true] %s5088_s8 }
  0x71   :  { %v150_v8 = vld [vmem:[#allocation5 + $0x20] sm:$0xff]  ;;  %v151_v13 = vld [vmem:[#allocation5 + $0x28] sm:$0xff]  ;;  %v157_v17 = vld [vmem:[#allocation5 + $0x58] sm:$0xff]  ;;  %v5114_v23 = vcombine.high %v156_v15, %v160_v16  ;;  %v5113_v29 = vcombine.low %v156_v15, %v160_v16  ;;  %v165_v36 = vshrl.u32 %v164_v35, 7  ;;  %s6066_s29 = scalar_lea.vmem %s5089_s8, 128  ;;  %p6071_p4 = scmp.lt.s32.totalorder %s5089_s8, %s5089_s8 }
  0x72   :  { %v5102_v11 = vcombine.high %v146_v7, %v150_v8  ;;  %300 = vmatprep.subr.bf16.mxu0 %v5110_v4  ;;  %v5104_v14 = vcombine.high %v147_v12, %v151_v13  ;;  %341 = vmatprep.subr.bf16.mxu1 %v5112_v9  ;;  %v5101_v18 = vcombine.low %v146_v7, %v150_v8  ;;  %v144_v19 = vld [vmem:[#allocation2] sm:$0xff]  ;;  %v148_v21 = vld [vmem:[#allocation5 + $0x10] sm:$0xff]  ;;  %v162_v40 = vld [vmem:[#allocation7] sm:$0xff]  ;;  %p6067_p3 = scmp.ne.s32.totalorder %s5089_s8, %s6066_s29  ;;  %p6072_p5 = scmp.lt.s32.totalorder %s6066_s29, %s6066_s29 }
  0x73   :  { %301 = vmatpush1.bf16.msra.mxu0 %v5109_v6  ;;  %v161_v20 = vld [vmem:[#allocation5 + $0x78] sm:$0xff]  ;;  %342 = vmatpush1.bf16.msra.mxu1 %v5111_v10  ;;  %v5103_v22 = vcombine.low %v147_v12, %v151_v13  ;;  %v152_v24 = vld [vmem:[#allocation5 + $0x30] sm:$0xff]  ;;  %v145_v28 = vpack.c.bf16 %v144_v19, %v144_v19  ;;  %v6194_v37 = vsub.s32 0, %v165_v36  ;;  %v6196_v38 = vsub.s32 2, %v165_v36 }
  0x74   :  { %302 = vmatprep.subr.bf16.mxu0 %v5102_v11  ;;  %v149_v25 = vld [vmem:[#allocation5 + $0x18] sm:$0xff]  ;;  %343 = vmatprep.subr.bf16.mxu1 %v5104_v14  ;;  %v5116_v27 = vcombine.high %v157_v17, %v161_v20  ;;  %v5115_v30 = vcombine.low %v157_v17, %v161_v20  ;;  %v5106_v31 = vcombine.high %v148_v21, %v152_v24  ;;  %v6198_v39 = vsub.s32 1, %v165_v36  ;;  %p6073_p6 = por %p6072_p5, %p6071_p4 }
  0x75   :  { %v153_v26 = vld [vmem:[#allocation5 + $0x38] sm:$0xff]  ;;  %v5105_v33 = vcombine.low %v148_v21, %v152_v24  ;;  %v6200_v41 = vsub.s32 3, %v165_v36  ;;  %v167_v42 = vrot.slane %v162_v40, %v6194_v37  ;;  %v175_v43 = vrot.slane %v162_v40, %v6196_v38 }
  0x76   :  { %v5108_v32 = vcombine.high %v149_v25, %v153_v26  ;;  %v5107_v34 = vcombine.low %v149_v25, %v153_v26  ;;  %v171_v44 = vrot.slane %v162_v40, %v6198_v39  ;;  %v6205_v47 = vsub.s32 4, %v165_v36  ;;  %v671_v21 = vld [vmem:[#allocation11 + $0x1c0] sm:$0xff]  ;;  %p6074_p7 = pnand %p6073_p6, %p6067_p3 }
  0x77   :  { %303 = vmatpush1.bf16.msra.mxu0 %v5101_v18  ;;  %344 = vmatpush1.bf16.msra.mxu1 %v5103_v22  ;;  %v179_v49 = vrot.slane %v162_v40, %v6200_v41  ;;  %v6208_v50 = vsub.s32 5, %v165_v36  ;;  %v6216_v55 = vsub.s32 6, %v165_v36  ;;  %v6226_v2 = vsub.s32 7, %v165_v36  ;;  %v675_v22 = vld [vmem:[#allocation11 + $0x1e0] sm:$0xff] }
  0x78   :  { %382 = vmatprep.subr.bf16.mxu0 %v5114_v23  ;;  %423 = vmatprep.subr.bf16.mxu1 %v5116_v27  ;;  %v183_v59 = vrot.slane %v162_v40, %v6205_v47  ;;  %v799_v23 = vld [vmem:[#allocation11 + $0x5c0] sm:$0xff]  ;;  %v5177_v24 = vcombine.low %v671_v21, %v675_v22  ;;  %v5178_v25 = vcombine.high %v671_v21, %v675_v22 }
  0x79   :  { %v187_v61 = vrot.slane %v162_v40, %v6208_v50  ;;  %v191_v1 = vrot.slane %v162_v40, %v6216_v55  ;;  %v195_v11 = vrot.slane %v162_v40, %v6226_v2  ;;  %v803_v26 = vld [vmem:[#allocation11 + $0x5e0] sm:$0xff] }
  0x7a   :  { %5117 = vmatmul.mubr.msk.bf16.vlgmr.msra.gmra.mxu0 %vm284_vm0, %v145_v28  ;;  %5118 = vmatmul.mubr.msk.bf16.vlgmr.msra.gmra.mxu1 %vm284_vm0, %v145_v28  ;;  %v663_v27 = vld [vmem:[#allocation11 + $0x180] sm:$0xff] }
  0x7b   :  { %383 = vmatpush1.bf16.msra.mxu0 %v5113_v29  ;;  %424 = vmatpush1.bf16.msra.mxu1 %v5115_v30  ;;  %v5305_v29 = vcombine.low %v799_v23, %v803_v26  ;;  %v5306_v30 = vcombine.high %v799_v23, %v803_v26  ;;  %v659_v36 = vld [vmem:[#allocation11 + $0x160] sm:$0xff] }
  0x7c   :  { %384 = vmatprep.subr.bf16.mxu0 %v5106_v31  ;;  %425 = vmatprep.subr.bf16.mxu1 %v5108_v32  ;;  %v791_v32 = vld [vmem:[#allocation11 + $0x580] sm:$0xff] }
  0x7d   :  { %402 = vmatprep.mubr.bf16.mxu0 %v6111_v0  ;;  %443 = vmatprep.mubr.bf16.mxu1 %v6111_v0  ;;  %v783_v40 = vld [vmem:[#allocation11 + $0x540] sm:$0xff] }
  0x7f   :  { %385 = vmatpush1.bf16.msra.mxu0 %v5105_v33  ;;  %426 = vmatpush1.bf16.msra.mxu1 %v5107_v34  ;;  %v795_v33 = vld [vmem:[#allocation11 + $0x5a0] sm:$0xff] }
  0x80   :  { %v655_v34 = vld [vmem:[#allocation11 + $0x140] sm:$0xff]  ;;  %3729 = vmatprep.subr.bf16.mxu0 %v5178_v25  ;;  %v5298_v35 = vcombine.high %v791_v32, %v795_v33  ;;  %3770 = vmatprep.subr.bf16.mxu1 %v5306_v30 }
  0x82   :  { %5119 = vmatmul.mubr.msk.bf16.vlgmr.msra.gmra.mxu0 %vm284_vm0, %v145_v28  ;;  %5120 = vmatmul.mubr.msk.bf16.vlgmr.msra.gmra.mxu1 %vm284_vm0, %v145_v28  ;;  %v667_v28 = vld [vmem:[#allocation11 + $0x1a0] sm:$0xff] }
  0x83   :  { %v5170_v31 = vcombine.high %v663_v27, %v667_v28  ;;  %3730 = vmatpush1.bf16.msra.mxu0 %v5177_v24  ;;  %3771 = vmatpush1.bf16.msra.mxu1 %v5305_v29 }
  0x84   :  { %3772 = vmatprep.subr.bf16.mxu1 %v5298_v35 }
  0x85   :  { %3731 = vmatprep.subr.bf16.mxu0 %v5170_v31 }
 0x13a   :  { %v322_v45 = vpop.f32.mrf.mxu0  ;;  %v363_v46 = vpop.f32.mrf.mxu1 }
 0x13b   :  { %v6210_v51 = vadd.f32 %v322_v45, %v167_v42  ;;  %v6212_v52 = vadd.f32 %v363_v46, %v175_v43  ;;  %v787_v42 = vld [vmem:[#allocation11 + $0x560] sm:$0xff]  ;;  %v5169_v43 = vcombine.low %v663_v27, %v667_v28  ;;  %v5162_v45 = vcombine.high %v655_v34, %v659_v36 }
 0x13c   :  { %v324_v48 = vpop.f32.mrf.mxu0  ;;  %v365_v54 = vpop.f32.mrf.mxu1  ;;  %v5290_v46 = vcombine.high %v783_v40, %v787_v42 }
 0x13d   :  { %v6214_v53 = vadd.f32 %v324_v48, %v171_v44  ;;  %v6222_v62 = vadd.f32 %v365_v54, %v179_v49  ;;  %v5297_v44 = vcombine.low %v791_v32, %v795_v33  ;;  %v647_v48 = vld [vmem:[#allocation11 + $0x100] sm:$0xff]  ;;  %3732 = vmatpush1.bf16.msra.mxu0 %v5169_v43 }
 0x13e   :  { %v326_v56 = vpop.f32.mrf.mxu0  ;;  %v367_v58 = vpop.f32.mrf.mxu1  ;;  %v651_v49 = vld [vmem:[#allocation11 + $0x120] sm:$0xff]  ;;  %3733 = vmatprep.subr.bf16.mxu0 %v5162_v45 }
 0x13f   :  { %v452_v57 = vadd.f32 %v6214_v53, %v6210_v51  ;;  %v775_v54 = vld [vmem:[#allocation11 + $0x500] sm:$0xff]  ;;  %3773 = vmatpush1.bf16.msra.mxu1 %v5297_v44  ;;  %v5289_v58 = vcombine.low %v783_v40, %v787_v42 }
 0x140   :  { %v327_v60 = vpop.f32.mrf.mxu0  ;;  %v368_v0 = vpop.f32.mrf.mxu1  ;;  %v779_v56 = vld [vmem:[#allocation11 + $0x520] sm:$0xff]  ;;  %3774 = vmatprep.subr.bf16.mxu1 %v5290_v46 }
 0x141   :  { %v453_v63 = vadd.f32 %v452_v57, %v6212_v52  ;;  %v5161_v57 = vcombine.low %v655_v34, %v659_v36  ;;  %v5282_v60 = vcombine.high %v775_v54, %v779_v56  ;;  %v767_v0 = vld [vmem:[#allocation11 + $0x4c0] sm:$0xff] }
 0x142   :  { %v404_v3 = vpop.f32.mrf.mxu0  ;;  %v445_v6 = vpop.f32.mrf.mxu1  ;;  %v623_v43 = vld [vmem:[#allocation11 + $0x40] sm:$0xff] }
 0x143   :  { %v454_v4 = vadd.f32 %v453_v63, %v6222_v62  ;;  %v6229_v5 = vadd.f32 %v404_v3, %v183_v59  ;;  %v6232_v9 = vadd.f32 %v445_v6, %v191_v1  ;;  %v5154_v59 = vcombine.high %v647_v48, %v651_v49  ;;  %v643_v63 = vld [vmem:[#allocation11 + $0xe0] sm:$0xff]  ;;  %3734 = vmatpush1.bf16.msra.mxu0 %v5161_v57 }
 0x144   :  { %v406_v7 = vpop.f32.mrf.mxu0  ;;  %v447_v12 = vpop.f32.mrf.mxu1  ;;  %v771_v1 = vld [vmem:[#allocation11 + $0x4e0] sm:$0xff]  ;;  %v5153_v3 = vcombine.low %v647_v48, %v651_v49  ;;  %3775 = vmatpush1.bf16.msra.mxu1 %v5289_v58 }
 0x145   :  { %v455_v8 = vadd.f32 %v454_v4, %v6229_v5  ;;  %v6234_v10 = vadd.f32 %v406_v7, %v187_v61  ;;  %v6238_v17 = vadd.f32 %v447_v12, %v195_v11  ;;  %v639_v61 = vld [vmem:[#allocation11 + $0xc0] sm:$0xff]  ;;  %3735 = vmatprep.subr.bf16.mxu0 %v5154_v59  ;;  %v5281_v4 = vcombine.low %v775_v54, %v779_v56 }
 0x146   :  { %v408_v13 = vpop.f32.mrf.mxu0  ;;  %v449_v15 = vpop.f32.mrf.mxu1  ;;  %v5146_v6 = vcombine.high %v639_v61, %v643_v63  ;;  %3776 = vmatprep.subr.bf16.mxu1 %v5282_v60  ;;  %v5274_v7 = vcombine.high %v767_v0, %v771_v1  ;;  %v635_v11 = vld [vmem:[#allocation11 + $0xa0] sm:$0xff] }
 0x147   :  { %v456_v14 = vadd.f32 %v455_v8, %v6234_v10  ;;  %v631_v8 = vld [vmem:[#allocation11 + $0x80] sm:$0xff]  ;;  %3736 = vmatpush1.bf16.msra.mxu0 %v5153_v3  ;;  %v5273_v15 = vcombine.low %v767_v0, %v771_v1 }
 0x148   :  { %v409_v16 = vpop.f32.mrf.mxu0  ;;  %v450_v18 = vpop.f32.mrf.mxu1  ;;  %v759_v12 = vld [vmem:[#allocation11 + $0x480] sm:$0xff]  ;;  %3777 = vmatpush1.bf16.msra.mxu1 %v5281_v4  ;;  %3737 = vmatprep.subr.bf16.mxu0 %v5146_v6 }
 0x149   :  { %v457_v19 = vadd.f32 %v456_v14, %v6232_v9  ;;  %v763_v13 = vld [vmem:[#allocation11 + $0x4a0] sm:$0xff]  ;;  %v5145_v14 = vcombine.low %v639_v61, %v643_v63  ;;  %v5138_v16 = vcombine.high %v631_v8, %v635_v11  ;;  %3778 = vmatprep.subr.bf16.mxu1 %v5274_v7 }
 0x14a   :  { %v5266_v18 = vcombine.high %v759_v12, %v763_v13  ;;  %v627_v44 = vld [vmem:[#allocation11 + $0x60] sm:$0xff] }
 0x14b   :  { %v458_v20 = vadd.f32 %v457_v19, %v6238_v17  ;;  %3738 = vmatpush1.bf16.msra.mxu0 %v5145_v14  ;;  %v5137_v19 = vcombine.low %v631_v8, %v635_v11  ;;  %v751_v45 = vld [vmem:[#allocation11 + $0x440] sm:$0xff]  ;;  %v5130_v46 = vcombine.high %v623_v43, %v627_v44  ;;  %v5129_v48 = vcombine.low %v623_v43, %v627_v44 }
 0x14c   :  { %3779 = vmatpush1.bf16.msra.mxu1 %v5273_v15  ;;  %3739 = vmatprep.subr.bf16.mxu0 %v5138_v16  ;;  %v615_v56 = vld [vmem:[#allocation11] sm:$0xff] }
 0x14d   :  { %459 = vadd.xlane.f32.xlu0 %v458_v20  ;;  %v5265_v20 = vcombine.low %v759_v12, %v763_v13  ;;  %3780 = vmatprep.subr.bf16.mxu1 %v5266_v18  ;;  %v619_v57 = vld [vmem:[#allocation11 + $0x20] sm:$0xff] }
 0x14e   :  { %v743_v58 = vld [vmem:[#allocation11 + $0x400] sm:$0xff]  ;;  %v5122_v59 = vcombine.high %v615_v56, %v619_v57  ;;  %v5121_v61 = vcombine.low %v615_v56, %v619_v57 }
 0x14f   :  { %3740 = vmatpush1.bf16.msra.mxu0 %v5137_v19  ;;  %v747_v60 = vld [vmem:[#allocation11 + $0x420] sm:$0xff] }
 0x150   :  { %3781 = vmatpush1.bf16.msra.mxu1 %v5265_v20  ;;  %3741 = vmatprep.subr.bf16.mxu0 %v5130_v46  ;;  %v5249_v63 = vcombine.low %v743_v58, %v747_v60  ;;  %v5250_v0 = vcombine.high %v743_v58, %v747_v60  ;;  %v735_v1 = vld [vmem:[#allocation11 + $0x3c0] sm:$0xff] }
 0x151   :  { %v739_v3 = vld [vmem:[#allocation11 + $0x3e0] sm:$0xff] }
 0x152   :  { %v863_v4 = vld [vmem:[#allocation11 + $0x7c0] sm:$0xff]  ;;  %v5242_v6 = vcombine.high %v735_v1, %v739_v3  ;;  %v5241_v12 = vcombine.low %v735_v1, %v739_v3 }
 0x153   :  { %3742 = vmatpush1.bf16.msra.mxu0 %v5129_v48  ;;  %v867_v7 = vld [vmem:[#allocation11 + $0x7e0] sm:$0xff] }
 0x154   :  { %3743 = vmatprep.subr.bf16.mxu0 %v5122_v59  ;;  %v727_v8 = vld [vmem:[#allocation11 + $0x380] sm:$0xff]  ;;  %v5370_v13 = vcombine.high %v863_v4, %v867_v7  ;;  %v5369_v16 = vcombine.low %v863_v4, %v867_v7 }
 0x155   :  { %v731_v11 = vld [vmem:[#allocation11 + $0x3a0] sm:$0xff] }
 0x156   :  { %v855_v14 = vld [vmem:[#allocation11 + $0x780] sm:$0xff]  ;;  %v5234_v18 = vcombine.high %v727_v8, %v731_v11 }
 0x157   :  { %3744 = vmatpush1.bf16.msra.mxu0 %v5121_v61  ;;  %v859_v15 = vld [vmem:[#allocation11 + $0x7a0] sm:$0xff] }
 0x158   :  { %3745 = vmatprep.subr.bf16.mxu0 %v5242_v6  ;;  %v5362_v19 = vcombine.high %v855_v14, %v859_v15  ;;  %v719_v20 = vld [vmem:[#allocation11 + $0x340] sm:$0xff] }
 0x159   :  { %v831_v43 = vld [vmem:[#allocation11 + $0x6c0] sm:$0xff] }
 0x15a   :  { %v835_v44 = vld [vmem:[#allocation11 + $0x6e0] sm:$0xff] }
 0x15b   :  { %3746 = vmatpush2.bf16.msra.mxu0 %v5241_v12  ;;  %v5338_v48 = vcombine.high %v831_v43, %v835_v44  ;;  %v823_v56 = vld [vmem:[#allocation11 + $0x680] sm:$0xff]  ;;  %v5337_v59 = vcombine.low %v831_v43, %v835_v44 }
 0x15c   :  { %3747 = vmatprep.subr.bf16.mxu0 %v5234_v18  ;;  %v827_v57 = vld [vmem:[#allocation11 + $0x6a0] sm:$0xff] }
 0x15d   :  { %v5330_v61 = vcombine.high %v823_v56, %v827_v57  ;;  %v815_v1 = vld [vmem:[#allocation11 + $0x640] sm:$0xff]  ;;  %v5329_v6 = vcombine.low %v823_v56, %v827_v57 }
 0x15e   :  { %v819_v3 = vld [vmem:[#allocation11 + $0x660] sm:$0xff] }
 0x15f   :  { %v683_v12 = vld [vmem:[#allocation11 + $0x220] sm:$0xff] }
 0x1d6   :  { %v460_v21 = vpop.xlane.xlu0 %459 }
 0x1d7   :  { %v462_v22 = vmul.f32 0.0009765625, %v460_v21  ;;  %v723_v21 = vld [vmem:[#allocation11 + $0x360] sm:$0xff] }
 0x1d9   :  { %v6243_v23 = vsub.f32 %v6210_v51, %v462_v22  ;;  %v6246_v24 = vsub.f32 %v6214_v53, %v462_v22  ;;  %v6249_v25 = vsub.f32 %v6212_v52, %v462_v22  ;;  %v6252_v26 = vsub.f32 %v6222_v62, %v462_v22 }
 0x1da   :  { %v6259_v29 = vsub.f32 %v6229_v5, %v462_v22  ;;  %v6264_v30 = vsub.f32 %v6234_v10, %v462_v22  ;;  %v6269_v31 = vsub.f32 %v6232_v9, %v462_v22  ;;  %v6274_v5 = vsub.f32 %v6238_v17, %v462_v22  ;;  %v755_v17 = vld [vmem:[#allocation11 + $0x460] sm:$0xff] }
 0x1db   :  { %v471_v27 = vmul.f32 %v6243_v23, %v6243_v23  ;;  %v472_v28 = vmul.f32 %v6246_v24, %v6246_v24  ;;  %v473_v51 = vmul.f32 %v6249_v25, %v6249_v25  ;;  %v474_v52 = vmul.f32 %v6252_v26, %v6252_v26  ;;  %v847_v22 = vld [vmem:[#allocation11 + $0x740] sm:$0xff] }
 0x1dc   :  { %v475_v32 = vmul.f32 %v6259_v29, %v6259_v29  ;;  %v476_v34 = vmul.f32 %v6264_v30, %v6264_v30  ;;  %v477_v10 = vmul.f32 %v6269_v31, %v6269_v31  ;;  %v478_v40 = vmul.f32 %v6274_v5, %v6274_v5 }
 0x1dd   :  { %v479_v53 = vadd.f32 %v472_v28, %v471_v27  ;;  %v5257_v49 = vcombine.low %v751_v45, %v755_v17  ;;  %v5258_v54 = vcombine.high %v751_v45, %v755_v17  ;;  %v851_v27 = vld [vmem:[#allocation11 + $0x760] sm:$0xff]  ;;  %v5233_v28 = vcombine.low %v727_v8, %v731_v11 }
 0x1de   :  { %v5322_v8 = vcombine.high %v815_v1, %v819_v3  ;;  %v679_v11 = vld [vmem:[#allocation11 + $0x200] sm:$0xff] }
 0x1df   :  { %v480_v62 = vadd.f32 %v479_v53, %v473_v51  ;;  %3782 = vmatprep.subr.bf16.mxu1 %v5258_v54  ;;  %v5361_v51 = vcombine.low %v855_v14, %v859_v15  ;;  %v5226_v53 = vcombine.high %v719_v20, %v723_v21  ;;  %3748 = vmatpush2.bf16.msra.mxu0 %v5233_v28  ;;  %v699_v54 = vld [vmem:[#allocation11 + $0x2a0] sm:$0xff] }
 0x1e0   :  { %3783 = vmatpush1.bf16.msra.mxu1 %v5257_v49  ;;  %v695_v49 = vld [vmem:[#allocation11 + $0x280] sm:$0xff]  ;;  %v5186_v18 = vcombine.high %v679_v11, %v683_v12 }
 0x1e1   :  { %v481_v33 = vadd.f32 %v480_v62, %v474_v52  ;;  %3784 = vmatprep.subr.bf16.mxu1 %v5250_v0  ;;  %v5354_v52 = vcombine.high %v847_v22, %v851_v27  ;;  %v711_v62 = vld [vmem:[#allocation11 + $0x300] sm:$0xff]  ;;  %3749 = vmatprep.subr.bf16.mxu0 %v5226_v53  ;;  %v5202_v60 = vcombine.high %v695_v49, %v699_v54 }
 0x1e2   :  { %v691_v0 = vld [vmem:[#allocation11 + $0x260] sm:$0xff]  ;;  %v5201_v4 = vcombine.low %v695_v49, %v699_v54 }
 0x1e3   :  { %v482_v35 = vadd.f32 %v481_v33, %v475_v32  ;;  %v715_v32 = vld [vmem:[#allocation11 + $0x320] sm:$0xff] }
 0x1e4   :  { %3785 = vmatpush1.bf16.msra.mxu1 %v5249_v63  ;;  %v839_v33 = vld [vmem:[#allocation11 + $0x700] sm:$0xff]  ;;  %v5217_v45 = vcombine.low %v711_v62, %v715_v32 }
 0x1e5   :  { %v483_v36 = vadd.f32 %v482_v35, %v476_v34  ;;  %3786 = vmatprep.subr.bf16.mxu1 %v5370_v13  ;;  %v843_v34 = vld [vmem:[#allocation11 + $0x720] sm:$0xff]  ;;  %v5225_v35 = vcombine.low %v719_v20, %v723_v21  ;;  %v5185_v20 = vcombine.low %v679_v11, %v683_v12 }
 0x1e6   :  { %v5345_v46 = vcombine.low %v839_v33, %v843_v34  ;;  %v687_v63 = vld [vmem:[#allocation11 + $0x240] sm:$0xff] }
 0x1e7   :  { %v484_v9 = vadd.f32 %v483_v36, %v477_v10  ;;  %v5353_v10 = vcombine.low %v847_v22, %v851_v27  ;;  %v5218_v36 = vcombine.high %v711_v62, %v715_v32  ;;  %3750 = vmatpush2.bf16.msra.mxu0 %v5225_v35  ;;  %v5194_v7 = vcombine.high %v687_v63, %v691_v0  ;;  %v807_v13 = vld [vmem:[#allocation11 + $0x600] sm:$0xff] }
 0x1e8   :  { %3787 = vmatpush2.bf16.msra.mxu1 %v5369_v16  ;;  %v811_v14 = vld [vmem:[#allocation11 + $0x620] sm:$0xff]  ;;  %v5193_v15 = vcombine.low %v687_v63, %v691_v0  ;;  %v5321_v16 = vcombine.low %v815_v1, %v819_v3 }
 0x1e9   :  { %v485_v42 = vadd.f32 %v484_v9, %v478_v40  ;;  %3788 = vmatprep.subr.bf16.mxu1 %v5362_v19  ;;  %v5346_v40 = vcombine.high %v839_v33, %v843_v34  ;;  %v703_v9 = vld [vmem:[#allocation11 + $0x2c0] sm:$0xff]  ;;  %3751 = vmatprep.subr.bf16.mxu0 %v5218_v36  ;;  %v5314_v19 = vcombine.high %v807_v13, %v811_v14  ;;  %v549_v36 = vld [vmem:[#allocation10] sm:$0xff] }
 0x1ea   :  { %v5313_v21 = vcombine.low %v807_v13, %v811_v14  ;;  %v6282_v22 = vld [vmem:[#allocation11 + $0x9c0] sm:$0xff]  ;;  %v558_v44 = vrot.slane %v549_v36, %v6198_v39  ;;  %v574_v49 = vrot.slane %v549_v36, %v6208_v50 }
 0x1eb   :  { %486 = vadd.xlane.f32.xlu0 %v485_v42  ;;  %v707_v42 = vld [vmem:[#allocation11 + $0x2e0] sm:$0xff]  ;;  %3752 = vmatpush2.bf16.msra.mxu0 %v5217_v45  ;;  %v566_v45 = vrot.slane %v549_v36, %v6200_v41 }
 0x1ec   :  { %3789 = vmatpush2.bf16.msra.mxu1 %v5361_v51  ;;  %v5210_v17 = vcombine.high %v703_v9, %v707_v42  ;;  %v5209_v58 = vcombine.low %v703_v9, %v707_v42  ;;  %v6284_v27 = vld [vmem:[#allocation11 + $0x9e0] sm:$0xff] }
 0x1ed   :  { %3790 = vmatprep.subr.bf16.mxu1 %v5354_v52  ;;  %v6286_v28 = vld [vmem:[#allocation11 + $0xdc0] sm:$0xff]  ;;  %v5434_v51 = vcombine.high %v6282_v22, %v6284_v27  ;;  %v5433_v52 = vcombine.low %v6282_v22, %v6284_v27 }
 0x1ee   :  { %3753 = vmatprep.subr.bf16.mxu0 %v5210_v17  ;;  %v6290_v53 = vld [vmem:[#allocation11 + $0xde0] sm:$0xff] }
 0x1ef   :  { %3754 = vmatpush2.bf16.msra.mxu0 %v5209_v58  ;;  %v5561_v62 = vcombine.low %v6286_v28, %v6290_v53  ;;  %v5562_v32 = vcombine.high %v6286_v28, %v6290_v53  ;;  %v582_v58 = vrot.slane %v549_v36, %v6226_v2  ;;  %v1031_v22 = vld [vmem:[#allocation11 + $0xd00] sm:$0xff] }
 0x1f0   :  { %3791 = vmatpush2.bf16.msra.mxu1 %v5353_v10  ;;  %3755 = vmatprep.subr.bf16.mxu0 %v5202_v60  ;;  %v499_v10 = vld [vmem:[#allocation8] sm:$0xff]  ;;  %v1035_v27 = vld [vmem:[#allocation11 + $0xd20] sm:$0xff] }
 0x1f1   :  { %3792 = vmatprep.subr.bf16.mxu1 %v5346_v40  ;;  %v508_v40 = vrot.slane %v499_v10, %v6198_v39  ;;  %v516_v9 = vrot.slane %v499_v10, %v6200_v41  ;;  %v504_v42 = vrot.slane %v499_v10, %v6194_v37  ;;  %v512_v43 = vrot.slane %v499_v10, %v6196_v38 }
 0x1f2   :  { %v524_v17 = vrot.slane %v499_v10, %v6208_v50  ;;  %v532_v54 = vrot.slane %v499_v10, %v6226_v2  ;;  %v520_v56 = vrot.slane %v499_v10, %v6205_v47  ;;  %v528_v60 = vrot.slane %v499_v10, %v6216_v55  ;;  %v1047_v10 = vld [vmem:[#allocation11 + $0xd80] sm:$0xff] }
 0x1f3   :  { %3756 = vmatpush2.bf16.msra.mxu0 %v5201_v4  ;;  %v5538_v53 = vcombine.high %v1031_v22, %v1035_v27 }
 0x1f4   :  { %3793 = vmatpush2.bf16.msra.mxu1 %v5345_v46  ;;  %3757 = vmatprep.subr.bf16.mxu0 %v5194_v7  ;;  %v554_v46 = vrot.slane %v549_v36, %v6194_v37 }
 0x1f5   :  { %3794 = vmatprep.subr.bf16.mxu1 %v5338_v48  ;;  %v562_v48 = vrot.slane %v549_v36, %v6196_v38 }
 0x1f7   :  { %3758 = vmatpush2.bf16.msra.mxu0 %v5193_v15 }
 0x1f8   :  { %3795 = vmatpush2.bf16.msra.mxu1 %v5337_v59  ;;  %3759 = vmatprep.subr.bf16.mxu0 %v5186_v18  ;;  %v570_v59 = vrot.slane %v549_v36, %v6205_v47 }
 0x1f9   :  { %3796 = vmatprep.subr.bf16.mxu1 %v5330_v61  ;;  %v578_v61 = vrot.slane %v549_v36, %v6216_v55  ;;  %v1051_v36 = vld [vmem:[#allocation11 + $0xda0] sm:$0xff] }
 0x1fb   :  { %3760 = vmatpush2.bf16.msra.mxu0 %v5185_v20 }
 0x1fc   :  { %3797 = vmatpush2.bf16.msra.mxu1 %v5329_v6  ;;  %3811 = vmatprep.subr.bf16.mxu0 %v5434_v51 }
 0x1fd   :  { %3798 = vmatprep.subr.bf16.mxu1 %v5322_v8 }
 0x200   :  { %3799 = vmatpush2.bf16.msra.mxu1 %v5321_v16 }
 0x201   :  { %3800 = vmatprep.subr.bf16.mxu1 %v5314_v19 }
 0x204   :  { %3801 = vmatpush2.bf16.msra.mxu1 %v5313_v21 }
 0x205   :  { %3852 = vmatprep.subr.bf16.mxu1 %v5562_v32  ;;  %v919_v32 = vld [vmem:[#allocation11 + $0x980] sm:$0xff] }
 0x274   :  { %v487_v33 = vpop.xlane.xlu0 %486 }
 0x275   :  { %v488_v34 = vmul.f32 0.0009765625, %v487_v33  ;;  %v923_v33 = vld [vmem:[#allocation11 + $0x9a0] sm:$0xff] }
 0x277   :  { %v489_v35 = vadd.f32 1e-05, %v488_v34 }
 0x279   :  { %5865 = vrsqrt.f32 %v489_v35 }
 0x286   :  { %v5866_v57 = vpop.eup %5865 }
 0x287   :  { %v492_v63 = vmul.f32 %v5866_v57, %v6246_v24  ;;  %v494_v0 = vmul.f32 %v5866_v57, %v6252_v26  ;;  %v491_v1 = vmul.f32 %v5866_v57, %v6243_v23  ;;  %v493_v3 = vmul.f32 %v5866_v57, %v6249_v25 }
 0x288   :  { %v496_v4 = vmul.f32 %v5866_v57, %v6264_v30  ;;  %v498_v6 = vmul.f32 %v5866_v57, %v6274_v5  ;;  %v495_v7 = vmul.f32 %v5866_v57, %v6259_v29  ;;  %v497_v8 = vmul.f32 %v5866_v57, %v6269_v31 }
 0x289   :  { %v542_v11 = vmul.f32 %v508_v40, %v492_v63  ;;  %v544_v12 = vmul.f32 %v516_v9, %v494_v0  ;;  %v541_v13 = vmul.f32 %v504_v42, %v491_v1  ;;  %v543_v14 = vmul.f32 %v512_v43, %v493_v3  ;;  %v903_v63 = vld [vmem:[#allocation11 + $0x900] sm:$0xff] }
 0x28a   :  { %v546_v15 = vmul.f32 %v524_v17, %v496_v4  ;;  %v548_v24 = vmul.f32 %v532_v54, %v498_v6  ;;  %v545_v16 = vmul.f32 %v520_v56, %v495_v7  ;;  %v547_v26 = vmul.f32 %v528_v60, %v497_v8  ;;  %v1039_v54 = vld [vmem:[#allocation11 + $0xd40] sm:$0xff] }
 0x28b   :  { %v592_v18 = vadd.f32 %v558_v44, %v542_v11  ;;  %v594_v23 = vadd.f32 %v566_v45, %v544_v12  ;;  %v591_v19 = vadd.f32 %v554_v46, %v541_v13  ;;  %v593_v25 = vadd.f32 %v562_v48, %v543_v14  ;;  %v911_v45 = vld [vmem:[#allocation11 + $0x940] sm:$0xff] }
 0x28c   :  { %v6322_v20 = vadd.f32 %v570_v59, %v545_v16  ;;  %v6324_v30 = vadd.f32 %v578_v61, %v547_v26  ;;  %v596_v29 = vadd.f32 %v574_v49, %v546_v15  ;;  %v598_v31 = vadd.f32 %v582_v58, %v548_v24  ;;  %v915_v46 = vld [vmem:[#allocation11 + $0x960] sm:$0xff] }
 0x28d   :  { %5867 = vtanh.f32 %v592_v18  ;;  %v5426_v44 = vcombine.high %v919_v32, %v923_v33  ;;  %v5554_v49 = vcombine.high %v1047_v10, %v1051_v36  ;;  %v1043_v56 = vld [vmem:[#allocation11 + $0xd60] sm:$0xff]  ;;  %v5425_v58 = vcombine.low %v919_v32, %v923_v33 }
 0x28e   :  { %5869 = vtanh.f32 %v594_v23  ;;  %v5553_v59 = vcombine.low %v1047_v10, %v1051_v36  ;;  %v5418_v60 = vcombine.high %v911_v45, %v915_v46  ;;  %v5546_v61 = vcombine.high %v1039_v54, %v1043_v56  ;;  %v907_v0 = vld [vmem:[#allocation11 + $0x920] sm:$0xff] }
 0x28f   :  { %5871 = vtanh.f32 %v591_v19  ;;  %v5545_v1 = vcombine.low %v1039_v54, %v1043_v56  ;;  %v5410_v28 = vcombine.high %v903_v63, %v907_v0  ;;  %v899_v3 = vld [vmem:[#allocation11 + $0x8e0] sm:$0xff]  ;;  %v5409_v7 = vcombine.low %v903_v63, %v907_v0 }
 0x290   :  { %5873 = vtanh.f32 %v593_v25  ;;  %v1023_v4 = vld [vmem:[#allocation11 + $0xcc0] sm:$0xff]  ;;  %v5537_v8 = vcombine.low %v1031_v22, %v1035_v27 }
 0x291   :  { %5875 = vtanh.f32 %v596_v29  ;;  %v1027_v6 = vld [vmem:[#allocation11 + $0xce0] sm:$0xff] }
 0x292   :  { %5877 = vtanh.f32 %v598_v31  ;;  %v5530_v12 = vcombine.high %v1023_v4, %v1027_v6  ;;  %v887_v13 = vld [vmem:[#allocation11 + $0x880] sm:$0xff]  ;;  %v5529_v26 = vcombine.low %v1023_v4, %v1027_v6 }
 0x293   :  { %v891_v14 = vld [vmem:[#allocation11 + $0x8a0] sm:$0xff]  ;;  %5879 = vtanh.f32 %v6322_v20 }
 0x294   :  { %v1015_v15 = vld [vmem:[#allocation11 + $0xc80] sm:$0xff]  ;;  %v5394_v18 = vcombine.high %v887_v13, %v891_v14  ;;  %5881 = vtanh.f32 %v6324_v30 }
 0x295   :  { %v1019_v24 = vld [vmem:[#allocation11 + $0xca0] sm:$0xff] }
 0x296   :  { %v5522_v23 = vcombine.high %v1015_v15, %v1019_v24  ;;  %v879_v19 = vld [vmem:[#allocation11 + $0x840] sm:$0xff] }
 0x297   :  { %v883_v25 = vld [vmem:[#allocation11 + $0x860] sm:$0xff] }
 0x298   :  { %v1007_v29 = vld [vmem:[#allocation11 + $0xc40] sm:$0xff]  ;;  %v5386_v32 = vcombine.high %v879_v19, %v883_v25 }
 0x299   :  { %v1011_v31 = vld [vmem:[#allocation11 + $0xc60] sm:$0xff] }
 0x29a   :  { %v5868_v5 = vpop.eup %5867  ;;  %v5514_v33 = vcombine.high %v1007_v29, %v1011_v31  ;;  %v875_v10 = vld [vmem:[#allocation11 + $0x820] sm:$0xff] }
 0x29b   :  { %v5870_v21 = vpop.eup %5869  ;;  %v6326_v51 = vpack.c.bf16 %v5868_v5, %v5868_v5  ;;  %v5393_v5 = vcombine.low %v887_v13, %v891_v14  ;;  %v999_v36 = vld [vmem:[#allocation11 + $0xc00] sm:$0xff] }
 0x29c   :  { %v5872_v34 = vpop.eup %5871  ;;  %v6328_v35 = vpack.c.bf16 %v5870_v21, %v5870_v21  ;;  %v5521_v21 = vcombine.low %v1015_v15, %v1019_v24  ;;  %v1119_v54 = vld [vmem:[#allocation11 + $0xfc0] sm:$0xff] }
 0x29d   :  { %v5874_v40 = vpop.eup %5873  ;;  %3761 = vmatprep.mubr.bf16.mxu0 %v6326_v51  ;;  %v6331_v9 = vpack.c.bf16 %v5872_v34, %v5872_v34  ;;  %v871_v34 = vld [vmem:[#allocation11 + $0x800] sm:$0xff] }
 0x29e   :  { %v5876_v42 = vpop.eup %5875  ;;  %3802 = vmatprep.mubr.bf16.mxu1 %v6328_v35  ;;  %v6334_v43 = vpack.c.bf16 %v5874_v40, %v5874_v40  ;;  %v1003_v40 = vld [vmem:[#allocation11 + $0xc20] sm:$0xff] }
 0x29f   :  { %v5878_v17 = vpop.eup %5877  ;;  %3762 = vmatmul.mubr.bf16.vlgmr.msra.gmra.mxu0 %v6331_v9  ;;  %v6337_v48 = vpack.c.bf16 %v5876_v42, %v5876_v42  ;;  %v5385_v42 = vcombine.low %v879_v19, %v883_v25  ;;  %v1123_v56 = vld [vmem:[#allocation11 + $0xfe0] sm:$0xff] }
 0x2a0   :  { %3803 = vmatmul.mubr.bf16.vlgmr.msra.gmra.mxu1 %v6334_v43  ;;  %3812 = vmatpush1.bf16.msra.mxu0 %v5433_v52  ;;  %v6343_v57 = vpack.c.bf16 %v5878_v17, %v5878_v17  ;;  %v5417_v52 = vcombine.low %v911_v45, %v915_v46  ;;  %v5378_v45 = vcombine.high %v871_v34, %v875_v10  ;;  %v991_v17 = vld [vmem:[#allocation11 + $0xbc0] sm:$0xff] }
 0x2a1   :  { %3853 = vmatpush1.bf16.msra.mxu1 %v5561_v62  ;;  %3843 = vmatprep.mubr.bf16.mxu0 %v6337_v48  ;;  %v895_v62 = vld [vmem:[#allocation11 + $0x8c0] sm:$0xff]  ;;  %v5506_v46 = vcombine.high %v999_v36, %v1003_v40 }
 0x2a2   :  { %3884 = vmatprep.mubr.bf16.mxu1 %v6343_v57  ;;  %3813 = vmatprep.subr.bf16.mxu0 %v5426_v44  ;;  %v5402_v11 = vcombine.high %v895_v62, %v899_v3  ;;  %v5401_v16 = vcombine.low %v895_v62, %v899_v3  ;;  %v5513_v44 = vcombine.low %v1007_v29, %v1011_v31  ;;  %v983_v63 = vld [vmem:[#allocation11 + $0xb80] sm:$0xff] }
 0x2a3   :  { %3854 = vmatprep.subr.bf16.mxu1 %v5554_v49  ;;  %v995_v49 = vld [vmem:[#allocation11 + $0xbe0] sm:$0xff] }
 0x2a4   :  { %3814 = vmatpush1.bf16.msra.mxu0 %v5425_v58  ;;  %v5377_v58 = vcombine.low %v871_v34, %v875_v10  ;;  %v987_v0 = vld [vmem:[#allocation11 + $0xba0] sm:$0xff] }
 0x2a5   :  { %3855 = vmatpush1.bf16.msra.mxu1 %v5553_v59  ;;  %3815 = vmatprep.subr.bf16.mxu0 %v5418_v60  ;;  %v5505_v59 = vcombine.low %v999_v36, %v1003_v40  ;;  %v5498_v60 = vcombine.high %v991_v17, %v995_v49  ;;  %v1111_v22 = vld [vmem:[#allocation11 + $0xf80] sm:$0xff] }
 0x2a6   :  { %3856 = vmatprep.subr.bf16.mxu1 %v5546_v61  ;;  %v5626_v61 = vcombine.high %v1119_v54, %v1123_v56  ;;  %v1115_v27 = vld [vmem:[#allocation11 + $0xfa0] sm:$0xff] }
 0x2a7   :  { %v975_v62 = vld [vmem:[#allocation11 + $0xb40] sm:$0xff] }
 0x2a8   :  { %3816 = vmatpush1.bf16.msra.mxu0 %v5417_v52  ;;  %v5497_v52 = vcombine.low %v991_v17, %v995_v49  ;;  %v979_v3 = vld [vmem:[#allocation11 + $0xb60] sm:$0xff] }
 0x2a9   :  { %3857 = vmatpush1.bf16.msra.mxu1 %v5545_v1  ;;  %3817 = vmatprep.subr.bf16.mxu0 %v5410_v28  ;;  %v5625_v1 = vcombine.low %v1119_v54, %v1123_v56  ;;  %v5490_v28 = vcombine.high %v983_v63, %v987_v0  ;;  %v1103_v4 = vld [vmem:[#allocation11 + $0xf40] sm:$0xff] }
 0x2aa   :  { %3858 = vmatprep.subr.bf16.mxu1 %v5538_v53  ;;  %v5618_v53 = vcombine.high %v1111_v22, %v1115_v27  ;;  %v1107_v6 = vld [vmem:[#allocation11 + $0xf60] sm:$0xff] }
 0x2ab   :  { %v967_v13 = vld [vmem:[#allocation11 + $0xb00] sm:$0xff] }
 0x2ac   :  { %3818 = vmatpush1.bf16.msra.mxu0 %v5409_v7  ;;  %v5489_v7 = vcombine.low %v983_v63, %v987_v0  ;;  %v971_v14 = vld [vmem:[#allocation11 + $0xb20] sm:$0xff] }
 0x2ad   :  { %3859 = vmatpush1.bf16.msra.mxu1 %v5537_v8  ;;  %3819 = vmatprep.subr.bf16.mxu0 %v5402_v11  ;;  %v5617_v8 = vcombine.low %v1111_v22, %v1115_v27  ;;  %v5482_v11 = vcombine.high %v975_v62, %v979_v3  ;;  %v1095_v15 = vld [vmem:[#allocation11 + $0xf00] sm:$0xff] }
 0x2ae   :  { %3860 = vmatprep.subr.bf16.mxu1 %v5530_v12  ;;  %v5610_v12 = vcombine.high %v1103_v4, %v1107_v6  ;;  %v1099_v24 = vld [vmem:[#allocation11 + $0xf20] sm:$0xff] }
 0x2af   :  { %v959_v19 = vld [vmem:[#allocation11 + $0xac0] sm:$0xff] }
 0x2b0   :  { %3820 = vmatpush1.bf16.msra.mxu0 %v5401_v16  ;;  %v5481_v16 = vcombine.low %v975_v62, %v979_v3  ;;  %v963_v25 = vld [vmem:[#allocation11 + $0xae0] sm:$0xff]  ;;  %v800_v62 = vld [vmem:[#allocation11 + $0x5c8] sm:$0xff] }
 0x2b1   :  { %3861 = vmatpush1.bf16.msra.mxu1 %v5529_v26  ;;  %3821 = vmatprep.subr.bf16.mxu0 %v5394_v18  ;;  %v5609_v26 = vcombine.low %v1103_v4, %v1107_v6  ;;  %v5474_v18 = vcombine.high %v967_v13, %v971_v14  ;;  %v1087_v29 = vld [vmem:[#allocation11 + $0xec0] sm:$0xff]  ;;  %v804_v3 = vld [vmem:[#allocation11 + $0x5e8] sm:$0xff] }
 0x2b2   :  { %3862 = vmatprep.subr.bf16.mxu1 %v5522_v23  ;;  %v5602_v23 = vcombine.high %v1095_v15, %v1099_v24  ;;  %v1091_v31 = vld [vmem:[#allocation11 + $0xee0] sm:$0xff] }
 0x2b3   :  { %v951_v34 = vld [vmem:[#allocation11 + $0xa80] sm:$0xff] }
 0x2b4   :  { %3822 = vmatpush1.bf16.msra.mxu0 %v5393_v5  ;;  %v5473_v5 = vcombine.low %v967_v13, %v971_v14  ;;  %v955_v10 = vld [vmem:[#allocation11 + $0xaa0] sm:$0xff]  ;;  %v664_v13 = vld [vmem:[#allocation11 + $0x188] sm:$0xff] }
 0x2b5   :  { %3863 = vmatpush1.bf16.msra.mxu1 %v5521_v21  ;;  %3823 = vmatprep.subr.bf16.mxu0 %v5386_v32  ;;  %v5601_v21 = vcombine.low %v1095_v15, %v1099_v24  ;;  %v5466_v32 = vcombine.high %v959_v19, %v963_v25  ;;  %v1079_v36 = vld [vmem:[#allocation11 + $0xe80] sm:$0xff]  ;;  %v668_v14 = vld [vmem:[#allocation11 + $0x1a8] sm:$0xff] }
 0x2b6   :  { %3864 = vmatprep.subr.bf16.mxu1 %v5514_v33  ;;  %v5594_v33 = vcombine.high %v1087_v29, %v1091_v31  ;;  %v1083_v40 = vld [vmem:[#allocation11 + $0xea0] sm:$0xff]  ;;  %v792_v24 = vld [vmem:[#allocation11 + $0x588] sm:$0xff] }
 0x2b7   :  { %v943_v17 = vld [vmem:[#allocation11 + $0xa40] sm:$0xff] }
 0x2b8   :  { %3824 = vmatpush1.bf16.msra.mxu0 %v5385_v42  ;;  %v5465_v42 = vcombine.low %v959_v19, %v963_v25  ;;  %v947_v49 = vld [vmem:[#allocation11 + $0xa60] sm:$0xff]  ;;  %v5172_v19 = vcombine.high %v664_v13, %v668_v14  ;;  %v656_v25 = vld [vmem:[#allocation11 + $0x148] sm:$0xff] }
 0x2b9   :  { %3865 = vmatpush1.bf16.msra.mxu1 %v5513_v44  ;;  %3825 = vmatprep.subr.bf16.mxu0 %v5378_v45  ;;  %v5593_v44 = vcombine.low %v1087_v29, %v1091_v31  ;;  %v5458_v45 = vcombine.high %v951_v34, %v955_v10  ;;  %v1071_v54 = vld [vmem:[#allocation11 + $0xe40] sm:$0xff]  ;;  %v5449_v27 = vcombine.low %v943_v17, %v947_v49  ;;  %v660_v29 = vld [vmem:[#allocation11 + $0x168] sm:$0xff] }
 0x2ba   :  { %3866 = vmatprep.subr.bf16.mxu1 %v5506_v46  ;;  %v5586_v46 = vcombine.high %v1079_v36, %v1083_v40  ;;  %v1075_v56 = vld [vmem:[#allocation11 + $0xe60] sm:$0xff] }
 0x2bb   :  { %v935_v63 = vld [vmem:[#allocation11 + $0xa00] sm:$0xff] }
 0x2bc   :  { %3826 = vmatpush1.bf16.msra.mxu0 %v5377_v58  ;;  %v5457_v58 = vcombine.low %v951_v34, %v955_v10  ;;  %v939_v0 = vld [vmem:[#allocation11 + $0xa20] sm:$0xff]  ;;  %v5164_v34 = vcombine.high %v656_v25, %v660_v29 }
 0x2bd   :  { %3867 = vmatpush1.bf16.msra.mxu1 %v5505_v59  ;;  %3827 = vmatprep.subr.bf16.mxu0 %v5498_v60  ;;  %v5585_v59 = vcombine.low %v1079_v36, %v1083_v40  ;;  %v5450_v60 = vcombine.high %v943_v17, %v947_v49  ;;  %v1063_v22 = vld [vmem:[#allocation11 + $0xe00] sm:$0xff]  ;;  %v5442_v30 = vcombine.high %v935_v63, %v939_v0  ;;  %v648_v36 = vld [vmem:[#allocation11 + $0x108] sm:$0xff] }
 0x2be   :  { %3868 = vmatprep.subr.bf16.mxu1 %v5626_v61  ;;  %v5578_v61 = vcombine.high %v1071_v54, %v1075_v56  ;;  %v1067_v20 = vld [vmem:[#allocation11 + $0xe20] sm:$0xff]  ;;  %v5441_v4 = vcombine.low %v935_v63, %v939_v0  ;;  %v652_v40 = vld [vmem:[#allocation11 + $0x128] sm:$0xff] }
 0x2bf   :  { %v5569_v6 = vcombine.low %v1063_v22, %v1067_v20  ;;  %v5156_v17 = vcombine.high %v648_v36, %v652_v40 }
 0x2c0   :  { %3828 = vmatpush2.bf16.msra.mxu0 %v5497_v52  ;;  %v5577_v52 = vcombine.low %v1071_v54, %v1075_v56  ;;  %v640_v54 = vld [vmem:[#allocation11 + $0xc8] sm:$0xff] }
 0x2c1   :  { %3869 = vmatpush2.bf16.msra.mxu1 %v5625_v1  ;;  %3829 = vmatprep.subr.bf16.mxu0 %v5490_v28  ;;  %v5570_v1 = vcombine.high %v1063_v22, %v1067_v20  ;;  %v672_v28 = vld [vmem:[#allocation11 + $0x1c8] sm:$0xff] }
 0x2c2   :  { %3870 = vmatprep.subr.bf16.mxu1 %v5618_v53  ;;  %v676_v53 = vld [vmem:[#allocation11 + $0x1e8] sm:$0xff] }
 0x2c3   :  { %v5179_v15 = vcombine.low %v672_v28, %v676_v53  ;;  %v644_v56 = vld [vmem:[#allocation11 + $0xe8] sm:$0xff] }
 0x2c4   :  { %3830 = vmatpush2.bf16.msra.mxu0 %v5489_v7  ;;  %v5180_v7 = vcombine.high %v672_v28, %v676_v53  ;;  %v5148_v63 = vcombine.high %v640_v54, %v644_v56  ;;  %v632_v22 = vld [vmem:[#allocation11 + $0x88] sm:$0xff] }
 0x2c5   :  { %3871 = vmatpush2.bf16.msra.mxu1 %v5617_v8  ;;  %3831 = vmatprep.subr.bf16.mxu0 %v5482_v11  ;;  %v5880_v8 = vpop.eup %5879  ;;  %v5308_v11 = vcombine.high %v800_v62, %v804_v3  ;;  %v636_v20 = vld [vmem:[#allocation11 + $0xa8] sm:$0xff] }
 0x2c6   :  { %3872 = vmatprep.subr.bf16.mxu1 %v5610_v12  ;;  %v5882_v12 = vpop.eup %5881  ;;  %v5140_v28 = vcombine.high %v632_v22, %v636_v20 }
 0x2c8   :  { %3832 = vmatpush2.bf16.msra.mxu0 %v5481_v16  ;;  %v796_v16 = vld [vmem:[#allocation11 + $0x5a8] sm:$0xff] }
 0x2c9   :  { %3873 = vmatpush2.bf16.msra.mxu1 %v5609_v26  ;;  %3833 = vmatprep.subr.bf16.mxu0 %v5474_v18  ;;  %v6352_v26 = vpack.c.bf16 %v5880_v8, %v5880_v8  ;;  %v5307_v18 = vcombine.low %v800_v62, %v804_v3  ;;  %v5300_v31 = vcombine.high %v792_v24, %v796_v16  ;;  %v624_v62 = vld [vmem:[#allocation11 + $0x48] sm:$0xff] }
 0x2ca   :  { %3874 = vmatprep.subr.bf16.mxu1 %v5602_v23  ;;  %v6354_v23 = vpack.c.bf16 %v5882_v12, %v5882_v12  ;;  %v628_v3 = vld [vmem:[#allocation11 + $0x68] sm:$0xff] }
 0x2cc   :  { %3834 = vmatpush2.bf16.msra.mxu0 %v5473_v5  ;;  %v784_v5 = vld [vmem:[#allocation11 + $0x548] sm:$0xff] }
 0x2cd   :  { %3875 = vmatpush2.bf16.msra.mxu1 %v5601_v21  ;;  %3835 = vmatprep.subr.bf16.mxu0 %v5466_v32  ;;  %v788_v21 = vld [vmem:[#allocation11 + $0x568] sm:$0xff]  ;;  %v5171_v32 = vcombine.low %v664_v13, %v668_v14 }
 0x2ce   :  { %3876 = vmatprep.subr.bf16.mxu1 %v5594_v33  ;;  %v5299_v33 = vcombine.low %v792_v24, %v796_v16  ;;  %v5292_v10 = vcombine.high %v784_v5, %v788_v21  ;;  %v616_v13 = vld [vmem:[#allocation11 + $0x8] sm:$0xff]  ;;  %v5131_v16 = vcombine.low %v624_v62, %v628_v3 }
 0x2cf   :  { %v620_v14 = vld [vmem:[#allocation11 + $0x28] sm:$0xff] }
 0x2d0   :  { %3836 = vmatpush2.bf16.msra.mxu0 %v5465_v42  ;;  %v776_v42 = vld [vmem:[#allocation11 + $0x508] sm:$0xff] }
 0x2d1   :  { %3877 = vmatpush2.bf16.msra.mxu1 %v5593_v44  ;;  %3837 = vmatprep.subr.bf16.mxu0 %v5458_v45  ;;  %v780_v44 = vld [vmem:[#allocation11 + $0x528] sm:$0xff]  ;;  %v5163_v45 = vcombine.low %v656_v25, %v660_v29 }
 0x2d2   :  { %3878 = vmatprep.subr.bf16.mxu1 %v5586_v46  ;;  %v5291_v46 = vcombine.low %v784_v5, %v788_v21  ;;  %v5284_v49 = vcombine.high %v776_v42, %v780_v44  ;;  %v748_v24 = vld [vmem:[#allocation11 + $0x428] sm:$0xff] }
 0x2d3   :  { %v736_v29 = vld [vmem:[#allocation11 + $0x3c8] sm:$0xff] }
 0x2d4   :  { %3838 = vmatpush2.bf16.msra.mxu0 %v5457_v58  ;;  %v768_v58 = vld [vmem:[#allocation11 + $0x4c8] sm:$0xff] }
 0x2d5   :  { %3879 = vmatpush2.bf16.msra.mxu1 %v5585_v59  ;;  %3839 = vmatprep.subr.bf16.mxu0 %v5450_v60  ;;  %v772_v59 = vld [vmem:[#allocation11 + $0x4e8] sm:$0xff]  ;;  %v5155_v60 = vcombine.low %v648_v36, %v652_v40 }
 0x2d6   :  { %3880 = vmatprep.subr.bf16.mxu1 %v5578_v61  ;;  %v5283_v61 = vcombine.low %v776_v42, %v780_v44  ;;  %v5276_v0 = vcombine.high %v768_v58, %v772_v59  ;;  %v864_v5 = vld [vmem:[#allocation11 + $0x7c8] sm:$0xff] }
 0x2d7   :  { %v868_v21 = vld [vmem:[#allocation11 + $0x7e8] sm:$0xff] }
 0x2d8   :  { %3840 = vmatpush2.bf16.msra.mxu0 %v5449_v27  ;;  %v760_v27 = vld [vmem:[#allocation11 + $0x488] sm:$0xff] }
 0x2d9   :  { %3881 = vmatpush2.bf16.msra.mxu1 %v5577_v52  ;;  %3841 = vmatprep.subr.bf16.mxu0 %v5442_v30  ;;  %v764_v52 = vld [vmem:[#allocation11 + $0x4a8] sm:$0xff]  ;;  %v5147_v30 = vcombine.low %v640_v54, %v644_v56 }
 0x2da   :  { %3882 = vmatprep.subr.bf16.mxu1 %v5570_v1  ;;  %v5275_v1 = vcombine.low %v768_v58, %v772_v59  ;;  %v5268_v53 = vcombine.high %v760_v27, %v764_v52  ;;  %v5267_v8 = vcombine.low %v760_v27, %v764_v52  ;;  %v728_v36 = vld [vmem:[#allocation11 + $0x388] sm:$0xff] }
 0x2db   :  { %v732_v40 = vld [vmem:[#allocation11 + $0x3a8] sm:$0xff] }
 0x2dc   :  { %3842 = vmatpush2.bf16.msra.mxu0 %v5441_v4  ;;  %v752_v4 = vld [vmem:[#allocation11 + $0x448] sm:$0xff] }
 0x2dd   :  { %3883 = vmatpush2.bf16.msra.mxu1 %v5569_v6  ;;  %3893 = vmatprep.subr.bf16.mxu0 %v5180_v7  ;;  %v756_v6 = vld [vmem:[#allocation11 + $0x468] sm:$0xff]  ;;  %v5139_v7 = vcombine.low %v632_v22, %v636_v20 }
 0x2de   :  { %3934 = vmatprep.subr.bf16.mxu1 %v5308_v11  ;;  %v5132_v11 = vcombine.high %v624_v62, %v628_v3  ;;  %v5260_v12 = vcombine.high %v752_v4, %v756_v6  ;;  %v856_v42 = vld [vmem:[#allocation11 + $0x788] sm:$0xff] }
 0x2df   :  { %3844 = vmatmul.mubr.bf16.vlgmr.msra.gmra.mxu0 %v6352_v26  ;;  %v860_v44 = vld [vmem:[#allocation11 + $0x7a8] sm:$0xff] }
 0x2e0   :  { %3885 = vmatmul.mubr.bf16.vlgmr.msra.gmra.mxu1 %v6354_v23  ;;  %3894 = vmatpush1.bf16.msra.mxu0 %v5179_v15  ;;  %v744_v15 = vld [vmem:[#allocation11 + $0x408] sm:$0xff] }
 0x2e1   :  { %3925 = vmatprep.mubr.bf16.mxu0 %v6326_v51  ;;  %3935 = vmatpush1.bf16.msra.mxu1 %v5307_v18  ;;  %v5259_v18 = vcombine.low %v752_v4, %v756_v6  ;;  %v5252_v25 = vcombine.high %v744_v15, %v748_v24  ;;  %v720_v54 = vld [vmem:[#allocation11 + $0x348] sm:$0xff] }
 0x2e2   :  { %3966 = vmatprep.mubr.bf16.mxu1 %v6328_v35  ;;  %3895 = vmatprep.subr.bf16.mxu0 %v5172_v19  ;;  %v5124_v19 = vcombine.high %v616_v13, %v620_v14  ;;  %v724_v56 = vld [vmem:[#allocation11 + $0x368] sm:$0xff] }
 0x2e3   :  { %3936 = vmatprep.subr.bf16.mxu1 %v5300_v31  ;;  %v740_v31 = vld [vmem:[#allocation11 + $0x3e8] sm:$0xff] }
 0x2e4   :  { %3896 = vmatpush1.bf16.msra.mxu0 %v5171_v32  ;;  %v5123_v32 = vcombine.low %v616_v13, %v620_v14  ;;  %v848_v58 = vld [vmem:[#allocation11 + $0x748] sm:$0xff] }
 0x2e5   :  { %3937 = vmatpush1.bf16.msra.mxu1 %v5299_v33  ;;  %3897 = vmatprep.subr.bf16.mxu0 %v5164_v34  ;;  %v5251_v33 = vcombine.low %v744_v15, %v748_v24  ;;  %v5244_v34 = vcombine.high %v736_v29, %v740_v31  ;;  %v852_v59 = vld [vmem:[#allocation11 + $0x768] sm:$0xff] }
 0x2e6   :  { %3938 = vmatprep.subr.bf16.mxu1 %v5292_v10  ;;  %v5372_v10 = vcombine.high %v864_v5, %v868_v21  ;;  %v712_v22 = vld [vmem:[#allocation11 + $0x308] sm:$0xff] }
 0x2e7   :  { %v716_v20 = vld [vmem:[#allocation11 + $0x328] sm:$0xff] }
 0x2e8   :  { %3898 = vmatpush1.bf16.msra.mxu0 %v5163_v45  ;;  %v5243_v45 = vcombine.low %v736_v29, %v740_v31  ;;  %v840_v27 = vld [vmem:[#allocation11 + $0x708] sm:$0xff] }
 0x2e9   :  { %3939 = vmatpush1.bf16.msra.mxu1 %v5291_v46  ;;  %3899 = vmatprep.subr.bf16.mxu0 %v5156_v17  ;;  %v5371_v46 = vcombine.low %v864_v5, %v868_v21  ;;  %v5236_v17 = vcombine.high %v728_v36, %v732_v40  ;;  %v844_v52 = vld [vmem:[#allocation11 + $0x728] sm:$0xff] }
 0x2ea   :  { %3940 = vmatprep.subr.bf16.mxu1 %v5284_v49  ;;  %v5364_v49 = vcombine.high %v856_v42, %v860_v44  ;;  %v704_v62 = vld [vmem:[#allocation11 + $0x2c8] sm:$0xff] }
 0x2eb   :  { %v708_v3 = vld [vmem:[#allocation11 + $0x2e8] sm:$0xff] }
 0x2ec   :  { %3900 = vmatpush1.bf16.msra.mxu0 %v5155_v60  ;;  %v5235_v60 = vcombine.low %v728_v36, %v732_v40  ;;  %v832_v4 = vld [vmem:[#allocation11 + $0x6c8] sm:$0xff] }
 0x2ed   :  { %3941 = vmatpush1.bf16.msra.mxu1 %v5283_v61  ;;  %3901 = vmatprep.subr.bf16.mxu0 %v5148_v63  ;;  %v5363_v61 = vcombine.low %v856_v42, %v860_v44  ;;  %v5228_v63 = vcombine.high %v720_v54, %v724_v56  ;;  %v836_v6 = vld [vmem:[#allocation11 + $0x6e8] sm:$0xff] }
 0x2ee   :  { %3942 = vmatprep.subr.bf16.mxu1 %v5276_v0  ;;  %v5356_v0 = vcombine.high %v848_v58, %v852_v59  ;;  %v696_v13 = vld [vmem:[#allocation11 + $0x288] sm:$0xff] }
 0x2ef   :  { %v700_v14 = vld [vmem:[#allocation11 + $0x2a8] sm:$0xff] }
 0x2f0   :  { %3902 = vmatpush1.bf16.msra.mxu0 %v5147_v30  ;;  %v5227_v30 = vcombine.low %v720_v54, %v724_v56  ;;  %v824_v15 = vld [vmem:[#allocation11 + $0x688] sm:$0xff] }
 0x2f1   :  { %3943 = vmatpush1.bf16.msra.mxu1 %v5275_v1  ;;  %3903 = vmatprep.subr.bf16.mxu0 %v5140_v28  ;;  %v5355_v1 = vcombine.low %v848_v58, %v852_v59  ;;  %v5220_v28 = vcombine.high %v712_v22, %v716_v20  ;;  %v828_v24 = vld [vmem:[#allocation11 + $0x6a8] sm:$0xff] }
 0x2f2   :  { %3944 = vmatprep.subr.bf16.mxu1 %v5268_v53  ;;  %v5348_v53 = vcombine.high %v840_v27, %v844_v52  ;;  %v688_v29 = vld [vmem:[#allocation11 + $0x248] sm:$0xff] }
 0x2f3   :  { %v692_v31 = vld [vmem:[#allocation11 + $0x268] sm:$0xff] }
 0x2f4   :  { %3904 = vmatpush1.bf16.msra.mxu0 %v5139_v7  ;;  %v5219_v7 = vcombine.low %v712_v22, %v716_v20  ;;  %v816_v5 = vld [vmem:[#allocation11 + $0x648] sm:$0xff] }
 0x2f5   :  { %3945 = vmatpush1.bf16.msra.mxu1 %v5267_v8  ;;  %3905 = vmatprep.subr.bf16.mxu0 %v5132_v11  ;;  %v5347_v8 = vcombine.low %v840_v27, %v844_v52  ;;  %v5212_v11 = vcombine.high %v704_v62, %v708_v3  ;;  %v820_v21 = vld [vmem:[#allocation11 + $0x668] sm:$0xff] }
 0x2f6   :  { %3946 = vmatprep.subr.bf16.mxu1 %v5260_v12  ;;  %v5340_v12 = vcombine.high %v832_v4, %v836_v6  ;;  %v680_v36 = vld [vmem:[#allocation11 + $0x208] sm:$0xff] }
 0x2f7   :  { %v684_v40 = vld [vmem:[#allocation11 + $0x228] sm:$0xff] }
 0x2f8   :  { %3906 = vmatpush1.bf16.msra.mxu0 %v5131_v16  ;;  %v5211_v16 = vcombine.low %v704_v62, %v708_v3  ;;  %v808_v42 = vld [vmem:[#allocation11 + $0x608] sm:$0xff] }
 0x2f9   :  { %3947 = vmatpush1.bf16.msra.mxu1 %v5259_v18  ;;  %3907 = vmatprep.subr.bf16.mxu0 %v5124_v19  ;;  %v5339_v18 = vcombine.low %v832_v4, %v836_v6  ;;  %v5204_v19 = vcombine.high %v696_v13, %v700_v14  ;;  %v812_v44 = vld [vmem:[#allocation11 + $0x628] sm:$0xff] }
 0x2fa   :  { %3948 = vmatprep.subr.bf16.mxu1 %v5252_v25  ;;  %v5332_v25 = vcombine.high %v824_v15, %v828_v24  ;;  %v928_v54 = vld [vmem:[#allocation11 + $0x9c8] sm:$0xff] }
 0x2fb   :  { %v932_v56 = vld [vmem:[#allocation11 + $0x9e8] sm:$0xff] }
 0x2fc   :  { %3908 = vmatpush1.bf16.msra.mxu0 %v5123_v32  ;;  %v5203_v32 = vcombine.low %v696_v13, %v700_v14  ;;  %v1056_v58 = vld [vmem:[#allocation11 + $0xdc8] sm:$0xff]  ;;  %v5435_v27 = vcombine.low %v928_v54, %v932_v56 }
 0x2fd   :  { %3949 = vmatpush1.bf16.msra.mxu1 %v5251_v33  ;;  %3909 = vmatprep.subr.bf16.mxu0 %v5244_v34  ;;  %v5331_v33 = vcombine.low %v824_v15, %v828_v24  ;;  %v5196_v34 = vcombine.high %v688_v29, %v692_v31  ;;  %v1060_v59 = vld [vmem:[#allocation11 + $0xde8] sm:$0xff] }
 0x2fe   :  { %3950 = vmatprep.subr.bf16.mxu1 %v5372_v10  ;;  %v5324_v10 = vcombine.high %v816_v5, %v820_v21  ;;  %v920_v22 = vld [vmem:[#allocation11 + $0x988] sm:$0xff] }
 0x2ff   :  { %v924_v20 = vld [vmem:[#allocation11 + $0x9a8] sm:$0xff] }
 0x300   :  { %3910 = vmatpush2.bf16.msra.mxu0 %v5243_v45  ;;  %v5195_v45 = vcombine.low %v688_v29, %v692_v31  ;;  %v1048_v52 = vld [vmem:[#allocation11 + $0xd88] sm:$0xff] }
 0x301   :  { %3951 = vmatpush2.bf16.msra.mxu1 %v5371_v46  ;;  %3911 = vmatprep.subr.bf16.mxu0 %v5236_v17  ;;  %v5323_v46 = vcombine.low %v816_v5, %v820_v21  ;;  %v5188_v17 = vcombine.high %v680_v36, %v684_v40  ;;  %v916_v62 = vld [vmem:[#allocation11 + $0x968] sm:$0xff] }
 0x302   :  { %3952 = vmatprep.subr.bf16.mxu1 %v5364_v49  ;;  %v5316_v49 = vcombine.high %v808_v42, %v812_v44  ;;  %v1040_v4 = vld [vmem:[#allocation11 + $0xd48] sm:$0xff] }
 0x303   :  { %v1044_v6 = vld [vmem:[#allocation11 + $0xd68] sm:$0xff] }
 0x304   :  { %3912 = vmatpush2.bf16.msra.mxu0 %v5235_v60  ;;  %v5187_v60 = vcombine.low %v680_v36, %v684_v40  ;;  %v904_v13 = vld [vmem:[#allocation11 + $0x908] sm:$0xff] }
 0x305   :  { %3953 = vmatpush2.bf16.msra.mxu1 %v5363_v61  ;;  %3913 = vmatprep.subr.bf16.mxu0 %v5228_v63  ;;  %v5315_v61 = vcombine.low %v808_v42, %v812_v44  ;;  %v5436_v63 = vcombine.high %v928_v54, %v932_v56  ;;  %v908_v14 = vld [vmem:[#allocation11 + $0x928] sm:$0xff] }
 0x306   :  { %3954 = vmatprep.subr.bf16.mxu1 %v5356_v0  ;;  %v5564_v0 = vcombine.high %v1056_v58, %v1060_v59  ;;  %v1032_v15 = vld [vmem:[#allocation11 + $0xd08] sm:$0xff] }
 0x307   :  { %v1036_v24 = vld [vmem:[#allocation11 + $0xd28] sm:$0xff] }
 0x308   :  { %3914 = vmatpush2.bf16.msra.mxu0 %v5227_v30  ;;  %v1052_v30 = vld [vmem:[#allocation11 + $0xda8] sm:$0xff] }
 0x309   :  { %3955 = vmatpush2.bf16.msra.mxu1 %v5355_v1  ;;  %3915 = vmatprep.subr.bf16.mxu0 %v5220_v28  ;;  %v5563_v1 = vcombine.low %v1056_v58, %v1060_v59  ;;  %v5428_v28 = vcombine.high %v920_v22, %v924_v20  ;;  %v5556_v3 = vcombine.high %v1048_v52, %v1052_v30  ;;  %v896_v29 = vld [vmem:[#allocation11 + $0x8c8] sm:$0xff] }
 0x30a   :  { %3956 = vmatprep.subr.bf16.mxu1 %v5348_v53  ;;  %v912_v53 = vld [vmem:[#allocation11 + $0x948] sm:$0xff] }
 0x30b   :  { %v900_v31 = vld [vmem:[#allocation11 + $0x8e8] sm:$0xff] }
 0x30c   :  { %3916 = vmatpush2.bf16.msra.mxu0 %v5219_v7  ;;  %v5427_v7 = vcombine.low %v920_v22, %v924_v20  ;;  %v1024_v5 = vld [vmem:[#allocation11 + $0xcc8] sm:$0xff] }
 0x30d   :  { %3957 = vmatpush2.bf16.msra.mxu1 %v5347_v8  ;;  %3917 = vmatprep.subr.bf16.mxu0 %v5212_v11  ;;  %v5555_v8 = vcombine.low %v1048_v52, %v1052_v30  ;;  %v5420_v11 = vcombine.high %v912_v53, %v916_v62  ;;  %v1028_v21 = vld [vmem:[#allocation11 + $0xce8] sm:$0xff] }
 0x30e   :  { %3958 = vmatprep.subr.bf16.mxu1 %v5340_v12  ;;  %v5548_v12 = vcombine.high %v1040_v4, %v1044_v6  ;;  %v888_v36 = vld [vmem:[#allocation11 + $0x888] sm:$0xff] }
 0x30f   :  { %v892_v40 = vld [vmem:[#allocation11 + $0x8a8] sm:$0xff] }
 0x310   :  { %3918 = vmatpush2.bf16.msra.mxu0 %v5211_v16  ;;  %v5419_v16 = vcombine.low %v912_v53, %v916_v62  ;;  %v1016_v42 = vld [vmem:[#allocation11 + $0xc88] sm:$0xff] }
 0x311   :  { %3959 = vmatpush2.bf16.msra.mxu1 %v5339_v18  ;;  %3919 = vmatprep.subr.bf16.mxu0 %v5204_v19  ;;  %v5547_v18 = vcombine.low %v1040_v4, %v1044_v6  ;;  %v5412_v19 = vcombine.high %v904_v13, %v908_v14  ;;  %v1020_v44 = vld [vmem:[#allocation11 + $0xca8] sm:$0xff] }
 0x312   :  { %3960 = vmatprep.subr.bf16.mxu1 %v5332_v25  ;;  %v5540_v25 = vcombine.high %v1032_v15, %v1036_v24  ;;  %v880_v54 = vld [vmem:[#allocation11 + $0x848] sm:$0xff] }
 0x313   :  { %v884_v56 = vld [vmem:[#allocation11 + $0x868] sm:$0xff] }
 0x314   :  { %3920 = vmatpush2.bf16.msra.mxu0 %v5203_v32  ;;  %v5411_v32 = vcombine.low %v904_v13, %v908_v14  ;;  %v1008_v58 = vld [vmem:[#allocation11 + $0xc48] sm:$0xff]  ;;  %v5387_v30 = vcombine.low %v880_v54, %v884_v56 }
 0x315   :  { %3961 = vmatpush2.bf16.msra.mxu1 %v5331_v33  ;;  %3921 = vmatprep.subr.bf16.mxu0 %v5196_v34  ;;  %v5539_v33 = vcombine.low %v1032_v15, %v1036_v24  ;;  %v5404_v34 = vcombine.high %v896_v29, %v900_v31  ;;  %v1012_v59 = vld [vmem:[#allocation11 + $0xc68] sm:$0xff] }
 0x316   :  { %3962 = vmatprep.subr.bf16.mxu1 %v5324_v10  ;;  %v5532_v10 = vcombine.high %v1024_v5, %v1028_v21  ;;  %v872_v22 = vld [vmem:[#allocation11 + $0x808] sm:$0xff] }
 0x317   :  { %v876_v20 = vld [vmem:[#allocation11 + $0x828] sm:$0xff] }
 0x318   :  { %3922 = vmatpush2.bf16.msra.mxu0 %v5195_v45  ;;  %v5403_v45 = vcombine.low %v896_v29, %v900_v31  ;;  %v1004_v52 = vld [vmem:[#allocation11 + $0xc28] sm:$0xff] }
 0x319   :  { %3963 = vmatpush2.bf16.msra.mxu1 %v5323_v46  ;;  %3923 = vmatprep.subr.bf16.mxu0 %v5188_v17  ;;  %v5531_v46 = vcombine.low %v1024_v5, %v1028_v21  ;;  %v5396_v17 = vcombine.high %v888_v36, %v892_v40  ;;  %v992_v62 = vld [vmem:[#allocation11 + $0xbc8] sm:$0xff] }
 0x31a   :  { %3964 = vmatprep.subr.bf16.mxu1 %v5316_v49  ;;  %v5524_v49 = vcombine.high %v1016_v42, %v1020_v44  ;;  %v1120_v4 = vld [vmem:[#allocation11 + $0xfc8] sm:$0xff] }
 0x31b   :  { %v1124_v6 = vld [vmem:[#allocation11 + $0xfe8] sm:$0xff] }
 0x31c   :  { %3924 = vmatpush2.bf16.msra.mxu0 %v5187_v60  ;;  %v5395_v60 = vcombine.low %v888_v36, %v892_v40  ;;  %v984_v13 = vld [vmem:[#allocation11 + $0xb88] sm:$0xff] }
 0x31d   :  { %3965 = vmatpush2.bf16.msra.mxu1 %v5315_v61  ;;  %3975 = vmatprep.subr.bf16.mxu0 %v5436_v63  ;;  %v5523_v61 = vcombine.low %v1016_v42, %v1020_v44  ;;  %v5388_v63 = vcombine.high %v880_v54, %v884_v56  ;;  %v988_v14 = vld [vmem:[#allocation11 + $0xba8] sm:$0xff] }
 0x31e   :  { %4016 = vmatprep.subr.bf16.mxu1 %v5564_v0  ;;  %v5516_v0 = vcombine.high %v1008_v58, %v1012_v59  ;;  %v1112_v15 = vld [vmem:[#allocation11 + $0xf88] sm:$0xff] }
 0x31f   :  { %3926 = vmatmul.mubr.bf16.vlgmr.msra.gmra.mxu0 %v6331_v9  ;;  %v1116_v24 = vld [vmem:[#allocation11 + $0xfa8] sm:$0xff] }
 0x320   :  { %3967 = vmatmul.mubr.bf16.vlgmr.msra.gmra.mxu1 %v6334_v43  ;;  %3976 = vmatpush1.bf16.msra.mxu0 %v5435_v27  ;;  %v1000_v27 = vld [vmem:[#allocation11 + $0xc08] sm:$0xff] }
 0x321   :  { %4007 = vmatprep.mubr.bf16.mxu0 %v6337_v48  ;;  %4017 = vmatpush1.bf16.msra.mxu1 %v5563_v1  ;;  %v5515_v1 = vcombine.low %v1008_v58, %v1012_v59  ;;  %v5508_v53 = vcombine.high %v1000_v27, %v1004_v52  ;;  %v976_v29 = vld [vmem:[#allocation11 + $0xb48] sm:$0xff] }
 0x322   :  { %4048 = vmatprep.mubr.bf16.mxu1 %v6343_v57  ;;  %3977 = vmatprep.subr.bf16.mxu0 %v5428_v28  ;;  %v5380_v28 = vcombine.high %v872_v22, %v876_v20  ;;  %v980_v31 = vld [vmem:[#allocation11 + $0xb68] sm:$0xff] }
 0x323   :  { %4018 = vmatprep.subr.bf16.mxu1 %v5556_v3  ;;  %v996_v3 = vld [vmem:[#allocation11 + $0xbe8] sm:$0xff] }
 0x324   :  { %3978 = vmatpush1.bf16.msra.mxu0 %v5427_v7  ;;  %v5379_v7 = vcombine.low %v872_v22, %v876_v20  ;;  %v1104_v5 = vld [vmem:[#allocation11 + $0xf48] sm:$0xff] }
 0x325   :  { %4019 = vmatpush1.bf16.msra.mxu1 %v5555_v8  ;;  %3979 = vmatprep.subr.bf16.mxu0 %v5420_v11  ;;  %v5507_v8 = vcombine.low %v1000_v27, %v1004_v52  ;;  %v5500_v11 = vcombine.high %v992_v62, %v996_v3  ;;  %v1108_v21 = vld [vmem:[#allocation11 + $0xf68] sm:$0xff] }
 0x326   :  { %4020 = vmatprep.subr.bf16.mxu1 %v5548_v12  ;;  %v5628_v12 = vcombine.high %v1120_v4, %v1124_v6  ;;  %v968_v36 = vld [vmem:[#allocation11 + $0xb08] sm:$0xff] }
 0x327   :  { %v972_v40 = vld [vmem:[#allocation11 + $0xb28] sm:$0xff] }
 0x328   :  { %3980 = vmatpush1.bf16.msra.mxu0 %v5419_v16  ;;  %v5499_v16 = vcombine.low %v992_v62, %v996_v3  ;;  %v1096_v42 = vld [vmem:[#allocation11 + $0xf08] sm:$0xff] }
 0x329   :  { %4021 = vmatpush1.bf16.msra.mxu1 %v5547_v18  ;;  %3981 = vmatprep.subr.bf16.mxu0 %v5412_v19  ;;  %v5627_v18 = vcombine.low %v1120_v4, %v1124_v6  ;;  %v5492_v19 = vcombine.high %v984_v13, %v988_v14  ;;  %v1100_v44 = vld [vmem:[#allocation11 + $0xf28] sm:$0xff] }
 0x32a   :  { %4022 = vmatprep.subr.bf16.mxu1 %v5540_v25  ;;  %v5620_v25 = vcombine.high %v1112_v15, %v1116_v24  ;;  %v960_v54 = vld [vmem:[#allocation11 + $0xac8] sm:$0xff] }
 0x32b   :  { %v964_v56 = vld [vmem:[#allocation11 + $0xae8] sm:$0xff] }
 0x32c   :  { %3982 = vmatpush1.bf16.msra.mxu0 %v5411_v32  ;;  %v5491_v32 = vcombine.low %v984_v13, %v988_v14  ;;  %v1088_v58 = vld [vmem:[#allocation11 + $0xec8] sm:$0xff] }
 0x32d   :  { %4023 = vmatpush1.bf16.msra.mxu1 %v5539_v33  ;;  %3983 = vmatprep.subr.bf16.mxu0 %v5404_v34  ;;  %v5619_v33 = vcombine.low %v1112_v15, %v1116_v24  ;;  %v5484_v34 = vcombine.high %v976_v29, %v980_v31  ;;  %v1092_v59 = vld [vmem:[#allocation11 + $0xee8] sm:$0xff] }
 0x32e   :  { %4024 = vmatprep.subr.bf16.mxu1 %v5532_v10  ;;  %v5612_v10 = vcombine.high %v1104_v5, %v1108_v21  ;;  %v952_v22 = vld [vmem:[#allocation11 + $0xa88] sm:$0xff] }
 0x32f   :  { %v956_v20 = vld [vmem:[#allocation11 + $0xaa8] sm:$0xff] }
 0x330   :  { %3984 = vmatpush1.bf16.msra.mxu0 %v5403_v45  ;;  %v5483_v45 = vcombine.low %v976_v29, %v980_v31  ;;  %v1080_v27 = vld [vmem:[#allocation11 + $0xe88] sm:$0xff]  ;;  %v673_v29 = vld [vmem:[#allocation11 + $0x1d0] sm:$0xff] }
 0x331   :  { %4025 = vmatpush1.bf16.msra.mxu1 %v5531_v46  ;;  %3985 = vmatprep.subr.bf16.mxu0 %v5396_v17  ;;  %v5611_v46 = vcombine.low %v1104_v5, %v1108_v21  ;;  %v5476_v17 = vcombine.high %v968_v36, %v972_v40  ;;  %v1084_v52 = vld [vmem:[#allocation11 + $0xea8] sm:$0xff]  ;;  %v677_v31 = vld [vmem:[#allocation11 + $0x1f0] sm:$0xff] }
 0x332   :  { %4026 = vmatprep.subr.bf16.mxu1 %v5524_v49  ;;  %v5604_v49 = vcombine.high %v1096_v42, %v1100_v44  ;;  %v944_v62 = vld [vmem:[#allocation11 + $0xa48] sm:$0xff]  ;;  %v801_v5 = vld [vmem:[#allocation11 + $0x5d0] sm:$0xff] }
 0x333   :  { %v948_v3 = vld [vmem:[#allocation11 + $0xa68] sm:$0xff]  ;;  %v805_v21 = vld [vmem:[#allocation11 + $0x5f0] sm:$0xff] }
 0x334   :  { %3986 = vmatpush1.bf16.msra.mxu0 %v5395_v60  ;;  %v5475_v60 = vcombine.low %v968_v36, %v972_v40  ;;  %v1072_v4 = vld [vmem:[#allocation11 + $0xe48] sm:$0xff]  ;;  %v5310_v36 = vcombine.high %v801_v5, %v805_v21  ;;  %v665_v40 = vld [vmem:[#allocation11 + $0x190] sm:$0xff] }
 0x335   :  { %4027 = vmatpush1.bf16.msra.mxu1 %v5523_v61  ;;  %3987 = vmatprep.subr.bf16.mxu0 %v5388_v63  ;;  %v5603_v61 = vcombine.low %v1096_v42, %v1100_v44  ;;  %v5468_v63 = vcombine.high %v960_v54, %v964_v56  ;;  %v1076_v6 = vld [vmem:[#allocation11 + $0xe68] sm:$0xff]  ;;  %v669_v42 = vld [vmem:[#allocation11 + $0x1b0] sm:$0xff]  ;;  %v5181_v44 = vcombine.low %v673_v29, %v677_v31 }
 0x336   :  { %4028 = vmatprep.subr.bf16.mxu1 %v5516_v0  ;;  %v5596_v0 = vcombine.high %v1088_v58, %v1092_v59  ;;  %v936_v13 = vld [vmem:[#allocation11 + $0xa08] sm:$0xff] }
 0x337   :  { %v940_v14 = vld [vmem:[#allocation11 + $0xa28] sm:$0xff] }
 0x338   :  { %3988 = vmatpush1.bf16.msra.mxu0 %v5387_v30  ;;  %v5467_v30 = vcombine.low %v960_v54, %v964_v56  ;;  %v1064_v15 = vld [vmem:[#allocation11 + $0xe08] sm:$0xff]  ;;  %v5174_v56 = vcombine.high %v665_v40, %v669_v42 }
 0x339   :  { %4029 = vmatpush1.bf16.msra.mxu1 %v5515_v1  ;;  %3989 = vmatprep.subr.bf16.mxu0 %v5380_v28  ;;  %v5595_v1 = vcombine.low %v1088_v58, %v1092_v59  ;;  %v5460_v28 = vcombine.high %v952_v22, %v956_v20  ;;  %v1068_v24 = vld [vmem:[#allocation11 + $0xe28] sm:$0xff]  ;;  %v657_v58 = vld [vmem:[#allocation11 + $0x150] sm:$0xff] }
 0x33a   :  { %4030 = vmatprep.subr.bf16.mxu1 %v5508_v53  ;;  %v5588_v53 = vcombine.high %v1080_v27, %v1084_v52  ;;  %v661_v59 = vld [vmem:[#allocation11 + $0x170] sm:$0xff] }
 0x33c   :  { %3990 = vmatpush1.bf16.msra.mxu0 %v5379_v7  ;;  %v5459_v7 = vcombine.low %v952_v22, %v956_v20  ;;  %v5173_v20 = vcombine.low %v665_v40, %v669_v42  ;;  %v765_v40 = vld [vmem:[#allocation11 + $0x4b0] sm:$0xff] }
 0x33d   :  { %4031 = vmatpush1.bf16.msra.mxu1 %v5507_v8  ;;  %3991 = vmatprep.subr.bf16.mxu0 %v5500_v11  ;;  %v5587_v8 = vcombine.low %v1080_v27, %v1084_v52  ;;  %v5452_v11 = vcombine.high %v944_v62, %v948_v3  ;;  %v5166_v52 = vcombine.high %v657_v58, %v661_v59 }
 0x33e   :  { %4032 = vmatprep.subr.bf16.mxu1 %v5628_v12  ;;  %v5580_v12 = vcombine.high %v1072_v4, %v1076_v6 }
 0x340   :  { %3992 = vmatpush2.bf16.msra.mxu0 %v5499_v16  ;;  %v5451_v16 = vcombine.low %v944_v62, %v948_v3  ;;  %v649_v62 = vld [vmem:[#allocation11 + $0x110] sm:$0xff] }
 0x341   :  { %4033 = vmatpush2.bf16.msra.mxu1 %v5627_v18  ;;  %3993 = vmatprep.subr.bf16.mxu0 %v5492_v19  ;;  %v5579_v18 = vcombine.low %v1072_v4, %v1076_v6  ;;  %v5444_v19 = vcombine.high %v936_v13, %v940_v14  ;;  %v653_v3 = vld [vmem:[#allocation11 + $0x130] sm:$0xff] }
 0x342   :  { %4034 = vmatprep.subr.bf16.mxu1 %v5620_v25  ;;  %v5572_v25 = vcombine.high %v1064_v15, %v1068_v24  ;;  %v777_v6 = vld [vmem:[#allocation11 + $0x510] sm:$0xff] }
 0x344   :  { %3994 = vmatpush2.bf16.msra.mxu0 %v5491_v32  ;;  %v5443_v32 = vcombine.low %v936_v13, %v940_v14 }
 0x345   :  { %4035 = vmatpush2.bf16.msra.mxu1 %v5619_v33  ;;  %3995 = vmatprep.subr.bf16.mxu0 %v5484_v34  ;;  %v5571_v33 = vcombine.low %v1064_v15, %v1068_v24  ;;  %v5182_v34 = vcombine.high %v673_v29, %v677_v31  ;;  %v5158_v15 = vcombine.high %v649_v62, %v653_v3  ;;  %v773_v29 = vld [vmem:[#allocation11 + $0x4f0] sm:$0xff] }
 0x346   :  { %4036 = vmatprep.subr.bf16.mxu1 %v5612_v10  ;;  %v6364_v10 = vld [vmem:[#allocation13] sm:$0xff]  ;;  %v5157_v31 = vcombine.low %v649_v62, %v653_v3  ;;  %v869_v62 = vld [vmem:[#allocation11 + $0x7f0] sm:$0xff] }
 0x347   :  { %v1136_v54 = vrot.slane %v6364_v10, %v6198_v39 }
 0x348   :  { %3996 = vmatpush2.bf16.msra.mxu0 %v5483_v45  ;;  %v1132_v45 = vrot.slane %v6364_v10, %v6194_v37 }
 0x349   :  { %4037 = vmatpush2.bf16.msra.mxu1 %v5611_v46  ;;  %3997 = vmatprep.subr.bf16.mxu0 %v5476_v17  ;;  %v793_v46 = vld [vmem:[#allocation11 + $0x590] sm:$0xff] }
 0x34a   :  { %4038 = vmatprep.subr.bf16.mxu1 %v5604_v49  ;;  %v797_v17 = vld [vmem:[#allocation11 + $0x5b0] sm:$0xff]  ;;  %v5309_v49 = vcombine.low %v801_v5, %v805_v21 }
 0x34b   :  { %v5301_v39 = vcombine.low %v793_v46, %v797_v17 }
 0x34c   :  { %3998 = vmatpush2.bf16.msra.mxu0 %v5475_v60 }
 0x34d   :  { %4039 = vmatpush2.bf16.msra.mxu1 %v5603_v61  ;;  %3999 = vmatprep.subr.bf16.mxu0 %v5468_v63  ;;  %v5302_v61 = vcombine.high %v793_v46, %v797_v17  ;;  %v785_v63 = vld [vmem:[#allocation11 + $0x550] sm:$0xff] }
 0x34e   :  { %4040 = vmatprep.subr.bf16.mxu1 %v5596_v0  ;;  %v789_v0 = vld [vmem:[#allocation11 + $0x570] sm:$0xff] }
 0x34f   :  { %v5293_v14 = vcombine.low %v785_v63, %v789_v0  ;;  %v625_v17 = vld [vmem:[#allocation11 + $0x50] sm:$0xff] }
 0x350   :  { %4000 = vmatpush2.bf16.msra.mxu0 %v5467_v30 }
 0x351   :  { %4041 = vmatpush2.bf16.msra.mxu1 %v5595_v1  ;;  %4001 = vmatprep.subr.bf16.mxu0 %v5460_v28 }
 0x352   :  { %4042 = vmatprep.subr.bf16.mxu1 %v5588_v53  ;;  %v5294_v53 = vcombine.high %v785_v63, %v789_v0  ;;  %v617_v63 = vld [vmem:[#allocation11 + $0x10] sm:$0xff] }
 0x353   :  { %v621_v0 = vld [vmem:[#allocation11 + $0x30] sm:$0xff] }
 0x354   :  { %4002 = vmatpush2.bf16.msra.mxu0 %v5459_v7  ;;  %v781_v7 = vld [vmem:[#allocation11 + $0x530] sm:$0xff]  ;;  %v5125_v3 = vcombine.low %v617_v63, %v621_v0 }
 0x355   :  { %4043 = vmatpush2.bf16.msra.mxu1 %v5587_v8  ;;  %4003 = vmatprep.subr.bf16.mxu0 %v5452_v11  ;;  %v5285_v5 = vcombine.low %v777_v6, %v781_v7 }
 0x356   :  { %4044 = vmatprep.subr.bf16.mxu1 %v5580_v12  ;;  %v5165_v12 = vcombine.low %v657_v58, %v661_v59 }
 0x358   :  { %4004 = vmatpush2.bf16.msra.mxu0 %v5451_v16  ;;  %v5286_v16 = vcombine.high %v777_v6, %v781_v7 }
 0x359   :  { %4045 = vmatpush2.bf16.msra.mxu1 %v5579_v18  ;;  %4005 = vmatprep.subr.bf16.mxu0 %v5444_v19  ;;  %v641_v18 = vld [vmem:[#allocation11 + $0xd0] sm:$0xff] }
 0x35a   :  { %4046 = vmatprep.subr.bf16.mxu1 %v5572_v25  ;;  %v645_v19 = vld [vmem:[#allocation11 + $0xf0] sm:$0xff] }
 0x35b   :  { %v769_v25 = vld [vmem:[#allocation11 + $0x4d0] sm:$0xff]  ;;  %v5150_v21 = vcombine.high %v641_v18, %v645_v19  ;;  %v5149_v42 = vcombine.low %v641_v18, %v645_v19 }
 0x35c   :  { %4006 = vmatpush2.bf16.msra.mxu0 %v5443_v32  ;;  %v5278_v32 = vcombine.high %v769_v25, %v773_v29  ;;  %v721_v19 = vld [vmem:[#allocation11 + $0x350] sm:$0xff] }
 0x35d   :  { %4047 = vmatpush2.bf16.msra.mxu1 %v5571_v33  ;;  %4057 = vmatprep.subr.bf16.mxu0 %v5182_v34  ;;  %v633_v33 = vld [vmem:[#allocation11 + $0x90] sm:$0xff] }
 0x35e   :  { %4098 = vmatprep.subr.bf16.mxu1 %v5310_v36  ;;  %v637_v34 = vld [vmem:[#allocation11 + $0xb0] sm:$0xff] }
 0x35f   :  { %4008 = vmatmul.mubr.bf16.vlgmr.msra.gmra.mxu0 %v6352_v26  ;;  %v3763_v60 = vpop.f32.mrf.mxu0  ;;  %v761_v36 = vld [vmem:[#allocation11 + $0x490] sm:$0xff]  ;;  %v5141_v58 = vcombine.low %v633_v33, %v637_v34 }
 0x360   :  { %4049 = vmatmul.mubr.bf16.vlgmr.msra.gmra.mxu1 %v6354_v23  ;;  %v3764_v37 = vadd.f32 %v3763_v60, %v1132_v45  ;;  %v3804_v22 = vpop.f32.mrf.mxu1  ;;  %4058 = vmatpush1.bf16.msra.mxu0 %v5181_v44  ;;  %v5277_v44 = vcombine.low %v769_v25, %v773_v29  ;;  %v5142_v45 = vcombine.high %v633_v33, %v637_v34  ;;  %v725_v25 = vld [vmem:[#allocation11 + $0x370] sm:$0xff] }
 0x361   :  { %4089 = vmatprep.mubr.bf16.mxu0 %v6326_v51  ;;  %4099 = vmatpush1.bf16.msra.mxu1 %v5309_v49  ;;  %v3765_v27 = vpop.f32.mrf.mxu0  ;;  %v5270_v46 = vcombine.high %v761_v36, %v765_v40  ;;  %v629_v49 = vld [vmem:[#allocation11 + $0x70] sm:$0xff]  ;;  %v5269_v59 = vcombine.low %v761_v36, %v765_v40 }
 0x362   :  { %v6373_v30 = vadd.f32 %v3804_v22, %v3764_v37  ;;  %4130 = vmatprep.mubr.bf16.mxu1 %v6328_v35  ;;  %v3766_v1 = vadd.f32 %v3765_v27, %v1136_v54  ;;  %v3806_v28 = vpop.f32.mrf.mxu1  ;;  %4059 = vmatprep.subr.bf16.mxu0 %v5174_v56  ;;  %v753_v54 = vld [vmem:[#allocation11 + $0x450] sm:$0xff]  ;;  %v5134_v60 = vcombine.high %v625_v17, %v629_v49 }
 0x363   :  { %4100 = vmatprep.subr.bf16.mxu1 %v5302_v61  ;;  %v3767_v4 = vpop.f32.mrf.mxu0  ;;  %v757_v56 = vld [vmem:[#allocation11 + $0x470] sm:$0xff] }
 0x364   :  { %v6376_v8 = vadd.f32 %v3806_v28, %v3766_v1  ;;  %v3808_v11 = vpop.f32.mrf.mxu1  ;;  %4060 = vmatpush1.bf16.msra.mxu0 %v5173_v20  ;;  %v5262_v61 = vcombine.high %v753_v54, %v757_v56  ;;  %v745_v37 = vld [vmem:[#allocation11 + $0x410] sm:$0xff]  ;;  %v5133_v20 = vcombine.low %v625_v17, %v629_v49  ;;  %v5261_v27 = vcombine.low %v753_v54, %v757_v56 }
 0x365   :  { %4101 = vmatpush1.bf16.msra.mxu1 %v5301_v39  ;;  %v3768_v13 = vpop.f32.mrf.mxu0  ;;  %4061 = vmatprep.subr.bf16.mxu0 %v5166_v52  ;;  %v749_v22 = vld [vmem:[#allocation11 + $0x430] sm:$0xff]  ;;  %v5126_v39 = vcombine.high %v617_v63, %v621_v0 }
 0x366   :  { %v3809_v24 = vpop.f32.mrf.mxu1  ;;  %4102 = vmatprep.subr.bf16.mxu1 %v5294_v53  ;;  %v5254_v52 = vcombine.high %v745_v37, %v749_v22  ;;  %v737_v1 = vld [vmem:[#allocation11 + $0x3d0] sm:$0xff]  ;;  %v5253_v4 = vcombine.low %v745_v37, %v749_v22 }
 0x367   :  { %v741_v28 = vld [vmem:[#allocation11 + $0x3f0] sm:$0xff] }
 0x368   :  { %4062 = vmatpush1.bf16.msra.mxu0 %v5165_v12  ;;  %v865_v53 = vld [vmem:[#allocation11 + $0x7d0] sm:$0xff]  ;;  %v5246_v6 = vcombine.high %v737_v1, %v741_v28 }
 0x369   :  { %4103 = vmatpush1.bf16.msra.mxu1 %v5293_v14  ;;  %4063 = vmatprep.subr.bf16.mxu0 %v5158_v15  ;;  %v5374_v7 = vcombine.high %v865_v53, %v869_v62  ;;  %v729_v11 = vld [vmem:[#allocation11 + $0x390] sm:$0xff]  ;;  %v5245_v15 = vcombine.low %v737_v1, %v741_v28  ;;  %v5373_v24 = vcombine.low %v865_v53, %v869_v62 }
 0x36a   :  { %4104 = vmatprep.subr.bf16.mxu1 %v5286_v16  ;;  %v733_v12 = vld [vmem:[#allocation11 + $0x3b0] sm:$0xff] }
 0x36b   :  { %v857_v13 = vld [vmem:[#allocation11 + $0x790] sm:$0xff]  ;;  %v5238_v16 = vcombine.high %v729_v11, %v733_v12 }
 0x36c   :  { %4064 = vmatpush1.bf16.msra.mxu0 %v5157_v31  ;;  %v861_v14 = vld [vmem:[#allocation11 + $0x7b0] sm:$0xff] }
 0x36d   :  { %4105 = vmatpush1.bf16.msra.mxu1 %v5285_v5  ;;  %4065 = vmatprep.subr.bf16.mxu0 %v5150_v21  ;;  %v5366_v18 = vcombine.high %v857_v13, %v861_v14  ;;  %v849_v29 = vld [vmem:[#allocation11 + $0x750] sm:$0xff]  ;;  %v5237_v5 = vcombine.low %v729_v11, %v733_v12  ;;  %v5365_v21 = vcombine.low %v857_v13, %v861_v14 }
 0x36e   :  { %4106 = vmatprep.subr.bf16.mxu1 %v5278_v32  ;;  %v853_v31 = vld [vmem:[#allocation11 + $0x770] sm:$0xff]  ;;  %v5230_v32 = vcombine.high %v721_v19, %v725_v25 }
 0x36f   :  { %v5358_v33 = vcombine.high %v849_v29, %v853_v31  ;;  %v713_v34 = vld [vmem:[#allocation11 + $0x310] sm:$0xff] }
 0x370   :  { %4066 = vmatpush1.bf16.msra.mxu0 %v5149_v42  ;;  %v717_v36 = vld [vmem:[#allocation11 + $0x330] sm:$0xff] }
 0x371   :  { %4107 = vmatpush1.bf16.msra.mxu1 %v5277_v44  ;;  %4067 = vmatprep.subr.bf16.mxu0 %v5142_v45  ;;  %v841_v40 = vld [vmem:[#allocation11 + $0x710] sm:$0xff]  ;;  %v5229_v44 = vcombine.low %v721_v19, %v725_v25  ;;  %v5357_v45 = vcombine.low %v849_v29, %v853_v31 }
 0x372   :  { %4108 = vmatprep.subr.bf16.mxu1 %v5270_v46  ;;  %v845_v42 = vld [vmem:[#allocation11 + $0x730] sm:$0xff]  ;;  %v5222_v46 = vcombine.high %v713_v34, %v717_v36 }
 0x373   :  { %v5350_v17 = vcombine.high %v841_v40, %v845_v42  ;;  %v705_v49 = vld [vmem:[#allocation11 + $0x2d0] sm:$0xff] }
 0x374   :  { %4068 = vmatpush1.bf16.msra.mxu0 %v5141_v58  ;;  %v709_v54 = vld [vmem:[#allocation11 + $0x2f0] sm:$0xff] }
 0x375   :  { %4109 = vmatpush1.bf16.msra.mxu1 %v5269_v59  ;;  %4069 = vmatprep.subr.bf16.mxu0 %v5134_v60  ;;  %v833_v56 = vld [vmem:[#allocation11 + $0x6d0] sm:$0xff]  ;;  %v5221_v59 = vcombine.low %v713_v34, %v717_v36  ;;  %v5349_v60 = vcombine.low %v841_v40, %v845_v42 }
 0x376   :  { %4110 = vmatprep.subr.bf16.mxu1 %v5262_v61  ;;  %v837_v58 = vld [vmem:[#allocation11 + $0x6f0] sm:$0xff]  ;;  %v5214_v61 = vcombine.high %v705_v49, %v709_v54 }
 0x377   :  { %v5342_v63 = vcombine.high %v833_v56, %v837_v58  ;;  %v697_v0 = vld [vmem:[#allocation11 + $0x290] sm:$0xff] }
 0x378   :  { %4070 = vmatpush1.bf16.msra.mxu0 %v5133_v20  ;;  %v701_v37 = vld [vmem:[#allocation11 + $0x2b0] sm:$0xff] }
 0x379   :  { %4111 = vmatpush1.bf16.msra.mxu1 %v5261_v27  ;;  %4071 = vmatprep.subr.bf16.mxu0 %v5126_v39  ;;  %v825_v22 = vld [vmem:[#allocation11 + $0x690] sm:$0xff]  ;;  %v5213_v27 = vcombine.low %v705_v49, %v709_v54  ;;  %v5341_v39 = vcombine.low %v833_v56, %v837_v58 }
 0x37a   :  { %4112 = vmatprep.subr.bf16.mxu1 %v5254_v52  ;;  %v829_v20 = vld [vmem:[#allocation11 + $0x6b0] sm:$0xff]  ;;  %v5206_v52 = vcombine.high %v697_v0, %v701_v37 }
 0x37b   :  { %v5334_v1 = vcombine.high %v825_v22, %v829_v20  ;;  %v689_v28 = vld [vmem:[#allocation11 + $0x250] sm:$0xff] }
 0x37c   :  { %4072 = vmatpush1.bf16.msra.mxu0 %v5125_v3  ;;  %v693_v53 = vld [vmem:[#allocation11 + $0x270] sm:$0xff] }
 0x37d   :  { %4113 = vmatpush1.bf16.msra.mxu1 %v5253_v4  ;;  %4073 = vmatprep.subr.bf16.mxu0 %v5246_v6  ;;  %v817_v62 = vld [vmem:[#allocation11 + $0x650] sm:$0xff]  ;;  %v5205_v4 = vcombine.low %v697_v0, %v701_v37  ;;  %v5333_v6 = vcombine.low %v825_v22, %v829_v20 }
 0x37e   :  { %4114 = vmatprep.subr.bf16.mxu1 %v5374_v7  ;;  %v821_v3 = vld [vmem:[#allocation11 + $0x670] sm:$0xff]  ;;  %v5198_v7 = vcombine.high %v689_v28, %v693_v53 }
 0x37f   :  { %v5326_v11 = vcombine.high %v817_v62, %v821_v3  ;;  %v681_v12 = vld [vmem:[#allocation11 + $0x210] sm:$0xff] }
 0x380   :  { %4074 = vmatpush2.bf16.msra.mxu0 %v5245_v15  ;;  %v685_v13 = vld [vmem:[#allocation11 + $0x230] sm:$0xff] }
 0x381   :  { %4115 = vmatpush2.bf16.msra.mxu1 %v5373_v24  ;;  %4075 = vmatprep.subr.bf16.mxu0 %v5238_v16  ;;  %v809_v14 = vld [vmem:[#allocation11 + $0x610] sm:$0xff]  ;;  %v5197_v24 = vcombine.low %v689_v28, %v693_v53  ;;  %v5325_v16 = vcombine.low %v817_v62, %v821_v3 }
 0x382   :  { %4116 = vmatprep.subr.bf16.mxu1 %v5366_v18  ;;  %v813_v15 = vld [vmem:[#allocation11 + $0x630] sm:$0xff]  ;;  %v5190_v18 = vcombine.high %v681_v12, %v685_v13 }
 0x383   :  { %v5318_v19 = vcombine.high %v809_v14, %v813_v15  ;;  %v929_v25 = vld [vmem:[#allocation11 + $0x9d0] sm:$0xff] }
 0x384   :  { %4076 = vmatpush2.bf16.msra.mxu0 %v5237_v5  ;;  %v933_v29 = vld [vmem:[#allocation11 + $0x9f0] sm:$0xff] }
 0x385   :  { %4117 = vmatpush2.bf16.msra.mxu1 %v5365_v21  ;;  %4077 = vmatprep.subr.bf16.mxu0 %v5230_v32  ;;  %v1057_v31 = vld [vmem:[#allocation11 + $0xdd0] sm:$0xff]  ;;  %v5189_v21 = vcombine.low %v681_v12, %v685_v13  ;;  %v5317_v32 = vcombine.low %v809_v14, %v813_v15  ;;  %v5437_v42 = vcombine.low %v929_v25, %v933_v29 }
 0x386   :  { %4118 = vmatprep.subr.bf16.mxu1 %v5358_v33  ;;  %v1061_v5 = vld [vmem:[#allocation11 + $0xdf0] sm:$0xff]  ;;  %v5438_v33 = vcombine.high %v929_v25, %v933_v29 }
 0x387   :  { %v5566_v34 = vcombine.high %v1057_v31, %v1061_v5  ;;  %v921_v36 = vld [vmem:[#allocation11 + $0x990] sm:$0xff] }
 0x388   :  { %4078 = vmatpush2.bf16.msra.mxu0 %v5229_v44  ;;  %v925_v40 = vld [vmem:[#allocation11 + $0x9b0] sm:$0xff] }
 0x389   :  { %4119 = vmatpush2.bf16.msra.mxu1 %v5357_v45  ;;  %4079 = vmatprep.subr.bf16.mxu0 %v5222_v46  ;;  %v1049_v44 = vld [vmem:[#allocation11 + $0xd90] sm:$0xff]  ;;  %v5565_v46 = vcombine.low %v1057_v31, %v1061_v5  ;;  %v5429_v0 = vcombine.low %v921_v36, %v925_v40 }
 0x38a   :  { %4120 = vmatprep.subr.bf16.mxu1 %v5350_v17  ;;  %v1053_v45 = vld [vmem:[#allocation11 + $0xdb0] sm:$0xff]  ;;  %v5430_v17 = vcombine.high %v921_v36, %v925_v40 }
 0x38b   :  { %v913_v49 = vld [vmem:[#allocation11 + $0x950] sm:$0xff]  ;;  %v5558_v58 = vcombine.high %v1049_v44, %v1053_v45  ;;  %v5557_v22 = vcombine.low %v1049_v44, %v1053_v45 }
 0x38c   :  { %4080 = vmatpush2.bf16.msra.mxu0 %v5221_v59  ;;  %v917_v54 = vld [vmem:[#allocation11 + $0x970] sm:$0xff] }
 0x38d   :  { %4121 = vmatpush2.bf16.msra.mxu1 %v5349_v60  ;;  %4081 = vmatprep.subr.bf16.mxu0 %v5214_v61  ;;  %v1041_v59 = vld [vmem:[#allocation11 + $0xd50] sm:$0xff]  ;;  %v5422_v20 = vcombine.high %v913_v49, %v917_v54 }
 0x38e   :  { %4122 = vmatprep.subr.bf16.mxu1 %v5342_v63  ;;  %v1045_v60 = vld [vmem:[#allocation11 + $0xd70] sm:$0xff] }
 0x38f   :  { %v909_v28 = vld [vmem:[#allocation11 + $0x930] sm:$0xff]  ;;  %v5549_v12 = vcombine.low %v1041_v59, %v1045_v60 }
 0x390   :  { %4082 = vmatpush2.bf16.msra.mxu0 %v5213_v27  ;;  %v1033_v62 = vld [vmem:[#allocation11 + $0xd10] sm:$0xff] }
 0x391   :  { %4123 = vmatpush2.bf16.msra.mxu1 %v5341_v39  ;;  %4083 = vmatprep.subr.bf16.mxu0 %v5206_v52  ;;  %v1037_v3 = vld [vmem:[#allocation11 + $0xd30] sm:$0xff] }
 0x392   :  { %4124 = vmatprep.subr.bf16.mxu1 %v5334_v1  ;;  %v905_v1 = vld [vmem:[#allocation11 + $0x910] sm:$0xff]  ;;  %v5542_v14 = vcombine.high %v1033_v62, %v1037_v3  ;;  %v5541_v25 = vcombine.low %v1033_v62, %v1037_v3 }
 0x393   :  { %v5414_v13 = vcombine.high %v905_v1, %v909_v28  ;;  %v897_v15 = vld [vmem:[#allocation11 + $0x8d0] sm:$0xff] }
 0x394   :  { %4084 = vmatpush2.bf16.msra.mxu0 %v5205_v4  ;;  %v889_v5 = vld [vmem:[#allocation11 + $0x890] sm:$0xff] }
 0x395   :  { %4125 = vmatpush2.bf16.msra.mxu1 %v5333_v6  ;;  %4085 = vmatprep.subr.bf16.mxu0 %v5198_v7  ;;  %v5421_v7 = vcombine.low %v913_v49, %v917_v54  ;;  %v881_v44 = vld [vmem:[#allocation11 + $0x850] sm:$0xff] }
 0x396   :  { %4126 = vmatprep.subr.bf16.mxu1 %v5326_v11  ;;  %v885_v45 = vld [vmem:[#allocation11 + $0x870] sm:$0xff] }
 0x398   :  { %4086 = vmatpush2.bf16.msra.mxu0 %v5197_v24  ;;  %v901_v24 = vld [vmem:[#allocation11 + $0x8f0] sm:$0xff] }
 0x399   :  { %4127 = vmatpush2.bf16.msra.mxu1 %v5325_v16  ;;  %4087 = vmatprep.subr.bf16.mxu0 %v5190_v18  ;;  %v1025_v16 = vld [vmem:[#allocation11 + $0xcd0] sm:$0xff]  ;;  %v5406_v29 = vcombine.high %v897_v15, %v901_v24 }
 0x39a   :  { %4128 = vmatprep.subr.bf16.mxu1 %v5318_v19  ;;  %v1029_v18 = vld [vmem:[#allocation11 + $0xcf0] sm:$0xff]  ;;  %v5413_v19 = vcombine.low %v905_v1, %v909_v28 }
 0x39b   :  { %v5534_v31 = vcombine.high %v1025_v16, %v1029_v18  ;;  %v5533_v36 = vcombine.low %v1025_v16, %v1029_v18  ;;  %v1125_v1 = vld [vmem:[#allocation11 + $0xff0] sm:$0xff] }
 0x39c   :  { %4088 = vmatpush2.bf16.msra.mxu0 %v5189_v21  ;;  %v893_v21 = vld [vmem:[#allocation11 + $0x8b0] sm:$0xff] }
 0x39d   :  { %4129 = vmatpush2.bf16.msra.mxu1 %v5317_v32  ;;  %4139 = vmatprep.subr.bf16.mxu0 %v5438_v33  ;;  %v1017_v32 = vld [vmem:[#allocation11 + $0xc90] sm:$0xff]  ;;  %v5398_v40 = vcombine.high %v889_v5, %v893_v21  ;;  %v5397_v49 = vcombine.low %v889_v5, %v893_v21 }
 0x39e   :  { %4180 = vmatprep.subr.bf16.mxu1 %v5566_v34  ;;  %v1021_v33 = vld [vmem:[#allocation11 + $0xcb0] sm:$0xff]  ;;  %v5405_v34 = vcombine.low %v897_v15, %v901_v24 }
 0x39f   :  { %v3845_v56 = vpop.f32.mrf.mxu0  ;;  %4090 = vmatmul.mubr.bf16.vlgmr.msra.gmra.mxu0 %v6331_v9  ;;  %v5525_v54 = vcombine.low %v1017_v32, %v1021_v33  ;;  %v977_v24 = vld [vmem:[#allocation11 + $0xb50] sm:$0xff] }
 0x3a0   :  { %v3846_v61 = vadd.f32 %v3845_v56, %v6373_v30  ;;  %v3886_v63 = vpop.f32.mrf.mxu1  ;;  %4131 = vmatmul.mubr.bf16.vlgmr.msra.gmra.mxu1 %v6334_v43  ;;  %4140 = vmatpush1.bf16.msra.mxu0 %v5437_v42  ;;  %v5550_v30 = vcombine.high %v1041_v59, %v1045_v60  ;;  %v5526_v42 = vcombine.high %v1017_v32, %v1021_v33  ;;  %v873_v59 = vld [vmem:[#allocation11 + $0x810] sm:$0xff] }
 0x3a1   :  { %4171 = vmatprep.mubr.bf16.mxu0 %v6337_v48  ;;  %4181 = vmatpush1.bf16.msra.mxu1 %v5565_v46  ;;  %v3847_v37 = vpop.f32.mrf.mxu0  ;;  %v1009_v46 = vld [vmem:[#allocation11 + $0xc50] sm:$0xff]  ;;  %v5390_v56 = vcombine.high %v881_v44, %v885_v45 }
 0x3a2   :  { %v6382_v27 = vadd.f32 %v3886_v63, %v3846_v61  ;;  %4212 = vmatprep.mubr.bf16.mxu1 %v6343_v57  ;;  %v3848_v39 = vadd.f32 %v3847_v37, %v6376_v8  ;;  %v3888_v52 = vpop.f32.mrf.mxu1  ;;  %4141 = vmatprep.subr.bf16.mxu0 %v5430_v17  ;;  %v1013_v17 = vld [vmem:[#allocation11 + $0xc70] sm:$0xff] }
 0x3a3   :  { %v3849_v53 = vpop.f32.mrf.mxu0  ;;  %4182 = vmatprep.subr.bf16.mxu1 %v5558_v58  ;;  %v5518_v58 = vcombine.high %v1009_v46, %v1013_v17  ;;  %v877_v60 = vld [vmem:[#allocation11 + $0x830] sm:$0xff]  ;;  %v5517_v37 = vcombine.low %v1009_v46, %v1013_v17 }
 0x3a4   :  { %v6386_v4 = vadd.f32 %v3888_v52, %v3848_v39  ;;  %v3890_v6 = vpop.f32.mrf.mxu1  ;;  %4142 = vmatpush1.bf16.msra.mxu0 %v5429_v0  ;;  %v1001_v61 = vld [vmem:[#allocation11 + $0xc10] sm:$0xff]  ;;  %v5389_v0 = vcombine.low %v881_v44, %v885_v45  ;;  %v5381_v28 = vcombine.low %v873_v59, %v877_v60 }
 0x3a5   :  { %4183 = vmatpush1.bf16.msra.mxu1 %v5557_v22  ;;  %v3850_v11 = vpop.f32.mrf.mxu0  ;;  %4143 = vmatprep.subr.bf16.mxu0 %v5422_v20  ;;  %v1005_v63 = vld [vmem:[#allocation11 + $0xc30] sm:$0xff]  ;;  %v5382_v22 = vcombine.high %v873_v59, %v877_v60 }
 0x3a6   :  { %v3891_v8 = vpop.f32.mrf.mxu1  ;;  %4184 = vmatprep.subr.bf16.mxu1 %v5550_v30  ;;  %v5510_v20 = vcombine.high %v1001_v61, %v1005_v63  ;;  %v993_v39 = vld [vmem:[#allocation11 + $0xbd0] sm:$0xff]  ;;  %v5509_v53 = vcombine.low %v1001_v61, %v1005_v63 }
 0x3a7   :  { %v997_v52 = vld [vmem:[#allocation11 + $0xbf0] sm:$0xff] }
 0x3a8   :  { %4144 = vmatpush1.bf16.msra.mxu0 %v5421_v7  ;;  %v1121_v30 = vld [vmem:[#allocation11 + $0xfd0] sm:$0xff]  ;;  %v5502_v62 = vcombine.high %v993_v39, %v997_v52 }
 0x3a9   :  { %4185 = vmatpush1.bf16.msra.mxu1 %v5549_v12  ;;  %4145 = vmatprep.subr.bf16.mxu0 %v5414_v13  ;;  %v5630_v3 = vcombine.high %v1121_v30, %v1125_v1  ;;  %v985_v6 = vld [vmem:[#allocation11 + $0xb90] sm:$0xff]  ;;  %v5501_v13 = vcombine.low %v993_v39, %v997_v52  ;;  %v5629_v8 = vcombine.low %v1121_v30, %v1125_v1 }
 0x3aa   :  { %4186 = vmatprep.subr.bf16.mxu1 %v5542_v14  ;;  %v989_v7 = vld [vmem:[#allocation11 + $0xbb0] sm:$0xff] }
 0x3ab   :  { %v1113_v11 = vld [vmem:[#allocation11 + $0xf90] sm:$0xff]  ;;  %v5494_v14 = vcombine.high %v985_v6, %v989_v7 }
 0x3ac   :  { %4146 = vmatpush1.bf16.msra.mxu0 %v5413_v19  ;;  %v1117_v12 = vld [vmem:[#allocation11 + $0xfb0] sm:$0xff] }
 0x3ad   :  { %4187 = vmatpush1.bf16.msra.mxu1 %v5541_v25  ;;  %4147 = vmatprep.subr.bf16.mxu0 %v5406_v29  ;;  %v5622_v15 = vcombine.high %v1113_v11, %v1117_v12  ;;  %v981_v16 = vld [vmem:[#allocation11 + $0xb70] sm:$0xff]  ;;  %v5493_v25 = vcombine.low %v985_v6, %v989_v7  ;;  %v5621_v29 = vcombine.low %v1113_v11, %v1117_v12 }
 0x3ae   :  { %4188 = vmatprep.subr.bf16.mxu1 %v5534_v31  ;;  %v1105_v18 = vld [vmem:[#allocation11 + $0xf50] sm:$0xff]  ;;  %v5486_v31 = vcombine.high %v977_v24, %v981_v16 }
 0x3af   :  { %v1109_v19 = vld [vmem:[#allocation11 + $0xf70] sm:$0xff] }
 0x3b0   :  { %4148 = vmatpush1.bf16.msra.mxu0 %v5405_v34  ;;  %v5614_v5 = vcombine.high %v1105_v18, %v1109_v19  ;;  %v969_v21 = vld [vmem:[#allocation11 + $0xb10] sm:$0xff] }
 0x3b1   :  { %4189 = vmatpush1.bf16.msra.mxu1 %v5533_v36  ;;  %4149 = vmatprep.subr.bf16.mxu0 %v5398_v40  ;;  %v973_v32 = vld [vmem:[#allocation11 + $0xb30] sm:$0xff]  ;;  %v5485_v36 = vcombine.low %v977_v24, %v981_v16  ;;  %v5613_v40 = vcombine.low %v1105_v18, %v1109_v19  ;;  %v674_v16 = vld [vmem:[#allocation11 + $0x1d8] sm:$0xff] }
 0x3b2   :  { %4190 = vmatprep.subr.bf16.mxu1 %v5526_v42  ;;  %v1097_v33 = vld [vmem:[#allocation11 + $0xf10] sm:$0xff]  ;;  %v5478_v42 = vcombine.high %v969_v21, %v973_v32  ;;  %v678_v18 = vld [vmem:[#allocation11 + $0x1f8] sm:$0xff] }
 0x3b3   :  { %v1101_v34 = vld [vmem:[#allocation11 + $0xf30] sm:$0xff]  ;;  %v802_v19 = vld [vmem:[#allocation11 + $0x5d8] sm:$0xff] }
 0x3b4   :  { %4150 = vmatpush1.bf16.msra.mxu0 %v5397_v49  ;;  %v5606_v44 = vcombine.high %v1097_v33, %v1101_v34  ;;  %v961_v45 = vld [vmem:[#allocation11 + $0xad0] sm:$0xff] }
 0x3b5   :  { %4191 = vmatpush1.bf16.msra.mxu1 %v5525_v54  ;;  %4151 = vmatprep.subr.bf16.mxu0 %v5390_v56  ;;  %v965_v46 = vld [vmem:[#allocation11 + $0xaf0] sm:$0xff]  ;;  %v5477_v54 = vcombine.low %v969_v21, %v973_v32  ;;  %v5605_v56 = vcombine.low %v1097_v33, %v1101_v34  ;;  %v666_v32 = vld [vmem:[#allocation11 + $0x198] sm:$0xff]  ;;  %v1140_v34 = vrot.slane %v6364_v10, %v6196_v38 }
 0x3b6   :  { %4192 = vmatprep.subr.bf16.mxu1 %v5518_v58  ;;  %v1089_v17 = vld [vmem:[#allocation11 + $0xed0] sm:$0xff]  ;;  %v5470_v58 = vcombine.high %v961_v45, %v965_v46  ;;  %v670_v33 = vld [vmem:[#allocation11 + $0x1b8] sm:$0xff] }
 0x3b7   :  { %v1093_v49 = vld [vmem:[#allocation11 + $0xef0] sm:$0xff] }
 0x3b8   :  { %4152 = vmatpush1.bf16.msra.mxu0 %v5389_v0  ;;  %v5598_v59 = vcombine.high %v1089_v17, %v1093_v49  ;;  %v953_v60 = vld [vmem:[#allocation11 + $0xa90] sm:$0xff] }
 0x3b9   :  { %4193 = vmatpush1.bf16.msra.mxu1 %v5517_v37  ;;  %4153 = vmatprep.subr.bf16.mxu0 %v5382_v22  ;;  %v957_v61 = vld [vmem:[#allocation11 + $0xab0] sm:$0xff]  ;;  %v5469_v37 = vcombine.low %v961_v45, %v965_v46  ;;  %v5597_v22 = vcombine.low %v1089_v17, %v1093_v49  ;;  %v1144_v45 = vrot.slane %v6364_v10, %v6200_v41  ;;  %v658_v17 = vld [vmem:[#allocation11 + $0x158] sm:$0xff] }
 0x3ba   :  { %4194 = vmatprep.subr.bf16.mxu1 %v5510_v20  ;;  %v1081_v63 = vld [vmem:[#allocation11 + $0xe90] sm:$0xff]  ;;  %v5462_v20 = vcombine.high %v953_v60, %v957_v61  ;;  %v5176_v46 = vcombine.high %v666_v32, %v670_v33  ;;  %v662_v49 = vld [vmem:[#allocation11 + $0x178] sm:$0xff] }
 0x3bb   :  { %v1085_v0 = vld [vmem:[#allocation11 + $0xeb0] sm:$0xff]  ;;  %v5168_v10 = vcombine.high %v658_v17, %v662_v49 }
 0x3bc   :  { %4154 = vmatpush1.bf16.msra.mxu0 %v5381_v28  ;;  %v5590_v39 = vcombine.high %v1081_v63, %v1085_v0  ;;  %v945_v52 = vld [vmem:[#allocation11 + $0xa50] sm:$0xff] }
 0x3bd   :  { %4195 = vmatpush1.bf16.msra.mxu1 %v5509_v53  ;;  %4155 = vmatprep.subr.bf16.mxu0 %v5502_v62  ;;  %v949_v30 = vld [vmem:[#allocation11 + $0xa70] sm:$0xff]  ;;  %v5461_v53 = vcombine.low %v953_v60, %v957_v61  ;;  %v5589_v62 = vcombine.low %v1081_v63, %v1085_v0  ;;  %v5175_v61 = vcombine.low %v666_v32, %v670_v33 }
 0x3be   :  { %4196 = vmatprep.subr.bf16.mxu1 %v5630_v3  ;;  %v1073_v1 = vld [vmem:[#allocation11 + $0xe50] sm:$0xff]  ;;  %v5454_v3 = vcombine.high %v945_v52, %v949_v30 }
 0x3bf   :  { %v1077_v28 = vld [vmem:[#allocation11 + $0xe70] sm:$0xff] }
 0x3c0   :  { %4156 = vmatpush2.bf16.msra.mxu0 %v5501_v13  ;;  %v5582_v6 = vcombine.high %v1073_v1, %v1077_v28  ;;  %v937_v7 = vld [vmem:[#allocation11 + $0xa10] sm:$0xff] }
 0x3c1   :  { %4197 = vmatpush2.bf16.msra.mxu1 %v5629_v8  ;;  %4157 = vmatprep.subr.bf16.mxu0 %v5494_v14  ;;  %v941_v11 = vld [vmem:[#allocation11 + $0xa30] sm:$0xff]  ;;  %v5453_v8 = vcombine.low %v945_v52, %v949_v30  ;;  %v5581_v14 = vcombine.low %v1073_v1, %v1077_v28  ;;  %v654_v52 = vld [vmem:[#allocation11 + $0x138] sm:$0xff] }
 0x3c2   :  { %4198 = vmatprep.subr.bf16.mxu1 %v5622_v15  ;;  %v1065_v12 = vld [vmem:[#allocation11 + $0xe10] sm:$0xff]  ;;  %v5446_v15 = vcombine.high %v937_v7, %v941_v11  ;;  %v778_v1 = vld [vmem:[#allocation11 + $0x518] sm:$0xff] }
 0x3c3   :  { %v1069_v13 = vld [vmem:[#allocation11 + $0xe30] sm:$0xff]  ;;  %v782_v28 = vld [vmem:[#allocation11 + $0x538] sm:$0xff] }
 0x3c4   :  { %4158 = vmatpush2.bf16.msra.mxu0 %v5493_v25  ;;  %v5574_v24 = vcombine.high %v1065_v12, %v1069_v13  ;;  %v806_v25 = vld [vmem:[#allocation11 + $0x5f8] sm:$0xff] }
 0x3c5   :  { %4199 = vmatpush2.bf16.msra.mxu1 %v5621_v29  ;;  %4159 = vmatprep.subr.bf16.mxu0 %v5486_v31  ;;  %v5445_v29 = vcombine.low %v937_v7, %v941_v11  ;;  %v5573_v31 = vcombine.low %v1065_v12, %v1069_v13  ;;  %v5312_v21 = vcombine.high %v802_v19, %v806_v25  ;;  %v642_v12 = vld [vmem:[#allocation11 + $0xd8] sm:$0xff] }
 0x3c6   :  { %4200 = vmatprep.subr.bf16.mxu1 %v5614_v5  ;;  %v5184_v5 = vcombine.high %v674_v16, %v678_v18  ;;  %v5288_v11 = vcombine.high %v778_v1, %v782_v28  ;;  %v646_v13 = vld [vmem:[#allocation11 + $0xf8] sm:$0xff] }
 0x3c8   :  { %4160 = vmatpush2.bf16.msra.mxu0 %v5485_v36  ;;  %v5183_v36 = vcombine.low %v674_v16, %v678_v18  ;;  %v5152_v16 = vcombine.high %v642_v12, %v646_v13 }
 0x3c9   :  { %4201 = vmatpush2.bf16.msra.mxu1 %v5613_v40  ;;  %4161 = vmatprep.subr.bf16.mxu0 %v5478_v42  ;;  %v794_v40 = vld [vmem:[#allocation11 + $0x598] sm:$0xff] }
 0x3ca   :  { %4202 = vmatprep.subr.bf16.mxu1 %v5606_v44  ;;  %v798_v42 = vld [vmem:[#allocation11 + $0x5b8] sm:$0xff]  ;;  %v5311_v44 = vcombine.low %v802_v19, %v806_v25 }
 0x3cb   :  { %v5303_v41 = vcombine.low %v794_v40, %v798_v42  ;;  %v634_v19 = vld [vmem:[#allocation11 + $0x98] sm:$0xff] }
 0x3cc   :  { %4162 = vmatpush2.bf16.msra.mxu0 %v5477_v54  ;;  %v638_v25 = vld [vmem:[#allocation11 + $0xb8] sm:$0xff] }
 0x3cd   :  { %4203 = vmatpush2.bf16.msra.mxu1 %v5605_v56  ;;  %4163 = vmatprep.subr.bf16.mxu0 %v5470_v58  ;;  %v5304_v56 = vcombine.high %v794_v40, %v798_v42  ;;  %v786_v58 = vld [vmem:[#allocation11 + $0x558] sm:$0xff]  ;;  %v5144_v32 = vcombine.high %v634_v19, %v638_v25 }
 0x3ce   :  { %4204 = vmatprep.subr.bf16.mxu1 %v5598_v59  ;;  %v790_v59 = vld [vmem:[#allocation11 + $0x578] sm:$0xff] }
 0x3cf   :  { %v754_v40 = vld [vmem:[#allocation11 + $0x458] sm:$0xff] }
 0x3d0   :  { %4164 = vmatpush2.bf16.msra.mxu0 %v5469_v37  ;;  %v758_v42 = vld [vmem:[#allocation11 + $0x478] sm:$0xff] }
 0x3d1   :  { %4205 = vmatpush2.bf16.msra.mxu1 %v5597_v22  ;;  %4165 = vmatprep.subr.bf16.mxu0 %v5462_v20  ;;  %v5296_v20 = vcombine.high %v786_v58, %v790_v59 }
 0x3d2   :  { %4206 = vmatprep.subr.bf16.mxu1 %v5590_v39  ;;  %v650_v39 = vld [vmem:[#allocation11 + $0x118] sm:$0xff] }
 0x3d4   :  { %4166 = vmatpush2.bf16.msra.mxu0 %v5461_v53 }
 0x3d5   :  { %4207 = vmatpush2.bf16.msra.mxu1 %v5589_v62  ;;  %4167 = vmatprep.subr.bf16.mxu0 %v5454_v3  ;;  %v5167_v62 = vcombine.low %v658_v17, %v662_v49  ;;  %v5264_v17 = vcombine.high %v754_v40, %v758_v42  ;;  %v618_v49 = vld [vmem:[#allocation11 + $0x18] sm:$0xff] }
 0x3d6   :  { %4208 = vmatprep.subr.bf16.mxu1 %v5582_v6  ;;  %v5295_v6 = vcombine.low %v786_v58, %v790_v59  ;;  %v750_v58 = vld [vmem:[#allocation11 + $0x438] sm:$0xff] }
 0x3d8   :  { %4168 = vmatpush2.bf16.msra.mxu0 %v5453_v8  ;;  %v770_v8 = vld [vmem:[#allocation11 + $0x4d8] sm:$0xff] }
 0x3d9   :  { %4209 = vmatpush2.bf16.msra.mxu1 %v5581_v14  ;;  %4169 = vmatprep.subr.bf16.mxu0 %v5446_v15  ;;  %v774_v14 = vld [vmem:[#allocation11 + $0x4f8] sm:$0xff]  ;;  %v5159_v15 = vcombine.low %v650_v39, %v654_v52 }
 0x3da   :  { %4210 = vmatprep.subr.bf16.mxu1 %v5574_v24  ;;  %v5287_v24 = vcombine.low %v778_v1, %v782_v28  ;;  %v5280_v18 = vcombine.high %v770_v8, %v774_v14  ;;  %v734_v1 = vld [vmem:[#allocation11 + $0x3b8] sm:$0xff] }
 0x3db   :  { %v858_v28 = vld [vmem:[#allocation11 + $0x798] sm:$0xff] }
 0x3dc   :  { %4170 = vmatpush2.bf16.msra.mxu0 %v5445_v29  ;;  %v762_v29 = vld [vmem:[#allocation11 + $0x498] sm:$0xff] }
 0x3dd   :  { %4211 = vmatpush2.bf16.msra.mxu1 %v5573_v31  ;;  %4221 = vmatprep.subr.bf16.mxu0 %v5184_v5  ;;  %v766_v31 = vld [vmem:[#allocation11 + $0x4b8] sm:$0xff]  ;;  %v5151_v5 = vcombine.low %v642_v12, %v646_v13 }
 0x3de   :  { %4262 = vmatprep.subr.bf16.mxu1 %v5312_v21  ;;  %v5279_v21 = vcombine.low %v770_v8, %v774_v14  ;;  %v5272_v33 = vcombine.high %v762_v29, %v766_v31  ;;  %v850_v12 = vld [vmem:[#allocation11 + $0x758] sm:$0xff] }
 0x3df   :  { %v3927_v54 = vpop.f32.mrf.mxu0  ;;  %4172 = vmatmul.mubr.bf16.vlgmr.msra.gmra.mxu0 %v6352_v26  ;;  %v854_v13 = vld [vmem:[#allocation11 + $0x778] sm:$0xff] }
 0x3e0   :  { %v3928_v38 = vadd.f32 %v3927_v54, %v1140_v34  ;;  %v3968_v60 = vpop.f32.mrf.mxu1  ;;  %4213 = vmatmul.mubr.bf16.vlgmr.msra.gmra.mxu1 %v6354_v23  ;;  %4222 = vmatpush1.bf16.msra.mxu0 %v5183_v36  ;;  %v626_v34 = vld [vmem:[#allocation11 + $0x58] sm:$0xff] }
 0x3e1   :  { %4253 = vmatprep.mubr.bf16.mxu0 %v6326_v51  ;;  %4263 = vmatpush1.bf16.msra.mxu1 %v5311_v44  ;;  %v3929_v63 = vpop.f32.mrf.mxu0  ;;  %v630_v36 = vld [vmem:[#allocation11 + $0x78] sm:$0xff]  ;;  %v5143_v44 = vcombine.low %v634_v19, %v638_v25 }
 0x3e2   :  { %v6395_v0 = vadd.f32 %v3968_v60, %v3928_v38  ;;  %4294 = vmatprep.mubr.bf16.mxu1 %v6328_v35  ;;  %v3930_v37 = vadd.f32 %v3929_v63, %v1144_v45  ;;  %v3970_v22 = vpop.f32.mrf.mxu1  ;;  %4223 = vmatprep.subr.bf16.mxu0 %v5176_v46  ;;  %v5160_v35 = vcombine.high %v650_v39, %v654_v52  ;;  %v622_v54 = vld [vmem:[#allocation11 + $0x38] sm:$0xff] }
 0x3e3   :  { %v3931_v30 = vpop.f32.mrf.mxu0  ;;  %4264 = vmatprep.subr.bf16.mxu1 %v5304_v56  ;;  %v5271_v45 = vcombine.low %v762_v29, %v766_v31  ;;  %v5136_v46 = vcombine.high %v626_v34, %v630_v36  ;;  %v746_v56 = vld [vmem:[#allocation11 + $0x418] sm:$0xff]  ;;  %v5135_v59 = vcombine.low %v626_v34, %v630_v36  ;;  %v5263_v38 = vcombine.low %v754_v40, %v758_v42 }
 0x3e4   :  { %v6398_v53 = vadd.f32 %v3970_v22, %v3930_v37  ;;  %v3972_v51 = vpop.f32.mrf.mxu1  ;;  %4224 = vmatpush1.bf16.msra.mxu0 %v5175_v61  ;;  %v5128_v60 = vcombine.high %v618_v49, %v622_v54  ;;  %v5256_v61 = vcombine.high %v746_v56, %v750_v58  ;;  %v738_v63 = vld [vmem:[#allocation11 + $0x3d8] sm:$0xff]  ;;  %v5127_v22 = vcombine.low %v618_v49, %v622_v54 }
 0x3e5   :  { %4265 = vmatpush1.bf16.msra.mxu1 %v5303_v41  ;;  %v3932_v3 = vpop.f32.mrf.mxu0  ;;  %4225 = vmatprep.subr.bf16.mxu0 %v5168_v10  ;;  %v742_v41 = vld [vmem:[#allocation11 + $0x3f8] sm:$0xff]  ;;  %v5359_v31 = vcombine.low %v850_v12, %v854_v13 }
 0x3e6   :  { %v3973_v7 = vpop.f32.mrf.mxu1  ;;  %4266 = vmatprep.subr.bf16.mxu1 %v5296_v20  ;;  %v866_v10 = vld [vmem:[#allocation11 + $0x7d8] sm:$0xff]  ;;  %v5255_v20 = vcombine.low %v746_v56, %v750_v58  ;;  %v5248_v39 = vcombine.high %v738_v63, %v742_v41 }
 0x3e7   :  { %v870_v37 = vld [vmem:[#allocation11 + $0x7f8] sm:$0xff] }
 0x3e8   :  { %4226 = vmatpush1.bf16.msra.mxu0 %v5167_v62  ;;  %v5376_v52 = vcombine.high %v866_v10, %v870_v37  ;;  %v730_v30 = vld [vmem:[#allocation11 + $0x398] sm:$0xff]  ;;  %v5247_v62 = vcombine.low %v738_v63, %v742_v41  ;;  %v5375_v3 = vcombine.low %v866_v10, %v870_v37 }
 0x3e9   :  { %4267 = vmatpush1.bf16.msra.mxu1 %v5295_v6  ;;  %4227 = vmatprep.subr.bf16.mxu0 %v5160_v35  ;;  %v862_v51 = vld [vmem:[#allocation11 + $0x7b8] sm:$0xff]  ;;  %v5240_v6 = vcombine.high %v730_v30, %v734_v1  ;;  %v5239_v8 = vcombine.low %v730_v30, %v734_v1 }
 0x3ea   :  { %4268 = vmatprep.subr.bf16.mxu1 %v5288_v11  ;;  %v5368_v35 = vcombine.high %v858_v28, %v862_v51  ;;  %v722_v7 = vld [vmem:[#allocation11 + $0x358] sm:$0xff]  ;;  %v5367_v14 = vcombine.low %v858_v28, %v862_v51 }
 0x3eb   :  { %v726_v11 = vld [vmem:[#allocation11 + $0x378] sm:$0xff] }
 0x3ec   :  { %4228 = vmatpush1.bf16.msra.mxu0 %v5159_v15  ;;  %v5232_v15 = vcombine.high %v722_v7, %v726_v11  ;;  %v842_v19 = vld [vmem:[#allocation11 + $0x718] sm:$0xff]  ;;  %v5231_v29 = vcombine.low %v722_v7, %v726_v11 }
 0x3ed   :  { %4269 = vmatpush1.bf16.msra.mxu1 %v5287_v24  ;;  %4229 = vmatprep.subr.bf16.mxu0 %v5152_v16  ;;  %v5360_v24 = vcombine.high %v850_v12, %v854_v13  ;;  %v714_v16 = vld [vmem:[#allocation11 + $0x318] sm:$0xff] }
 0x3ee   :  { %4270 = vmatprep.subr.bf16.mxu1 %v5280_v18  ;;  %v718_v18 = vld [vmem:[#allocation11 + $0x338] sm:$0xff] }
 0x3ef   :  { %v846_v25 = vld [vmem:[#allocation11 + $0x738] sm:$0xff]  ;;  %v5223_v40 = vcombine.low %v714_v16, %v718_v18 }
 0x3f0   :  { %4230 = vmatpush1.bf16.msra.mxu0 %v5151_v5  ;;  %v5224_v5 = vcombine.high %v714_v16, %v718_v18  ;;  %v834_v34 = vld [vmem:[#allocation11 + $0x6d8] sm:$0xff]  ;;  %v5351_v42 = vcombine.low %v842_v19, %v846_v25 }
 0x3f1   :  { %4271 = vmatpush1.bf16.msra.mxu1 %v5279_v21  ;;  %4231 = vmatprep.subr.bf16.mxu0 %v5144_v32  ;;  %v5352_v21 = vcombine.high %v842_v19, %v846_v25  ;;  %v706_v32 = vld [vmem:[#allocation11 + $0x2d8] sm:$0xff] }
 0x3f2   :  { %4272 = vmatprep.subr.bf16.mxu1 %v5272_v33  ;;  %v710_v33 = vld [vmem:[#allocation11 + $0x2f8] sm:$0xff] }
 0x3f3   :  { %v838_v36 = vld [vmem:[#allocation11 + $0x6f8] sm:$0xff]  ;;  %v5215_v56 = vcombine.low %v706_v32, %v710_v33 }
 0x3f4   :  { %4232 = vmatpush1.bf16.msra.mxu0 %v5143_v44  ;;  %v5216_v44 = vcombine.high %v706_v32, %v710_v33  ;;  %v826_v49 = vld [vmem:[#allocation11 + $0x698] sm:$0xff]  ;;  %v5343_v58 = vcombine.low %v834_v34, %v838_v36 }
 0x3f5   :  { %4273 = vmatpush1.bf16.msra.mxu1 %v5271_v45  ;;  %4233 = vmatprep.subr.bf16.mxu0 %v5136_v46  ;;  %v5344_v45 = vcombine.high %v834_v34, %v838_v36  ;;  %v698_v46 = vld [vmem:[#allocation11 + $0x298] sm:$0xff] }
 0x3f6   :  { %4274 = vmatprep.subr.bf16.mxu1 %v5264_v17  ;;  %v702_v17 = vld [vmem:[#allocation11 + $0x2b8] sm:$0xff] }
 0x3f7   :  { %v830_v54 = vld [vmem:[#allocation11 + $0x6b8] sm:$0xff]  ;;  %v5207_v10 = vcombine.low %v698_v46, %v702_v17 }
 0x3f8   :  { %4234 = vmatpush1.bf16.msra.mxu0 %v5135_v59  ;;  %v5208_v59 = vcombine.high %v698_v46, %v702_v17  ;;  %v818_v63 = vld [vmem:[#allocation11 + $0x658] sm:$0xff]  ;;  %v5335_v37 = vcombine.low %v826_v49, %v830_v54 }
 0x3f9   :  { %4275 = vmatpush1.bf16.msra.mxu1 %v5263_v38  ;;  %4235 = vmatprep.subr.bf16.mxu0 %v5128_v60  ;;  %v5336_v38 = vcombine.high %v826_v49, %v830_v54  ;;  %v690_v60 = vld [vmem:[#allocation11 + $0x258] sm:$0xff] }
 0x3fa   :  { %4276 = vmatprep.subr.bf16.mxu1 %v5256_v61  ;;  %v694_v61 = vld [vmem:[#allocation11 + $0x278] sm:$0xff] }
 0x3fb   :  { %v822_v41 = vld [vmem:[#allocation11 + $0x678] sm:$0xff]  ;;  %v5199_v28 = vcombine.low %v690_v60, %v694_v61 }
 0x3fc   :  { %4236 = vmatpush1.bf16.msra.mxu0 %v5127_v22  ;;  %v5200_v22 = vcombine.high %v690_v60, %v694_v61  ;;  %v810_v30 = vld [vmem:[#allocation11 + $0x618] sm:$0xff]  ;;  %v5327_v51 = vcombine.low %v818_v63, %v822_v41 }
 0x3fd   :  { %4277 = vmatpush1.bf16.msra.mxu1 %v5255_v20  ;;  %4237 = vmatprep.subr.bf16.mxu0 %v5248_v39  ;;  %v5328_v20 = vcombine.high %v818_v63, %v822_v41  ;;  %v682_v39 = vld [vmem:[#allocation11 + $0x218] sm:$0xff] }
 0x3fe   :  { %4278 = vmatprep.subr.bf16.mxu1 %v5376_v52  ;;  %v686_v52 = vld [vmem:[#allocation11 + $0x238] sm:$0xff] }
 0x3ff   :  { %v814_v1 = vld [vmem:[#allocation11 + $0x638] sm:$0xff]  ;;  %v5191_v12 = vcombine.low %v682_v39, %v686_v52 }
 0x400   :  { %4238 = vmatpush2.bf16.msra.mxu0 %v5247_v62  ;;  %v5192_v62 = vcombine.high %v682_v39, %v686_v52  ;;  %v1058_v7 = vld [vmem:[#allocation11 + $0xdd8] sm:$0xff]  ;;  %v5319_v13 = vcombine.low %v810_v30, %v814_v1 }
 0x401   :  { %4279 = vmatpush2.bf16.msra.mxu1 %v5375_v3  ;;  %4239 = vmatprep.subr.bf16.mxu0 %v5240_v6  ;;  %v5320_v3 = vcombine.high %v810_v30, %v814_v1  ;;  %v930_v6 = vld [vmem:[#allocation11 + $0x9d8] sm:$0xff] }
 0x402   :  { %4280 = vmatprep.subr.bf16.mxu1 %v5368_v35  ;;  %v934_v35 = vld [vmem:[#allocation11 + $0x9f8] sm:$0xff] }
 0x403   :  { %v1062_v11 = vld [vmem:[#allocation11 + $0xdf8] sm:$0xff]  ;;  %v5439_v16 = vcombine.low %v930_v6, %v934_v35 }
 0x404   :  { %4240 = vmatpush2.bf16.msra.mxu0 %v5239_v8  ;;  %v5440_v8 = vcombine.high %v930_v6, %v934_v35  ;;  %v1050_v18 = vld [vmem:[#allocation11 + $0xd98] sm:$0xff]  ;;  %v5567_v25 = vcombine.low %v1058_v7, %v1062_v11 }
 0x405   :  { %4281 = vmatpush2.bf16.msra.mxu1 %v5367_v14  ;;  %4241 = vmatprep.subr.bf16.mxu0 %v5232_v15  ;;  %v5568_v14 = vcombine.high %v1058_v7, %v1062_v11  ;;  %v922_v15 = vld [vmem:[#allocation11 + $0x998] sm:$0xff] }
 0x406   :  { %4282 = vmatprep.subr.bf16.mxu1 %v5360_v24  ;;  %v926_v24 = vld [vmem:[#allocation11 + $0x9b8] sm:$0xff] }
 0x407   :  { %v1054_v19 = vld [vmem:[#allocation11 + $0xdb8] sm:$0xff] }
 0x408   :  { %4242 = vmatpush2.bf16.msra.mxu0 %v5231_v29  ;;  %v5432_v29 = vcombine.high %v922_v15, %v926_v24  ;;  %v5560_v32 = vcombine.high %v1050_v18, %v1054_v19  ;;  %v1042_v33 = vld [vmem:[#allocation11 + $0xd58] sm:$0xff] }
 0x409   :  { %4283 = vmatpush2.bf16.msra.mxu1 %v5359_v31  ;;  %4243 = vmatprep.subr.bf16.mxu0 %v5224_v5  ;;  %v914_v31 = vld [vmem:[#allocation11 + $0x958] sm:$0xff] }
 0x40a   :  { %4284 = vmatprep.subr.bf16.mxu1 %v5352_v21  ;;  %v918_v5 = vld [vmem:[#allocation11 + $0x978] sm:$0xff] }
 0x40b   :  { %v1046_v34 = vld [vmem:[#allocation11 + $0xd78] sm:$0xff]  ;;  %v5424_v46 = vcombine.high %v914_v31, %v918_v5 }
 0x40c   :  { %4244 = vmatpush2.bf16.msra.mxu0 %v5223_v40  ;;  %v906_v49 = vld [vmem:[#allocation11 + $0x918] sm:$0xff]  ;;  %v5551_v60 = vcombine.low %v1042_v33, %v1046_v34 }
 0x40d   :  { %4285 = vmatpush2.bf16.msra.mxu1 %v5351_v42  ;;  %4245 = vmatprep.subr.bf16.mxu0 %v5216_v44  ;;  %v5431_v42 = vcombine.low %v922_v15, %v926_v24  ;;  %v910_v54 = vld [vmem:[#allocation11 + $0x938] sm:$0xff] }
 0x40e   :  { %4286 = vmatprep.subr.bf16.mxu1 %v5344_v45  ;;  %v5559_v45 = vcombine.low %v1050_v18, %v1054_v19  ;;  %v5416_v61 = vcombine.high %v906_v49, %v910_v54  ;;  %v898_v41 = vld [vmem:[#allocation11 + $0x8d8] sm:$0xff] }
 0x40f   :  { %v890_v1 = vld [vmem:[#allocation11 + $0x898] sm:$0xff] }
 0x410   :  { %4246 = vmatpush2.bf16.msra.mxu0 %v5215_v56  ;;  %v1034_v56 = vld [vmem:[#allocation11 + $0xd18] sm:$0xff] }
 0x411   :  { %4287 = vmatpush2.bf16.msra.mxu1 %v5343_v58  ;;  %4247 = vmatprep.subr.bf16.mxu0 %v5208_v59  ;;  %v1038_v58 = vld [vmem:[#allocation11 + $0xd38] sm:$0xff]  ;;  %v5423_v59 = vcombine.low %v914_v31, %v918_v5 }
 0x412   :  { %4288 = vmatprep.subr.bf16.mxu1 %v5336_v38  ;;  %v5543_v39 = vcombine.low %v1034_v56, %v1038_v58  ;;  %v882_v11 = vld [vmem:[#allocation11 + $0x858] sm:$0xff] }
 0x413   :  { %v874_v18 = vld [vmem:[#allocation11 + $0x818] sm:$0xff] }
 0x414   :  { %4248 = vmatpush2.bf16.msra.mxu0 %v5207_v10  ;;  %v902_v10 = vld [vmem:[#allocation11 + $0x8f8] sm:$0xff] }
 0x415   :  { %4289 = vmatpush2.bf16.msra.mxu1 %v5335_v37  ;;  %4249 = vmatprep.subr.bf16.mxu0 %v5200_v22  ;;  %v1026_v37 = vld [vmem:[#allocation11 + $0xcd8] sm:$0xff]  ;;  %v5408_v52 = vcombine.high %v898_v41, %v902_v10 }
 0x416   :  { %4290 = vmatprep.subr.bf16.mxu1 %v5328_v20  ;;  %v1030_v22 = vld [vmem:[#allocation11 + $0xcf8] sm:$0xff]  ;;  %v5415_v20 = vcombine.low %v906_v49, %v910_v54 }
 0x417   :  { %v5536_v30 = vcombine.high %v1026_v37, %v1030_v22  ;;  %v5535_v6 = vcombine.low %v1026_v37, %v1030_v22  ;;  %v878_v19 = vld [vmem:[#allocation11 + $0x838] sm:$0xff] }
 0x418   :  { %4250 = vmatpush2.bf16.msra.mxu0 %v5199_v28  ;;  %v894_v28 = vld [vmem:[#allocation11 + $0x8b8] sm:$0xff] }
 0x419   :  { %4291 = vmatpush2.bf16.msra.mxu1 %v5327_v51  ;;  %4251 = vmatprep.subr.bf16.mxu0 %v5192_v62  ;;  %v1018_v51 = vld [vmem:[#allocation11 + $0xc98] sm:$0xff]  ;;  %v5400_v35 = vcombine.high %v890_v1, %v894_v28 }
 0x41a   :  { %4292 = vmatprep.subr.bf16.mxu1 %v5320_v3  ;;  %v1022_v62 = vld [vmem:[#allocation11 + $0xcb8] sm:$0xff]  ;;  %v5407_v3 = vcombine.low %v898_v41, %v902_v10 }
 0x41b   :  { %v5528_v7 = vcombine.high %v1018_v51, %v1022_v62  ;;  %v5527_v15 = vcombine.low %v1018_v51, %v1022_v62  ;;  %v986_v49 = vld [vmem:[#allocation11 + $0xb98] sm:$0xff] }
 0x41c   :  { %4252 = vmatpush2.bf16.msra.mxu0 %v5191_v12  ;;  %v886_v12 = vld [vmem:[#allocation11 + $0x878] sm:$0xff] }
 0x41d   :  { %4293 = vmatpush2.bf16.msra.mxu1 %v5319_v13  ;;  %4303 = vmatprep.subr.bf16.mxu0 %v5440_v8  ;;  %v1010_v13 = vld [vmem:[#allocation11 + $0xc58] sm:$0xff]  ;;  %v5392_v24 = vcombine.high %v882_v11, %v886_v12  ;;  %v5391_v31 = vcombine.low %v882_v11, %v886_v12 }
 0x41e   :  { %4344 = vmatprep.subr.bf16.mxu1 %v5568_v14  ;;  %v1014_v8 = vld [vmem:[#allocation11 + $0xc78] sm:$0xff]  ;;  %v5399_v14 = vcombine.low %v890_v1, %v894_v28 }
 0x41f   :  { %v4009_v21 = vpop.f32.mrf.mxu0  ;;  %4254 = vmatmul.mubr.bf16.vlgmr.msra.gmra.mxu0 %v6331_v9  ;;  %v5519_v5 = vcombine.low %v1010_v13, %v1014_v8  ;;  %v990_v54 = vld [vmem:[#allocation11 + $0xbb8] sm:$0xff] }
 0x420   :  { %v4010_v36 = vadd.f32 %v4009_v21, %v6395_v0  ;;  %v4050_v40 = vpop.f32.mrf.mxu1  ;;  %4295 = vmatmul.mubr.bf16.vlgmr.msra.gmra.mxu1 %v6334_v43  ;;  %4304 = vmatpush1.bf16.msra.mxu0 %v5439_v16  ;;  %v5552_v0 = vcombine.high %v1042_v33, %v1046_v34  ;;  %v5520_v16 = vcombine.high %v1010_v13, %v1014_v8  ;;  %v994_v33 = vld [vmem:[#allocation11 + $0xbd8] sm:$0xff] }
 0x421   :  { %4335 = vmatprep.mubr.bf16.mxu0 %v6337_v48  ;;  %4345 = vmatpush1.bf16.msra.mxu1 %v5567_v25  ;;  %v6404_v44 = vpop.f32.mrf.mxu0  ;;  %v1002_v25 = vld [vmem:[#allocation11 + $0xc18] sm:$0xff]  ;;  %v5384_v21 = vcombine.high %v874_v18, %v878_v19  ;;  %v5495_v41 = vcombine.low %v986_v49, %v990_v54 }
 0x422   :  { %v6406_v17 = vadd.f32 %v4050_v40, %v4010_v36  ;;  %4376 = vmatprep.mubr.bf16.mxu1 %v6343_v57  ;;  %v6409_v9 = vpop.f32.mrf.mxu1  ;;  %4305 = vmatprep.subr.bf16.mxu0 %v5432_v29  ;;  %v5544_v57 = vcombine.high %v1034_v56, %v1038_v58  ;;  %v1006_v29 = vld [vmem:[#allocation11 + $0xc38] sm:$0xff] }
 0x423   :  { %v4013_v43 = vpop.f32.mrf.mxu0  ;;  %4346 = vmatprep.subr.bf16.mxu1 %v5560_v32  ;;  %v5512_v32 = vcombine.high %v1002_v25, %v1006_v29  ;;  %v998_v34 = vld [vmem:[#allocation11 + $0xbf8] sm:$0xff] }
 0x424   :  { %v4054_v48 = vpop.f32.mrf.mxu1  ;;  %4306 = vmatpush1.bf16.msra.mxu0 %v5431_v42  ;;  %v1122_v36 = vld [vmem:[#allocation11 + $0xfd8] sm:$0xff]  ;;  %v5383_v42 = vcombine.low %v874_v18, %v878_v19  ;;  %v5503_v58 = vcombine.low %v994_v33, %v998_v34 }
 0x425   :  { %4347 = vmatpush1.bf16.msra.mxu1 %v5559_v45  ;;  %v4014_v38 = vpop.f32.mrf.mxu0  ;;  %4307 = vmatprep.subr.bf16.mxu0 %v5424_v46  ;;  %v1126_v40 = vld [vmem:[#allocation11 + $0xff8] sm:$0xff]  ;;  %v5511_v45 = vcombine.low %v1002_v25, %v1006_v29  ;;  %v5504_v46 = vcombine.high %v994_v33, %v998_v34 }
 0x426   :  { %v4055_v63 = vpop.f32.mrf.mxu1  ;;  %4348 = vmatprep.subr.bf16.mxu1 %v5552_v0  ;;  %v5632_v0 = vcombine.high %v1122_v36, %v1126_v40  ;;  %v1114_v43 = vld [vmem:[#allocation11 + $0xf98] sm:$0xff]  ;;  %v5631_v48 = vcombine.low %v1122_v36, %v1126_v40 }
 0x427   :  { %v1118_v56 = vld [vmem:[#allocation11 + $0xfb8] sm:$0xff] }
 0x428   :  { %4308 = vmatpush1.bf16.msra.mxu0 %v5423_v59  ;;  %v5496_v59 = vcombine.high %v986_v49, %v990_v54  ;;  %v5624_v38 = vcombine.high %v1114_v43, %v1118_v56  ;;  %v1106_v63 = vld [vmem:[#allocation11 + $0xf58] sm:$0xff]  ;;  %v5623_v10 = vcombine.low %v1114_v43, %v1118_v56  ;;  %v4012_v49 = vadd.f32 %v6404_v44, %v6398_v53 }
 0x429   :  { %4349 = vmatpush1.bf16.msra.mxu1 %v5551_v60  ;;  %4309 = vmatprep.subr.bf16.mxu0 %v5416_v61  ;;  %v978_v60 = vld [vmem:[#allocation11 + $0xb58] sm:$0xff]  ;;  %v4386_v53 = vmax.f32 %v6386_v4, 0.0 }
 0x42a   :  { %4350 = vmatprep.subr.bf16.mxu1 %v5544_v57  ;;  %v982_v61 = vld [vmem:[#allocation11 + $0xb78] sm:$0xff] }
 0x42b   :  { %v1110_v57 = vld [vmem:[#allocation11 + $0xf78] sm:$0xff]  ;;  %v5488_v37 = vcombine.high %v978_v60, %v982_v61  ;;  %v5487_v1 = vcombine.low %v978_v60, %v982_v61  ;;  %v5801_v60 = vld [vmem:[#allocation14 + $0x78] sm:$0xff]  }
 0x42c   :  { %4310 = vmatpush1.bf16.msra.mxu0 %v5415_v20  ;;  %v5616_v22 = vcombine.high %v1106_v63, %v1110_v57  ;;  %v970_v20 = vld [vmem:[#allocation11 + $0xb18] sm:$0xff]  ;;  %v5615_v28 = vcombine.low %v1106_v63, %v1110_v57  ;;  %v5802_v61 = vld [vmem:[#allocation14 + $0xf8] sm:$0xff]  }
 0x42d   :  { %4351 = vmatpush1.bf16.msra.mxu1 %v5543_v39  ;;  %4311 = vmatprep.subr.bf16.mxu0 %v5408_v52  ;;  %v974_v39 = vld [vmem:[#allocation11 + $0xb38] sm:$0xff]  ;;  %v5803_v63 = vld [vmem:[#allocation14 + $0x38] sm:$0xff]  }
 0x42e   :  { %4352 = vmatprep.subr.bf16.mxu1 %v5536_v30  ;;  %v1098_v52 = vld [vmem:[#allocation11 + $0xf18] sm:$0xff]  ;;  %v5480_v51 = vcombine.high %v970_v20, %v974_v39  ;;  %v5479_v11 = vcombine.low %v970_v20, %v974_v39  ;;  %v5804_v57 = vld [vmem:[#allocation14 + $0xb8] sm:$0xff]  }
 0x42f   :  { %v1102_v30 = vld [vmem:[#allocation11 + $0xf38] sm:$0xff] }
 0x430   :  { %4312 = vmatpush1.bf16.msra.mxu0 %v5407_v3  ;;  %v5608_v62 = vcombine.high %v1098_v52, %v1102_v30  ;;  %v962_v3 = vld [vmem:[#allocation11 + $0xad8] sm:$0xff]  ;;  %v5607_v12 = vcombine.low %v1098_v52, %v1102_v30  ;;  %v5809_v30 = vld [vmem:[#allocation14 + $0x68] sm:$0xff]  }
 0x431   :  { %4353 = vmatpush1.bf16.msra.mxu1 %v5535_v6  ;;  %4313 = vmatprep.subr.bf16.mxu0 %v5400_v35  ;;  %v966_v6 = vld [vmem:[#allocation11 + $0xaf8] sm:$0xff] }
 0x432   :  { %4354 = vmatprep.subr.bf16.mxu1 %v5528_v7  ;;  %v1090_v35 = vld [vmem:[#allocation11 + $0xed8] sm:$0xff]  ;;  %v5472_v13 = vcombine.high %v962_v3, %v966_v6  ;;  %v5471_v18 = vcombine.low %v962_v3, %v966_v6  ;;  %v5812_v3 = vld [vmem:[#allocation14 + $0xa8] sm:$0xff]   ;;  %v5813_v6 = vld [vmem:[#allocation14 + $0x60] sm:$0xff]  }
 0x433   :  { %v1094_v7 = vld [vmem:[#allocation11 + $0xef8] sm:$0xff] }
 0x434   :  { %4314 = vmatpush1.bf16.msra.mxu0 %v5399_v14  ;;  %v5600_v8 = vcombine.high %v1090_v35, %v1094_v7  ;;  %v954_v14 = vld [vmem:[#allocation11 + $0xa98] sm:$0xff]  ;;  %v5599_v19 = vcombine.low %v1090_v35, %v1094_v7  ;;  %v5814_v7 = vld [vmem:[#allocation14 + $0xe0] sm:$0xff]  }
 0x435   :  { %4355 = vmatpush1.bf16.msra.mxu1 %v5527_v15  ;;  %4315 = vmatprep.subr.bf16.mxu0 %v5392_v24  ;;  %v958_v15 = vld [vmem:[#allocation11 + $0xab8] sm:$0xff] }
 0x436   :  { %4356 = vmatprep.subr.bf16.mxu1 %v5520_v16  ;;  %v1082_v24 = vld [vmem:[#allocation11 + $0xe98] sm:$0xff]  ;;  %v5464_v25 = vcombine.high %v954_v14, %v958_v15  ;;  %v5463_v33 = vcombine.low %v954_v14, %v958_v15  ;;  %v5819_v14 = vld [vmem:[#allocation14 + $0x18] sm:$0xff]  }
 0x437   :  { %v1086_v16 = vld [vmem:[#allocation11 + $0xeb8] sm:$0xff]  ;;  %v5820_v15 = vld [vmem:[#allocation14 + $0x98] sm:$0xff]  }
 0x438   :  { %4316 = vmatpush1.bf16.msra.mxu0 %v5391_v31  ;;  %v5592_v29 = vcombine.high %v1082_v24, %v1086_v16  ;;  %v946_v31 = vld [vmem:[#allocation11 + $0xa58] sm:$0xff]  ;;  %v5591_v34 = vcombine.low %v1082_v24, %v1086_v16 }
 0x439   :  { %4357 = vmatpush1.bf16.msra.mxu1 %v5519_v5  ;;  %4317 = vmatprep.subr.bf16.mxu0 %v5384_v21  ;;  %v950_v5 = vld [vmem:[#allocation11 + $0xa78] sm:$0xff] }
 0x43a   :  { %4358 = vmatprep.subr.bf16.mxu1 %v5512_v32  ;;  %v1074_v21 = vld [vmem:[#allocation11 + $0xe58] sm:$0xff]  ;;  %v5456_v36 = vcombine.high %v946_v31, %v950_v5  ;;  %v5455_v54 = vcombine.low %v946_v31, %v950_v5  ;;  %v5827_v31 = vld [vmem:[#allocation14 + $0x8] sm:$0xff]  }
 0x43b   :  { %v1078_v32 = vld [vmem:[#allocation11 + $0xe78] sm:$0xff]  ;;  %v5828_v5 = vld [vmem:[#allocation14 + $0x88] sm:$0xff]  }
 0x43c   :  { %4318 = vmatpush1.bf16.msra.mxu0 %v5383_v42  ;;  %v5584_v40 = vcombine.high %v1074_v21, %v1078_v32  ;;  %v938_v42 = vld [vmem:[#allocation11 + $0xa18] sm:$0xff]  ;;  %v5583_v43 = vcombine.low %v1074_v21, %v1078_v32  ;;  %v5829_v21 = vld [vmem:[#allocation14 + $0x40] sm:$0xff]  }
 0x43d   :  { %4359 = vmatpush1.bf16.msra.mxu1 %v5511_v45  ;;  %4319 = vmatprep.subr.bf16.mxu0 %v5504_v46  ;;  %v942_v45 = vld [vmem:[#allocation11 + $0xa38] sm:$0xff]  ;;  %v5830_v32 = vld [vmem:[#allocation14 + $0xc0] sm:$0xff]  }
 0x43e   :  { %4360 = vmatprep.subr.bf16.mxu1 %v5632_v0  ;;  %v1066_v46 = vld [vmem:[#allocation11 + $0xe18] sm:$0xff]  ;;  %v5448_v56 = vcombine.high %v938_v42, %v942_v45 }
 0x43f   :  { %v1070_v0 = vld [vmem:[#allocation11 + $0xe38] sm:$0xff] }
 0x440   :  { %4320 = vmatpush2.bf16.msra.mxu0 %v5503_v58  ;;  %v5576_v58 = vcombine.high %v1066_v46, %v1070_v0  ;;  %v5807_v4 = vld [vmem:[#allocation14 + $0x30] sm:$0xff]  }
 0x441   :  { %4361 = vmatpush2.bf16.msra.mxu1 %v5631_v48  ;;  %4321 = vmatprep.subr.bf16.mxu0 %v5496_v59  ;;  %v4053_v48 = vadd.f32 %v6409_v9, %v4012_v49  ;;  %v5447_v59 = vcombine.low %v938_v42, %v942_v45  ;;  %v5808_v52 = vld [vmem:[#allocation14 + $0xb0] sm:$0xff]   ;;  %v4387_v42 = vmax.f32 %v6406_v17, 0.0  ;;  %v5849_v45 = vld [vmem:[#allocation14 + $0x1f8] sm:$0xff]  }
 0x442   :  { %4362 = vmatprep.subr.bf16.mxu1 %v5624_v38  ;;  %v5575_v38 = vcombine.low %v1066_v46, %v1070_v0  ;;  %v5821_v24 = vld [vmem:[#allocation14 + $0x50] sm:$0xff]   ;;  %v5834_v46 = vld [vmem:[#allocation14 + $0x138] sm:$0xff]  }
 0x443   :  { %v4388_v44 = vmax.f32 %v4053_v48, 0.0  ;;  %v5822_v16 = vld [vmem:[#allocation14 + $0xd0] sm:$0xff]   ;;  %v5853_v48 = vld [vmem:[#allocation14 + $0x1e8] sm:$0xff]  }
 0x444   :  { %4322 = vmatpush2.bf16.msra.mxu0 %v5495_v41  ;;  %v5805_v41 = vld [vmem:[#allocation14 + $0x70] sm:$0xff]  }
 0x445   :  { %4363 = vmatpush2.bf16.msra.mxu1 %v5623_v10  ;;  %4323 = vmatprep.subr.bf16.mxu0 %v5488_v37  ;;  %v4394_v10 = vpack.c.bf16 %v4386_v53, %v4386_v53  ;;  %v5806_v37 = vld [vmem:[#allocation14 + $0xf0] sm:$0xff]   ;;  %v5840_v53 = vld [vmem:[#allocation14 + $0x120] sm:$0xff]  }
 0x446   :  { %4364 = vmatprep.subr.bf16.mxu1 %v5616_v22  ;;  %v4396_v22 = vpack.c.bf16 %v4388_v44, %v4388_v44  ;;  %v5835_v49 = vld [vmem:[#allocation14 + $0x170] sm:$0xff]   ;;  %v5841_v44 = vld [vmem:[#allocation14 + $0x158] sm:$0xff]  }
 0x447   :  { %v5852_v17 = vld [vmem:[#allocation14 + $0x1b0] sm:$0xff]  }
 0x448   :  { %4324 = vmatpush2.bf16.msra.mxu0 %v5487_v1 }
 0x449   :  { %4365 = vmatpush2.bf16.msra.mxu1 %v5615_v28  ;;  %4325 = vmatprep.subr.bf16.mxu0 %v5480_v51  ;;  %v5810_v28 = vld [vmem:[#allocation14 + $0xe8] sm:$0xff]  }
 0x44a   :  { %4366 = vmatprep.subr.bf16.mxu1 %v5608_v62  ;;  %v5811_v62 = vld [vmem:[#allocation14 + $0x28] sm:$0xff]  }
 0x44c   :  { %4326 = vmatpush2.bf16.msra.mxu0 %v5479_v11  ;;  %v5815_v11 = vld [vmem:[#allocation14 + $0x20] sm:$0xff]  }
 0x44d   :  { %4367 = vmatpush2.bf16.msra.mxu1 %v5607_v12  ;;  %4327 = vmatprep.subr.bf16.mxu0 %v5472_v13  ;;  %v5816_v12 = vld [vmem:[#allocation14 + $0xa0] sm:$0xff]   ;;  %v5817_v13 = vld [vmem:[#allocation14 + $0x58] sm:$0xff]  }
 0x44e   :  { %4368 = vmatprep.subr.bf16.mxu1 %v5600_v8  ;;  %v5818_v8 = vld [vmem:[#allocation14 + $0xd8] sm:$0xff]  }
 0x450   :  { %4328 = vmatpush2.bf16.msra.mxu0 %v5471_v18  ;;  %v5823_v18 = vld [vmem:[#allocation14 + $0x10] sm:$0xff]  }
 0x451   :  { %4369 = vmatpush2.bf16.msra.mxu1 %v5599_v19  ;;  %4329 = vmatprep.subr.bf16.mxu0 %v5464_v25  ;;  %v5824_v19 = vld [vmem:[#allocation14 + $0x90] sm:$0xff]   ;;  %v5825_v25 = vld [vmem:[#allocation14 + $0x48] sm:$0xff]  }
 0x452   :  { %4370 = vmatprep.subr.bf16.mxu1 %v5592_v29  ;;  %v5826_v29 = vld [vmem:[#allocation14 + $0xc8] sm:$0xff]  }
 0x454   :  { %4330 = vmatpush2.bf16.msra.mxu0 %v5463_v33  ;;  %v5831_v33 = vld [vmem:[#allocation14] sm:$0xff]  }
 0x455   :  { %4371 = vmatpush2.bf16.msra.mxu1 %v5591_v34  ;;  %4331 = vmatprep.subr.bf16.mxu0 %v5456_v36  ;;  %v4385_v34 = vmax.f32 %v6382_v27, 0.0  ;;  %v5832_v36 = vld [vmem:[#allocation14 + $0x80] sm:$0xff]   ;;  %v5836_v27 = vld [vmem:[#allocation14 + $0x130] sm:$0xff]  }
 0x456   :  { %4372 = vmatprep.subr.bf16.mxu1 %v5584_v40  ;;  %v5833_v40 = vld [vmem:[#allocation14 + $0x178] sm:$0xff]  }
 0x457   :  { %v4393_v0 = vpack.c.bf16 %v4385_v34, %v4385_v34 }
 0x458   :  { %4332 = vmatpush2.bf16.msra.mxu0 %v5455_v54  ;;  %v5850_v54 = vld [vmem:[#allocation14 + $0x1b8] sm:$0xff]  }
 0x459   :  { %4373 = vmatpush2.bf16.msra.mxu1 %v5583_v43  ;;  %4333 = vmatprep.subr.bf16.mxu0 %v5448_v56  ;;  %v4395_v43 = vpack.c.bf16 %v4387_v42, %v4387_v42  ;;  %v5851_v56 = vld [vmem:[#allocation14 + $0x1f0] sm:$0xff]  }
 0x45a   :  { %4374 = vmatprep.subr.bf16.mxu1 %v5576_v58  ;;  %v5837_v58 = vld [vmem:[#allocation14 + $0x168] sm:$0xff]  }
 0x45c   :  { %4334 = vmatpush2.bf16.msra.mxu0 %v5447_v59  ;;  %v5838_v59 = vld [vmem:[#allocation14 + $0x128] sm:$0xff]  }
 0x45d   :  { %4375 = vmatpush2.bf16.msra.mxu1 %v5575_v38  ;;  %5698 = vmatprep.subr.bf16.mxu0 %v5801_v60  ;;  %v5839_v38 = vld [vmem:[#allocation14 + $0x160] sm:$0xff]   ;;  %v5854_v60 = vld [vmem:[#allocation14 + $0x1a8] sm:$0xff]  }
 0x45e   :  { %5720 = vmatprep.subr.bf16.mxu1 %v5802_v61  ;;  %v5855_v61 = vld [vmem:[#allocation14 + $0x1e0] sm:$0xff]  }
 0x45f   :  { %v6415_v9 = vpop.f32.mrf.mxu0  ;;  %4336 = vmatmul.mubr.bf16.vlgmr.msra.gmra.mxu0 %v6352_v26 }
 0x460   :  { %v6418_v20 = vpop.f32.mrf.mxu1  ;;  %4377 = vmatmul.mubr.bf16.vlgmr.msra.gmra.mxu1 %v6354_v23  ;;  %5699 = vmatpush3.bf16.msra.mxu0 %v5803_v63  ;;  %v5856_v63 = vld [vmem:[#allocation14 + $0x1a0] sm:$0xff]  }
 0x461   :  { %4952 = vmatprep.mubr.bf16.mxu0 %v4394_v10  ;;  %5721 = vmatpush3.bf16.msra.mxu1 %v5804_v57  ;;  %v6421_v39 = vpop.f32.mrf.mxu0  ;;  %v5857_v57 = vld [vmem:[#allocation14 + $0x1d8] sm:$0xff]   ;;  %v5843_v10 = vld [vmem:[#allocation14 + $0x150] sm:$0xff]  }
 0x462   :  { %4992 = vmatprep.mubr.bf16.mxu1 %v4396_v22  ;;  %v6423_v1 = vpop.f32.mrf.mxu1  ;;  %5700 = vmatprep.subr.bf16.mxu0 %v5805_v41  ;;  %v5842_v41 = vld [vmem:[#allocation14 + $0x118] sm:$0xff]   ;;  %v5844_v22 = vld [vmem:[#allocation14 + $0x110] sm:$0xff]  }
 0x463   :  { %v4095_v26 = vpop.f32.mrf.mxu0  ;;  %5722 = vmatprep.subr.bf16.mxu1 %v5806_v37  ;;  %v5858_v37 = vld [vmem:[#allocation14 + $0x198] sm:$0xff]  }
 0x464   :  { %v4136_v51 = vpop.f32.mrf.mxu1  ;;  %5701 = vmatpush3.bf16.msra.mxu0 %v5807_v4  ;;  %v5845_v4 = vld [vmem:[#allocation14 + $0x148] sm:$0xff]  }
 0x465   :  { %5723 = vmatpush3.bf16.msra.mxu1 %v5808_v52  ;;  %v4096_v23 = vpop.f32.mrf.mxu0  ;;  %5702 = vmatprep.subr.bf16.mxu0 %v5809_v30  ;;  %v5846_v52 = vld [vmem:[#allocation14 + $0x108] sm:$0xff]   ;;  %v5847_v30 = vld [vmem:[#allocation14 + $0x140] sm:$0xff]  }
 0x466   :  { %v4137_v35 = vpop.f32.mrf.mxu1  ;;  %5724 = vmatprep.subr.bf16.mxu1 %v5810_v28  ;;  %v5885_v28 = vld [vmem:[#allocation13] sm:$0xff] }
 0x467   :  { %v1148_v26 = vrot.slane %v5885_v28, %v6205_v47  ;;  %v1152_v51 = vrot.slane %v5885_v28, %v6208_v50  ;;  %v5859_v50 = vld [vmem:[#allocation14 + $0x1d0] sm:$0xff]  }
 0x468   :  { %5703 = vmatpush3.bf16.msra.mxu0 %v5811_v62  ;;  %v5848_v62 = vld [vmem:[#allocation14 + $0x100] sm:$0xff]  }
 0x469   :  { %5725 = vmatpush3.bf16.msra.mxu1 %v5812_v3  ;;  %5704 = vmatprep.subr.bf16.mxu0 %v5813_v6  ;;  %v4092_v23 = vadd.f32 %v6415_v9, %v1148_v26  ;;  %v4094_v3 = vadd.f32 %v6421_v39, %v1152_v51 }
 0x46a   :  { %5726 = vmatprep.subr.bf16.mxu1 %v5814_v7 }
 0x46b   :  { %v4133_v6 = vadd.f32 %v6418_v20, %v4092_v23  ;;  %v4135_v7 = vadd.f32 %v6423_v1, %v4094_v3 }
 0x46c   :  { %5705 = vmatpush3.bf16.msra.mxu0 %v5815_v11 }
 0x46d   :  { %5727 = vmatpush3.bf16.msra.mxu1 %v5816_v12  ;;  %5706 = vmatprep.subr.bf16.mxu0 %v5817_v13 }
 0x46e   :  { %5728 = vmatprep.subr.bf16.mxu1 %v5818_v8 }
 0x470   :  { %5707 = vmatpush3.bf16.msra.mxu0 %v5819_v14 }
 0x471   :  { %5729 = vmatpush3.bf16.msra.mxu1 %v5820_v15  ;;  %5708 = vmatprep.subr.bf16.mxu0 %v5821_v24  ;;  %v5860_v24 = vld [vmem:[#allocation14 + $0x190] sm:$0xff]  }
 0x472   :  { %5730 = vmatprep.subr.bf16.mxu1 %v5822_v16 }
 0x474   :  { %5709 = vmatpush3.bf16.msra.mxu0 %v5823_v18 }
 0x475   :  { %5731 = vmatpush3.bf16.msra.mxu1 %v5824_v19  ;;  %5710 = vmatprep.subr.bf16.mxu0 %v5825_v25  ;;  %v5861_v25 = vld [vmem:[#allocation14 + $0x1c8] sm:$0xff]  }
 0x476   :  { %5732 = vmatprep.subr.bf16.mxu1 %v5826_v29  ;;  %v5862_v29 = vld [vmem:[#allocation14 + $0x188] sm:$0xff]  }
 0x478   :  { %5711 = vmatpush3.bf16.msra.mxu0 %v5827_v31  ;;  %v5863_v31 = vld [vmem:[#allocation14 + $0x1c0] sm:$0xff]  }
 0x479   :  { %5733 = vmatpush3.bf16.msra.mxu1 %v5828_v5  ;;  %5712 = vmatprep.subr.bf16.mxu0 %v5829_v21  ;;  %v5864_v21 = vld [vmem:[#allocation14 + $0x180] sm:$0xff]  }
 0x47a   :  { %5734 = vmatprep.subr.bf16.mxu1 %v5830_v32 }
 0x47c   :  { %5713 = vmatpush3.bf16.msra.mxu0 %v5831_v33 }
 0x47d   :  { %5735 = vmatpush3.bf16.msra.mxu1 %v5832_v36  ;;  %5742 = vmatprep.subr.bf16.mxu0 %v5833_v40 }
 0x47e   :  { %5764 = vmatprep.subr.bf16.mxu1 %v5849_v45 }
 0x47f   :  { %4953 = vmatmul.mubr.bf16.vlgmr.msra.gmra.mxu0 %v4393_v0  ;;  %v1156_v0 = vrot.slane %v5885_v28, %v6216_v55 }
 0x480   :  { %4993 = vmatmul.mubr.bf16.vlgmr.msra.gmra.mxu1 %v4395_v43  ;;  %5743 = vmatpush3.bf16.msra.mxu0 %v5834_v46 }
 0x481   :  { %5744 = vmatprep.subr.bf16.mxu0 %v5835_v49  ;;  %5765 = vmatpush3.bf16.msra.mxu1 %v5850_v54  ;;  %v1160_v49 = vrot.slane %v5885_v28, %v6226_v2 }
 0x482   :  { %5766 = vmatprep.subr.bf16.mxu1 %v5851_v56 }
 0x484   :  { %5745 = vmatpush3.bf16.msra.mxu0 %v5836_v27 }
 0x485   :  { %5746 = vmatprep.subr.bf16.mxu0 %v5837_v58  ;;  %5767 = vmatpush3.bf16.msra.mxu1 %v5852_v17 }
 0x486   :  { %5768 = vmatprep.subr.bf16.mxu1 %v5853_v48 }
 0x488   :  { %5747 = vmatpush3.bf16.msra.mxu0 %v5838_v59 }
 0x489   :  { %5748 = vmatprep.subr.bf16.mxu0 %v5839_v38  ;;  %5769 = vmatpush3.bf16.msra.mxu1 %v5854_v60 }
 0x48a   :  { %5770 = vmatprep.subr.bf16.mxu1 %v5855_v61 }
 0x48c   :  { %5749 = vmatpush3.bf16.msra.mxu0 %v5840_v53 }
 0x48d   :  { %5750 = vmatprep.subr.bf16.mxu0 %v5841_v44  ;;  %5771 = vmatpush3.bf16.msra.mxu1 %v5856_v63 }
 0x48e   :  { %5772 = vmatprep.subr.bf16.mxu1 %v5857_v57 }
 0x490   :  { %5751 = vmatpush3.bf16.msra.mxu0 %v5842_v41 }
 0x491   :  { %5752 = vmatprep.subr.bf16.mxu0 %v5843_v10  ;;  %5773 = vmatpush3.bf16.msra.mxu1 %v5858_v37 }
 0x492   :  { %5774 = vmatprep.subr.bf16.mxu1 %v5859_v50 }
 0x494   :  { %5753 = vmatpush3.bf16.msra.mxu0 %v5844_v22 }
 0x495   :  { %5754 = vmatprep.subr.bf16.mxu0 %v5845_v4  ;;  %5775 = vmatpush3.bf16.msra.mxu1 %v5860_v24 }
 0x496   :  { %5776 = vmatprep.subr.bf16.mxu1 %v5861_v25 }
 0x498   :  { %5755 = vmatpush3.bf16.msra.mxu0 %v5846_v52  ;;  %v5633_v52 = vld [vmem:[#allocation16] ss:$0 sm:$0xff] }
 0x499   :  { %5756 = vmatprep.subr.bf16.mxu0 %v5847_v30  ;;  %5777 = vmatpush3.bf16.msra.mxu1 %v5862_v29 }
 0x49a   :  { %5778 = vmatprep.subr.bf16.mxu1 %v5863_v31 }
 0x49c   :  { %5757 = vmatpush3.bf16.msra.mxu0 %v5848_v62 }
 0x49d   :  { %5779 = vmatpush3.bf16.msra.mxu1 %v5864_v21 }
 0x49f   :  { %v4173_v35 = vpop.f32.mrf.mxu0 }
 0x4a0   :  { %v4174_v11 = vadd.f32 %v4173_v35, %v4133_v6  ;;  %v4214_v12 = vpop.f32.mrf.mxu1 }
 0x4a1   :  { %v4175_v13 = vpop.f32.mrf.mxu0 }
 0x4a2   :  { %v4215_v8 = vadd.f32 %v4214_v12, %v4174_v11  ;;  %v4176_v47 = vadd.f32 %v4175_v13, %v4135_v7  ;;  %v4216_v14 = vpop.f32.mrf.mxu1 }
 0x4a3   :  { %v4177_v15 = vpop.f32.mrf.mxu0 }
 0x4a4   :  { %v4217_v16 = vadd.f32 %v4216_v14, %v4176_v47  ;;  %v4218_v18 = vpop.f32.mrf.mxu1  ;;  %v4389_v9 = vmax.f32 %v4215_v8, 0.0 }
 0x4a5   :  { %v4178_v39 = vpop.f32.mrf.mxu0 }
 0x4a6   :  { %v4390_v19 = vmax.f32 %v4217_v16, 0.0  ;;  %v4219_v20 = vpop.f32.mrf.mxu1  ;;  %v4397_v5 = vpack.c.bf16 %v4389_v9, %v4389_v9 }
 0x4a8   :  { %v4398_v1 = vpack.c.bf16 %v4390_v19, %v4390_v19 }
 0x4aa   :  { %5032 = vmatprep.mubr.bf16.mxu0 %v4398_v1 }
 0x4ab   :  { %5033 = vmatmul.mubr.bf16.vlgmr.msra.gmra.mxu0 %v4397_v5 }
 0x4df   :  { %v4255_v32 = vpop.f32.mrf.mxu0 }
 0x4e0   :  { %v4296_v33 = vpop.f32.mrf.mxu1  ;;  %v4256_v54 = vadd.f32 %v4255_v32, %v1156_v0 }
 0x4e1   :  { %v4257_v34 = vpop.f32.mrf.mxu0 }
 0x4e2   :  { %v4298_v36 = vpop.f32.mrf.mxu1  ;;  %v4258_v43 = vadd.f32 %v4257_v34, %v1160_v49  ;;  %v4297_v56 = vadd.f32 %v4296_v33, %v4256_v54 }
 0x4e3   :  { %v4259_v40 = vpop.f32.mrf.mxu0 }
 0x4e4   :  { %v4300_v42 = vpop.f32.mrf.mxu1  ;;  %v4299_v58 = vadd.f32 %v4298_v36, %v4258_v43 }
 0x4e5   :  { %v4260_v45 = vpop.f32.mrf.mxu0 }
 0x4e6   :  { %v4301_v46 = vpop.f32.mrf.mxu1 }
 0x51f   :  { %v4337_v27 = vpop.f32.mrf.mxu0 }
 0x520   :  { %v4338_v17 = vadd.f32 %v4337_v27, %v4297_v56  ;;  %v4378_v48 = vpop.f32.mrf.mxu1 }
 0x521   :  { %v4339_v59 = vpop.f32.mrf.mxu0 }
 0x522   :  { %v4379_v38 = vadd.f32 %v4378_v48, %v4338_v17  ;;  %v4340_v60 = vadd.f32 %v4339_v59, %v4299_v58  ;;  %v4380_v61 = vpop.f32.mrf.mxu1 }
 0x523   :  { %v4341_v53 = vpop.f32.mrf.mxu0 }
 0x524   :  { %v4381_v44 = vadd.f32 %v4380_v61, %v4340_v60  ;;  %v4382_v63 = vpop.f32.mrf.mxu1  ;;  %v4391_v57 = vmax.f32 %v4379_v38, 0.0 }
 0x525   :  { %v4342_v41 = vpop.f32.mrf.mxu0 }
 0x526   :  { %v4392_v10 = vmax.f32 %v4381_v44, 0.0  ;;  %v4383_v55 = vpop.f32.mrf.mxu1  ;;  %v4399_v2 = vpack.c.bf16 %v4391_v57, %v4391_v57 }
 0x528   :  { %v4400_v37 = vpack.c.bf16 %v4392_v10, %v4392_v10 }
 0x52a   :  { %5072 = vmatprep.mubr.bf16.mxu1 %v4400_v37 }
 0x52b   :  { %5073 = vmatmul.mubr.bf16.vlgmr.msra.gmra.mxu1 %v4399_v2 }
 0x53f   :  { %v5714_v22 = vpop.f32.mrf.mxu0 }
 0x540   :  { %v5736_v4 = vpop.f32.mrf.mxu1 }
 0x541   :  { %v5715_v30 = vpop.f32.mrf.mxu0 }
 0x542   :  { %v5716_v28 = vadd.f32 %v5715_v30, %v5714_v22  ;;  %v5737_v26 = vpop.f32.mrf.mxu1 }
 0x543   :  { %v5738_v51 = vadd.f32 %v5737_v26, %v5736_v4  ;;  %v5717_v62 = vpop.f32.mrf.mxu0 }
 0x544   :  { %v4955_v23 = vadd.f32 %v5716_v28, %v5633_v52  ;;  %v5739_v3 = vpop.f32.mrf.mxu1 }
 0x545   :  { %v5718_v6 = vpop.f32.mrf.mxu0 }
 0x546   :  { %v4995_v35 = vadd.f32 %v5738_v51, %v4955_v23  ;;  %v5740_v7 = vpop.f32.mrf.mxu1 }
 0x56b   :  { %v5758_v11 = vpop.f32.mrf.mxu0 }
 0x56d   :  { %v5759_v12 = vpop.f32.mrf.mxu0 }
 0x56e   :  { %v5760_v13 = vadd.f32 %v5759_v12, %v5758_v11 }
 0x56f   :  { %v5761_v8 = vpop.f32.mrf.mxu0 }
 0x570   :  { %v5035_v47 = vadd.f32 %v5760_v13, %v4995_v35 }
 0x571   :  { %v5762_v14 = vpop.f32.mrf.mxu0 }
 0x5eb   :  { %v5780_v50 = vpop.f32.mrf.mxu1 }
 0x5ed   :  { %v5781_v15 = vpop.f32.mrf.mxu1 }
 0x5ee   :  { %v5782_v24 = vadd.f32 %v5781_v15, %v5780_v50 }
 0x5ef   :  { %v5783_v16 = vpop.f32.mrf.mxu1 }
 0x5f0   :  { %v5075_v18 = vadd.f32 %v5782_v24, %v5035_v47 }
 0x5f1   :  { %v5784_v9 = vpop.f32.mrf.mxu1 }
 0x5f2   :  { %5883 = vtanh.f32 %v5075_v18 }
 0x5ff   :  { %v5884_v39 = vpop.eup %5883 }
 0x600   :  { %5081 = vst [vmem:[#allocation17] sm:$0xff] %v5884_v39 }
 0x601   :  { %6077 = shalt.err (!%p6074_p7)
}
 0x602   :  { %5091 = dma.vmem_to_hbm [thread:$0]  %s5089_s8, 128, %s6447_s9, [#allocation4]  }
 0x603   :  { %6096 = dma.done.wait [#allocation4], 128  }
 0x604   :  { %6097 = vsyncadd [#allocation4], 4294967168 }
 0x605   :  { %5095 = vsyncpa [#allocation3], 1 }
 0x606   :  { %5096 = vsyncpa [#allocation6], 1 }
 0x607   :  { %5097 = vsyncpa [#allocation9], 1 }
 0x608   :  { %5098 = vsyncpa [#allocation12], 1 }
 0x609   :  { %5099 = vsyncpa [#allocation15], 1 }
 0x60a   :  { %5100 = vsyncpa [#allocation4], 1 }

</bundles_post_ra>
